<compile_context>
chip_gen: v6e
topology: v6e:2x2x1
jax: 0.10.0
libtpu: 0.0.40
codegen_flags: <defaults>
</compile_context>

<pallas_src>
import functools
import math

import jax
import jax.numpy as jnp
from jax.experimental import pallas as pl
from jax.experimental.pallas import tpu as pltpu


# --------------------------------------------------------------------------
# In-kernel building blocks (pure jnp, traced inside the Pallas kernel body).
# --------------------------------------------------------------------------
def _layer_norm(x, gamma, beta, eps=1e-5):
    # one-pass variance: var = E[x^2] - mean^2  (halves the data passes)
    mean = jnp.mean(x, axis=-1, keepdims=True)
    mean_sq = jnp.mean(x * x, axis=-1, keepdims=True)
    var = mean_sq - mean * mean
    return (x - mean) * jax.lax.rsqrt(var + eps) * gamma + beta


def _mha(q_rows, k_rows, v_rows, mask2d, wo, bo, *, num_heads, block_b, Lq, Lk):
    """Multi-head attention on projected row slabs.

    q_rows : (bb*Lq, D) f32   k_rows/v_rows : (bb*Lk, D) f32
    mask2d : (bb*Lq, Lk) f32, 1.0 visible / 0.0 masked
    wo     : (D, D) bf16      bo : (1, D) f32
    All matmuls take bf16 operands and accumulate in f32 on the MXU.
    """
    D = q_rows.shape[-1]
    H = num_heads
    hd = D // H
    bb = block_b
    scale = 1.0 / math.sqrt(hd)
    bf16 = jnp.bfloat16
    f32 = jnp.float32

    def split_heads(rows, L):
        # (bb*L, D) -> (H*bb, L, hd); single transpose per tensor (not per b).
        r3 = rows.reshape(bb * L, H, hd)
        r3 = pltpu.einshape("mhd->hmd", r3)          # (H, bb*L, hd)
        return r3.reshape(H * bb, L, hd)             # layout-free (L % 8 == 0)

    qh = split_heads(q_rows, Lq)
    kh = split_heads(k_rows, Lk)
    vh = split_heads(v_rows, Lk)

    # One batched MXU contraction over all (batch, head) pairs.
    s = jnp.einsum("bqd,bkd->bqk", qh.astype(bf16), kh.astype(bf16),
                   preferred_element_type=f32) * scale      # (H*bb, Lq, Lk)

    # Mask + softmax on the (H, bb*Lq, Lk) view so the mask broadcasts over
    # heads without tiling (reshape is layout-free: Lq % 8 == 0).
    sv = s.reshape(H, bb * Lq, Lk)
    sv = jnp.where(mask2d[None, :, :] != 0.0, sv, -10000.0)  # masked_fill semantics
    sv = sv - jnp.max(sv, axis=-1, keepdims=True)
    p = jnp.exp(sv)
    p = p * pl.reciprocal(jnp.sum(p, axis=-1, keepdims=True), approx=True)
    p = p.reshape(H * bb, Lq, Lk)

    ctx = jnp.einsum("bqk,bkd->bqd", p.astype(bf16), vh.astype(bf16),
                     preferred_element_type=f32)             # (H*bb, Lq, hd)

    # (H*bb, Lq, hd) -> (bb*Lq, D)
    ctx = ctx.reshape(H, bb * Lq, hd)
    ctx = pltpu.einshape("hmd->mhd", ctx)                    # (bb*Lq, H, hd)
    ctx = ctx.reshape(bb * Lq, D)

    return jnp.dot(ctx.astype(bf16), wo, preferred_element_type=f32) + bo


# --------------------------------------------------------------------------
# Pallas kernel: one grid step processes block_b batch elements end-to-end.
# --------------------------------------------------------------------------
def decoder_layer_kernel(
    x_ref, mem_ref, tmask_ref, smask_ref,
    sa_wqkv, sa_wo, sa_bo,
    ca_wq, ca_wkv, ca_wo, ca_bo,
    ffn_w1, ffn_b1, ffn_w2, ffn_b2,
    n1_g, n1_b, n2_g, n2_b, n3_g, n3_b,
    out_ref, *, num_heads, block_b):
    bb = block_b
    _, Lt, D = x_ref.shape
    Ls = mem_ref.shape[1]
    bf16 = jnp.bfloat16
    f32 = jnp.float32

    x = x_ref[...].reshape(bb * Lt, D)                    # f32 row slab, M = bb*Lt
    mem_bf = mem_ref[...].reshape(bb * Ls, D).astype(bf16)

    # masks arrive as compact bf16 0/1 tensors; expand to f32 row slabs.
    tmask2d = tmask_ref[...].astype(f32).reshape(bb * Lt, Lt)
    smask2d = jnp.broadcast_to(smask_ref[...].astype(f32),
                               (bb, Lt, Ls)).reshape(bb * Lt, Ls)

    # --- self attention (fused QKV projection, N = 3D) + residual + norm1 ---
    qkv = jnp.dot(x.astype(bf16), sa_wqkv[...], preferred_element_type=f32)
    attn = _mha(qkv[:, :D], qkv[:, D:2 * D], qkv[:, 2 * D:],
                tmask2d, sa_wo[...], sa_bo[...],
                num_heads=num_heads, block_b=bb, Lq=Lt, Lk=Lt)
    x = _layer_norm(x + attn, n1_g[...], n1_b[...])

    # --- cross attention (fused KV projection, N = 2D) + residual + norm2 ---
    q = jnp.dot(x.astype(bf16), ca_wq[...], preferred_element_type=f32)
    kv = jnp.dot(mem_bf, ca_wkv[...], preferred_element_type=f32)
    cattn = _mha(q, kv[:, :D], kv[:, D:],
                 smask2d, ca_wo[...], ca_bo[...],
                 num_heads=num_heads, block_b=bb, Lq=Lt, Lk=Ls)
    x = _layer_norm(x + cattn, n2_g[...], n2_b[...])

    # --- FFN (D -> d_ff -> D, ReLU) + residual + norm3 ---
    h = jnp.dot(x.astype(bf16), ffn_w1[...], preferred_element_type=f32) + ffn_b1[...]
    h = jnp.maximum(h, 0.0)
    f = jnp.dot(h.astype(bf16), ffn_w2[...], preferred_element_type=f32) + ffn_b2[...]
    x = _layer_norm(x + f, n3_g[...], n3_b[...])

    out_ref[...] = x.reshape(bb, Lt, D)


# --------------------------------------------------------------------------
# Wrapper: per-generation tiling / VMEM budget, fused weights, mask packing.
# --------------------------------------------------------------------------
def _device_kind():
    try:
        return jax.devices()[0].device_kind.lower()
    except Exception:
        return ""


def _vmem_bytes_per_step(bb, Lt, Ls, D, d_ff, H, params_bytes):
    f32b, bf16b = 4, 2
    rows_t, rows_s = bb * Lt, bb * Ls
    Lk = max(Lt, Ls)
    est = 0
    # double-buffered pipelined operands (inputs, masks, output, weights)
    est += 2 * (rows_t * D + rows_s * D) * f32b
    est += 2 * (bb * Lt * Lt + bb * Ls) * bf16b
    est += 2 * rows_t * D * f32b
    est += 2 * params_bytes
    # live f32 intermediates inside the body
    est += (rows_t * 3 * D + rows_s * 2 * D) * f32b      # fused qkv / kv slabs
    est += 3 * (rows_t + rows_s) * D * f32b              # head-split copies
    est += 2 * H * bb * Lt * Lk * f32b                   # scores + probabilities
    est += rows_t * d_ff * f32b                          # FFN hidden
    return est


def _pick_block_b(B, Lt, Ls, D, d_ff, H, params_bytes, vmem_limit,
                  target_rows, need_two_steps):
    budget = int(vmem_limit * 0.75)                      # headroom for spills/frag
    divisors = [d for d in range(1, B + 1) if B % d == 0]
    fitting = [d for d in divisors
               if _vmem_bytes_per_step(d, Lt, Ls, D, d_ff, H, params_bytes) <= budget]
    if not fitting:
        fitting = [1]
    reaching = [d for d in fitting if d * Lt >= target_rows]
    bb = reaching[0] if reaching else fitting[-1]
    if need_two_steps and B >= 2 and B // bb < 2:
        halved = [d for d in fitting if d <= B // 2]
        if halved:
            bb = halved[-1]                              # keep both v7x TCs busy
    return bb


def decoder_layer(x, memory, tgt_mask, src_mask, params, num_heads,
                  *, block_b=None):
    B, Lt, D = x.shape
    _, Ls, _ = memory.shape
    d_ff = params["ffn_w1"].shape[1]

    assert D % num_heads == 0, "d_model must be divisible by num_heads"
    assert D % 128 == 0, "d_model must be a multiple of 128 (lane-dense)"
    assert Lt % 8 == 0 and Ls % 8 == 0, \
        "sequence lengths must be multiples of 8 for layout-free reshapes"
    if tgt_mask.ndim == 4:
        assert tgt_mask.shape[1] == 1, "per-head target masks are not supported"
    if src_mask.ndim == 4:
        assert src_mask.shape[1] == 1, "per-head source masks are not supported"

    # Masks DMA'd as compact bf16 0/1 tensors (expanded to f32 in-kernel).
    tmask = tgt_mask.reshape(B, Lt, Lt).astype(jnp.bfloat16)
    smask = src_mask.reshape(B, 1, Ls).astype(jnp.bfloat16)

    # Fuse Q|K|V (self) and K|V (cross) weights along N -> bigger MXU N-fill.
    sa_wqkv = jnp.concatenate(
        [params["sa_wq"], params["sa_wk"], params["sa_wv"]], axis=1)
    ca_wkv = jnp.concatenate([params["ca_wk"], params["ca_wv"]], axis=1)

    param_arrays = [
        sa_wqkv, params["sa_wo"], params["sa_bo"],
        params["ca_wq"], ca_wkv, params["ca_wo"], params["ca_bo"],
        params["ffn_w1"], params["ffn_b1"], params["ffn_w2"], params["ffn_b2"],
        params["n1_g"], params["n1_b"], params["n2_g"], params["n2_b"],
        params["n3_g"], params["n3_b"],
    ]
    params_bytes = sum(int(a.size) * a.dtype.itemsize for a in param_arrays)

    # Per-generation budgets: v7x has 64 MiB VMEM + 2 TCs; v5e wants M>=128.
    kind = _device_kind()
    is_v7 = ("v7" in kind) or ("7x" in kind)
    is_v5 = "v5" in kind
    vmem_limit = (48 if is_v7 else 96) * 1024 * 1024
    target_rows = 128 if is_v5 else 256

    if block_b is None:
        block_b = _pick_block_b(B, Lt, Ls, D, d_ff, num_heads, params_bytes,
                                vmem_limit, target_rows, need_two_steps=is_v7)
    assert B % block_b == 0, "block_b must divide B"

    def full_spec(arr):
        nd = arr.ndim
        return pl.BlockSpec(arr.shape, lambda b, _nd=nd: (0,) * _nd)

    in_specs = [
        pl.BlockSpec((block_b, Lt, D), lambda b: (b, 0, 0)),     # x
        pl.BlockSpec((block_b, Ls, D), lambda b: (b, 0, 0)),     # memory
        pl.BlockSpec((block_b, Lt, Lt), lambda b: (b, 0, 0)),    # tgt mask (bf16)
        pl.BlockSpec((block_b, 1, Ls), lambda b: (b, 0, 0)),     # src mask (bf16)
    ] + [full_spec(a) for a in param_arrays]

    out_spec = pl.BlockSpec((block_b, Lt, D), lambda b: (b, 0, 0))

    kernel = functools.partial(decoder_layer_kernel,
                               num_heads=num_heads, block_b=block_b)

    return pl.pallas_call(
        kernel,
        out_shape=jax.ShapeDtypeStruct((B, Lt, D), jnp.float32),
        grid=(B // block_b,),
        in_specs=in_specs,
        out_specs=out_spec,
        compiler_params=pltpu.CompilerParams(
            dimension_semantics=("parallel",),
            vmem_limit_bytes=vmem_limit),
    )(x, memory, tmask, smask, *param_arrays)


# --------------------------------------------------------------------------
# Independent pure-JAX reference (mirrors the PyTorch ops, bf16 operands with
# f32 accumulation, exact softmax division).
# --------------------------------------------------------------------------
def decoder_layer_ref(x, memory, tgt_mask, src_mask, params, num_heads):
    bf = jnp.bfloat16
    f32 = jnp.float32

    def linear(a, w, b=None):
        y = jnp.einsum('bld,df->blf', a.astype(bf), w, preferred_element_type=f32)
        return y if b is None else y + b

    def mha(q_in, kv_in, mask, wq, wk, wv, wo, bo):
        B, Lq, D = q_in.shape
        Lk = kv_in.shape[1]
        H = num_heads
        hd = D // H
        scale = 1.0 / math.sqrt(hd)
        q = linear(q_in, wq).reshape(B, Lq, H, hd).transpose(0, 2, 1, 3)
        k = linear(kv_in, wk).reshape(B, Lk, H, hd).transpose(0, 2, 1, 3)
        v = linear(kv_in, wv).reshape(B, Lk, H, hd).transpose(0, 2, 1, 3)
        s = jnp.einsum('bhqd,bhkd->bhqk', q.astype(bf), k.astype(bf),
                       preferred_element_type=f32) * scale
        s = jnp.where(mask == 0, -10000.0, s)
        p = jax.nn.softmax(s, axis=-1)
        ctx = jnp.einsum('bhqk,bhkd->bhqd', p.astype(bf), v.astype(bf),
                         preferred_element_type=f32)
        ctx = ctx.transpose(0, 2, 1, 3).reshape(B, Lq, D)
        return linear(ctx, wo, bo)

    def ln(a, g, b, eps=1e-5):
        mu = jnp.mean(a, axis=-1, keepdims=True)
        var = jnp.mean(jnp.square(a - mu), axis=-1, keepdims=True)
        return (a - mu) / jnp.sqrt(var + eps) * g + b

    h = x
    h = ln(h + mha(h, h, tgt_mask,
                   params["sa_wq"], params["sa_wk"], params["sa_wv"],
                   params["sa_wo"], params["sa_bo"]),
           params["n1_g"], params["n1_b"])
    h = ln(h + mha(h, memory, src_mask,
                   params["ca_wq"], params["ca_wk"], params["ca_wv"],
                   params["ca_wo"], params["ca_bo"]),
           params["n2_g"], params["n2_b"])
    ff = jnp.maximum(linear(h, params["ffn_w1"], params["ffn_b1"]), 0.0)
    ff = linear(ff, params["ffn_w2"], params["ffn_b2"])
    h = ln(h + ff, params["n3_g"], params["n3_b"])
    return h


# --------------------------------------------------------------------------
# Deterministic parameter init (synthetic).  Matmul weights stored in bf16,
# biases / LayerNorm params in f32.
# --------------------------------------------------------------------------
def init_params(key, d_model, d_ff):
    ks = jax.random.split(key, 20)
    s = 0.05

    def w(k, shape):
        return (jax.random.normal(k, shape, jnp.float32) * s).astype(jnp.bfloat16)

    def b(k, shape):
        return jax.random.normal(k, shape, jnp.float32) * s

    return {
        "sa_wq": w(ks[0], (d_model, d_model)),
        "sa_wk": w(ks[1], (d_model, d_model)),
        "sa_wv": w(ks[2], (d_model, d_model)),
        "sa_wo": w(ks[3], (d_model, d_model)),
        "sa_bo": b(ks[10], (1, d_model)),
        "ca_wq": w(ks[4], (d_model, d_model)),
        "ca_wk": w(ks[5], (d_model, d_model)),
        "ca_wv": w(ks[6], (d_model, d_model)),
        "ca_wo": w(ks[7], (d_model, d_model)),
        "ca_bo": b(ks[11], (1, d_model)),
        "ffn_w1": w(ks[8], (d_model, d_ff)),
        "ffn_b1": b(ks[12], (1, d_ff)),
        "ffn_w2": w(ks[9], (d_ff, d_model)),
        "ffn_b2": b(ks[13], (1, d_model)),
        "n1_g": 1.0 + b(ks[14], (1, d_model)),
        "n1_b": b(ks[15], (1, d_model)),
        "n2_g": 1.0 + b(ks[16], (1, d_model)),
        "n2_b": b(ks[17], (1, d_model)),
        "n3_g": 1.0 + b(ks[18], (1, d_model)),
        "n3_b": b(ks[19], (1, d_model)),
    }


if __name__ == "__main__":
    # Lane-dense small config: D multiple of 128, L multiple of 8.
    B, Lt, Ls = 2, 8, 8
    d_model, num_heads, d_ff = 128, 4, 256

    root = jax.random.PRNGKey(0)
    k_x, k_m, k_p = jax.random.split(root, 3)

    x = jax.random.normal(k_x, (B, Lt, d_model), jnp.float32)
    memory = jax.random.normal(k_m, (B, Ls, d_model), jnp.float32)

    # causal target mask (1 = visible), full source mask
    causal = jnp.tril(jnp.ones((Lt, Lt), jnp.float32))
    tgt_mask = jnp.broadcast_to(causal, (B, 1, Lt, Lt)).astype(jnp.float32)
    src_mask = jnp.ones((B, 1, 1, Ls), jnp.float32)

    params = init_params(k_p, d_model, d_ff)

    out = decoder_layer(x, memory, tgt_mask, src_mask, params, num_heads)
    out = jax.block_until_ready(out)

    ref = decoder_layer_ref(x, memory, tgt_mask, src_mask, params, num_heads)
    ref = jax.block_until_ready(ref)

    assert out.shape == (B, Lt, d_model)
    assert jnp.allclose(out, ref, rtol=5e-3, atol=5e-3), "mismatch vs reference"

    print("KERNEL_OK")
</pallas_src>

<mosaic_0001>
module attributes {stable_mosaic.version = 11 : i64} {
  func.func @decoder_layer_kernel(%arg0: i32, %arg1: memref<2x8x128xf32, #tpu.memory_space<vmem>>, %arg2: memref<2x8x128xf32, #tpu.memory_space<vmem>>, %arg3: memref<2x8x8xbf16, #tpu.memory_space<vmem>>, %arg4: memref<2x1x8xbf16, #tpu.memory_space<vmem>>, %arg5: memref<128x384xbf16, #tpu.memory_space<vmem>>, %arg6: memref<128x128xbf16, #tpu.memory_space<vmem>>, %arg7: memref<1x128xf32, #tpu.memory_space<vmem>>, %arg8: memref<128x128xbf16, #tpu.memory_space<vmem>>, %arg9: memref<128x256xbf16, #tpu.memory_space<vmem>>, %arg10: memref<128x128xbf16, #tpu.memory_space<vmem>>, %arg11: memref<1x128xf32, #tpu.memory_space<vmem>>, %arg12: memref<128x256xbf16, #tpu.memory_space<vmem>>, %arg13: memref<1x256xf32, #tpu.memory_space<vmem>>, %arg14: memref<256x128xbf16, #tpu.memory_space<vmem>>, %arg15: memref<1x128xf32, #tpu.memory_space<vmem>>, %arg16: memref<1x128xf32, #tpu.memory_space<vmem>>, %arg17: memref<1x128xf32, #tpu.memory_space<vmem>>, %arg18: memref<1x128xf32, #tpu.memory_space<vmem>>, %arg19: memref<1x128xf32, #tpu.memory_space<vmem>>, %arg20: memref<1x128xf32, #tpu.memory_space<vmem>>, %arg21: memref<1x128xf32, #tpu.memory_space<vmem>>, %arg22: memref<2x8x128xf32, #tpu.memory_space<vmem>>) attributes {dimension_semantics = [#tpu.dimension_semantics<parallel>], iteration_bounds = array<i64: 1>, scalar_prefetch = 0 : i64, scratch_operands = 0 : i64, tpu.core_type = #tpu.core_type<tc>, window_params = [{transform_indices = @transform_0, window_bounds = array<i64: 2, 8, 128>}, {transform_indices = @transform_1, window_bounds = array<i64: 2, 8, 128>}, {transform_indices = @transform_2, window_bounds = array<i64: 2, 8, 8>}, {transform_indices = @transform_3, window_bounds = array<i64: 2, 1, 8>}, {pipeline_mode = #tpu.pipeline_mode<synchronous>, transform_indices = @transform_4, window_bounds = array<i64: 128, 384>}, {pipeline_mode = #tpu.pipeline_mode<synchronous>, transform_indices = @transform_5, window_bounds = array<i64: 128, 128>}, {pipeline_mode = #tpu.pipeline_mode<synchronous>, transform_indices = @transform_6, window_bounds = array<i64: 1, 128>}, {pipeline_mode = #tpu.pipeline_mode<synchronous>, transform_indices = @transform_7, window_bounds = array<i64: 128, 128>}, {pipeline_mode = #tpu.pipeline_mode<synchronous>, transform_indices = @transform_8, window_bounds = array<i64: 128, 256>}, {pipeline_mode = #tpu.pipeline_mode<synchronous>, transform_indices = @transform_9, window_bounds = array<i64: 128, 128>}, {pipeline_mode = #tpu.pipeline_mode<synchronous>, transform_indices = @transform_10, window_bounds = array<i64: 1, 128>}, {pipeline_mode = #tpu.pipeline_mode<synchronous>, transform_indices = @transform_11, window_bounds = array<i64: 128, 256>}, {pipeline_mode = #tpu.pipeline_mode<synchronous>, transform_indices = @transform_12, window_bounds = array<i64: 1, 256>}, {pipeline_mode = #tpu.pipeline_mode<synchronous>, transform_indices = @transform_13, window_bounds = array<i64: 256, 128>}, {pipeline_mode = #tpu.pipeline_mode<synchronous>, transform_indices = @transform_14, window_bounds = array<i64: 1, 128>}, {pipeline_mode = #tpu.pipeline_mode<synchronous>, transform_indices = @transform_15, window_bounds = array<i64: 1, 128>}, {pipeline_mode = #tpu.pipeline_mode<synchronous>, transform_indices = @transform_16, window_bounds = array<i64: 1, 128>}, {pipeline_mode = #tpu.pipeline_mode<synchronous>, transform_indices = @transform_17, window_bounds = array<i64: 1, 128>}, {pipeline_mode = #tpu.pipeline_mode<synchronous>, transform_indices = @transform_18, window_bounds = array<i64: 1, 128>}, {pipeline_mode = #tpu.pipeline_mode<synchronous>, transform_indices = @transform_19, window_bounds = array<i64: 1, 128>}, {pipeline_mode = #tpu.pipeline_mode<synchronous>, transform_indices = @transform_20, window_bounds = array<i64: 1, 128>}, {transform_indices = @transform_21, window_bounds = array<i64: 2, 8, 128>}]} {
    %c0 = arith.constant 0 : index
    %c0_0 = arith.constant 0 : index
    %c0_1 = arith.constant 0 : index
    %0 = vector.load %arg1[%c0, %c0_0, %c0_1] : memref<2x8x128xf32, #tpu.memory_space<vmem>>, vector<2x8x128xf32>
    %1 = vector.shape_cast %0 : vector<2x8x128xf32> to vector<16x128xf32>
    %c0_2 = arith.constant 0 : index
    %c0_3 = arith.constant 0 : index
    %c0_4 = arith.constant 0 : index
    %2 = vector.load %arg2[%c0_2, %c0_3, %c0_4] : memref<2x8x128xf32, #tpu.memory_space<vmem>>, vector<2x8x128xf32>
    %3 = vector.shape_cast %2 : vector<2x8x128xf32> to vector<16x128xf32>
    %4 = arith.truncf %3 : vector<16x128xf32> to vector<16x128xbf16>
    %c0_5 = arith.constant 0 : index
    %c0_6 = arith.constant 0 : index
    %c0_7 = arith.constant 0 : index
    %5 = vector.load %arg3[%c0_5, %c0_6, %c0_7] : memref<2x8x8xbf16, #tpu.memory_space<vmem>>, vector<2x8x8xbf16>
    %6 = arith.extf %5 : vector<2x8x8xbf16> to vector<2x8x8xf32>
    %7 = vector.shape_cast %6 : vector<2x8x8xf32> to vector<16x8xf32>
    %c0_8 = arith.constant 0 : index
    %c0_9 = arith.constant 0 : index
    %c0_10 = arith.constant 0 : index
    %8 = vector.load %arg4[%c0_8, %c0_9, %c0_10] : memref<2x1x8xbf16, #tpu.memory_space<vmem>>, vector<2x1x8xbf16>
    %9 = arith.extf %8 : vector<2x1x8xbf16> to vector<2x1x8xf32>
    %10 = vector.shape_cast %9 : vector<2x1x8xf32> to vector<2x1x8xf32>
    %11 = vector.broadcast %10 : vector<2x1x8xf32> to vector<2x8x8xf32>
    %12 = vector.shape_cast %11 : vector<2x8x8xf32> to vector<16x8xf32>
    %13 = arith.truncf %1 : vector<16x128xf32> to vector<16x128xbf16>
    %c0_11 = arith.constant 0 : index
    %c0_12 = arith.constant 0 : index
    %14 = vector.load %arg5[%c0_11, %c0_12] : memref<128x384xbf16, #tpu.memory_space<vmem>>, vector<128x384xbf16>
    %cst = arith.constant dense<0.000000e+00> : vector<16x384xf32>
    %15 = tpu.matmul %13, %14, %cst {dimension_numbers = #tpu.dot_dimension_numbers<[1], [0], [0], [1], [0, 0, 1, 1], [], []>} : vector<16x128xbf16>, vector<128x384xbf16>, vector<16x384xf32> -> vector<16x384xf32>
    %16 = vector.extract_strided_slice %15 {offsets = [0, 0], sizes = [16, 128], strides = [1, 1]} : vector<16x384xf32> to vector<16x128xf32>
    %17 = vector.extract_strided_slice %15 {offsets = [0, 128], sizes = [16, 128], strides = [1, 1]} : vector<16x384xf32> to vector<16x128xf32>
    %18 = vector.extract_strided_slice %15 {offsets = [0, 256], sizes = [16, 128], strides = [1, 1]} : vector<16x384xf32> to vector<16x128xf32>
    %c0_13 = arith.constant 0 : index
    %c0_14 = arith.constant 0 : index
    %19 = vector.load %arg6[%c0_13, %c0_14] : memref<128x128xbf16, #tpu.memory_space<vmem>>, vector<128x128xbf16>
    %c0_15 = arith.constant 0 : index
    %c0_16 = arith.constant 0 : index
    %20 = vector.load %arg7[%c0_15, %c0_16] : memref<1x128xf32, #tpu.memory_space<vmem>>, vector<1x128xf32>
    %21 = vector.shape_cast %16 : vector<16x128xf32> to vector<16x4x32xf32>
    %22 = tpu.transpose %21, [1, 0, 2] : vector<16x4x32xf32> -> vector<4x16x32xf32>
    %23 = vector.shape_cast %22 : vector<4x16x32xf32> to vector<8x8x32xf32>
    %24 = vector.shape_cast %17 : vector<16x128xf32> to vector<16x4x32xf32>
    %25 = tpu.transpose %24, [1, 0, 2] : vector<16x4x32xf32> -> vector<4x16x32xf32>
    %26 = vector.shape_cast %25 : vector<4x16x32xf32> to vector<8x8x32xf32>
    %27 = vector.shape_cast %18 : vector<16x128xf32> to vector<16x4x32xf32>
    %28 = tpu.transpose %27, [1, 0, 2] : vector<16x4x32xf32> -> vector<4x16x32xf32>
    %29 = vector.shape_cast %28 : vector<4x16x32xf32> to vector<8x8x32xf32>
    %30 = arith.truncf %23 : vector<8x8x32xf32> to vector<8x8x32xbf16>
    %31 = arith.truncf %26 : vector<8x8x32xf32> to vector<8x8x32xbf16>
    "tpu.trace_start"() <{level = 10 : i32, message = "bqd,bkd->bqk"}> : () -> ()
    %cst_17 = arith.constant dense<0.000000e+00> : vector<8x8x8xf32>
    %32 = tpu.matmul %30, %31, %cst_17 {dimension_numbers = #tpu.dot_dimension_numbers<[2], [2], [1], [1], [0, 0, 0, 1, 1, 1], [0], [0]>} : vector<8x8x32xbf16>, vector<8x8x32xbf16>, vector<8x8x8xf32> -> vector<8x8x8xf32>
    "tpu.trace_stop"() : () -> ()
    %cst_18 = arith.constant 0.176776692 : f32
    %33 = vector.broadcast %cst_18 : f32 to vector<8x8x8xf32>
    %34 = arith.mulf %32, %33 : vector<8x8x8xf32>
    %35 = vector.shape_cast %34 : vector<8x8x8xf32> to vector<4x16x8xf32>
    %36 = vector.shape_cast %7 : vector<16x8xf32> to vector<1x16x8xf32>
    %cst_19 = arith.constant 0.000000e+00 : f32
    %37 = vector.broadcast %cst_19 : f32 to vector<1x16x8xf32>
    %38 = arith.cmpf one, %36, %37 : vector<1x16x8xf32>
    %cst_20 = arith.constant -1.000000e+04 : f32
    %39 = vector.shape_cast %38 : vector<1x16x8xi1> to vector<1x16x8xi1>
    %40 = vector.broadcast %39 : vector<1x16x8xi1> to vector<4x16x8xi1>
    %41 = vector.broadcast %cst_20 : f32 to vector<4x16x8xf32>
    %42 = arith.select %40, %35, %41 : vector<4x16x8xi1>, vector<4x16x8xf32>
    %cst_21 = arith.constant dense<0xFF800000> : vector<4x16xf32>
    %43 = vector.multi_reduction <maximumf>, %42, %cst_21 [2] : vector<4x16x8xf32> to vector<4x16xf32>
    %44 = vector.shape_cast %43 : vector<4x16xf32> to vector<4x16x1xf32>
    %45 = vector.broadcast %44 : vector<4x16x1xf32> to vector<4x16x8xf32>
    %46 = arith.subf %42, %45 : vector<4x16x8xf32>
    %47 = math.exp %46 : vector<4x16x8xf32>
    %cst_22 = arith.constant dense<0.000000e+00> : vector<4x16xf32>
    %48 = vector.multi_reduction <add>, %47, %cst_22 [2] : vector<4x16x8xf32> to vector<4x16xf32>
    %49 = vector.shape_cast %48 : vector<4x16xf32> to vector<4x16x1xf32>
    %50 = tpu.reciprocal %49 {approx = true} : vector<4x16x1xf32> -> vector<4x16x1xf32>
    %51 = vector.broadcast %50 : vector<4x16x1xf32> to vector<4x16x8xf32>
    %52 = arith.mulf %47, %51 : vector<4x16x8xf32>
    %53 = vector.shape_cast %52 : vector<4x16x8xf32> to vector<8x8x8xf32>
    %54 = arith.truncf %53 : vector<8x8x8xf32> to vector<8x8x8xbf16>
    %55 = arith.truncf %29 : vector<8x8x32xf32> to vector<8x8x32xbf16>
    "tpu.trace_start"() <{level = 10 : i32, message = "bqk,bkd->bqd"}> : () -> ()
    %cst_23 = arith.constant dense<0.000000e+00> : vector<8x8x32xf32>
    %56 = tpu.matmul %54, %55, %cst_23 {dimension_numbers = #tpu.dot_dimension_numbers<[2], [1], [1], [2], [0, 0, 0, 1, 1, 2], [0], [0]>} : vector<8x8x8xbf16>, vector<8x8x32xbf16>, vector<8x8x32xf32> -> vector<8x8x32xf32>
    "tpu.trace_stop"() : () -> ()
    %57 = vector.shape_cast %56 : vector<8x8x32xf32> to vector<4x16x32xf32>
    %58 = tpu.transpose %57, [1, 0, 2] : vector<4x16x32xf32> -> vector<16x4x32xf32>
    %59 = vector.shape_cast %58 : vector<16x4x32xf32> to vector<16x128xf32>
    %60 = arith.truncf %59 : vector<16x128xf32> to vector<16x128xbf16>
    %cst_24 = arith.constant dense<0.000000e+00> : vector<16x128xf32>
    %61 = tpu.matmul %60, %19, %cst_24 {dimension_numbers = #tpu.dot_dimension_numbers<[1], [0], [0], [1], [0, 0, 1, 1], [], []>} : vector<16x128xbf16>, vector<128x128xbf16>, vector<16x128xf32> -> vector<16x128xf32>
    %62 = vector.broadcast %20 : vector<1x128xf32> to vector<16x128xf32>
    %63 = arith.addf %61, %62 : vector<16x128xf32>
    %64 = arith.addf %1, %63 : vector<16x128xf32>
    %c0_25 = arith.constant 0 : index
    %c0_26 = arith.constant 0 : index
    %65 = vector.load %arg16[%c0_25, %c0_26] : memref<1x128xf32, #tpu.memory_space<vmem>>, vector<1x128xf32>
    %c0_27 = arith.constant 0 : index
    %c0_28 = arith.constant 0 : index
    %66 = vector.load %arg17[%c0_27, %c0_28] : memref<1x128xf32, #tpu.memory_space<vmem>>, vector<1x128xf32>
    %cst_29 = arith.constant dense<0.000000e+00> : vector<16xf32>
    %67 = vector.multi_reduction <add>, %64, %cst_29 [1] : vector<16x128xf32> to vector<16xf32>
    %68 = vector.shape_cast %67 : vector<16xf32> to vector<16x1xf32>
    %cst_30 = arith.constant 1.280000e+02 : f32
    %69 = vector.broadcast %cst_30 : f32 to vector<16x1xf32>
    %70 = arith.divf %68, %69 : vector<16x1xf32>
    %71 = arith.mulf %64, %64 : vector<16x128xf32>
    %cst_31 = arith.constant dense<0.000000e+00> : vector<16xf32>
    %72 = vector.multi_reduction <add>, %71, %cst_31 [1] : vector<16x128xf32> to vector<16xf32>
    %73 = vector.shape_cast %72 : vector<16xf32> to vector<16x1xf32>
    %cst_32 = arith.constant 1.280000e+02 : f32
    %74 = vector.broadcast %cst_32 : f32 to vector<16x1xf32>
    %75 = arith.divf %73, %74 : vector<16x1xf32>
    %76 = arith.mulf %70, %70 : vector<16x1xf32>
    %77 = arith.subf %75, %76 : vector<16x1xf32>
    %78 = vector.broadcast %70 : vector<16x1xf32> to vector<16x128xf32>
    %79 = arith.subf %64, %78 : vector<16x128xf32>
    %cst_33 = arith.constant 9.99999974E-6 : f32
    %80 = vector.broadcast %cst_33 : f32 to vector<16x1xf32>
    %81 = arith.addf %77, %80 : vector<16x1xf32>
    %82 = math.rsqrt %81 : vector<16x1xf32>
    %83 = vector.broadcast %82 : vector<16x1xf32> to vector<16x128xf32>
    %84 = arith.mulf %79, %83 : vector<16x128xf32>
    %85 = vector.broadcast %65 : vector<1x128xf32> to vector<16x128xf32>
    %86 = arith.mulf %84, %85 : vector<16x128xf32>
    %87 = vector.broadcast %66 : vector<1x128xf32> to vector<16x128xf32>
    %88 = arith.addf %86, %87 : vector<16x128xf32>
    %89 = arith.truncf %88 : vector<16x128xf32> to vector<16x128xbf16>
    %c0_34 = arith.constant 0 : index
    %c0_35 = arith.constant 0 : index
    %90 = vector.load %arg8[%c0_34, %c0_35] : memref<128x128xbf16, #tpu.memory_space<vmem>>, vector<128x128xbf16>
    %cst_36 = arith.constant dense<0.000000e+00> : vector<16x128xf32>
    %91 = tpu.matmul %89, %90, %cst_36 {dimension_numbers = #tpu.dot_dimension_numbers<[1], [0], [0], [1], [0, 0, 1, 1], [], []>} : vector<16x128xbf16>, vector<128x128xbf16>, vector<16x128xf32> -> vector<16x128xf32>
    %c0_37 = arith.constant 0 : index
    %c0_38 = arith.constant 0 : index
    %92 = vector.load %arg9[%c0_37, %c0_38] : memref<128x256xbf16, #tpu.memory_space<vmem>>, vector<128x256xbf16>
    %cst_39 = arith.constant dense<0.000000e+00> : vector<16x256xf32>
    %93 = tpu.matmul %4, %92, %cst_39 {dimension_numbers = #tpu.dot_dimension_numbers<[1], [0], [0], [1], [0, 0, 1, 1], [], []>} : vector<16x128xbf16>, vector<128x256xbf16>, vector<16x256xf32> -> vector<16x256xf32>
    %94 = vector.extract_strided_slice %93 {offsets = [0, 0], sizes = [16, 128], strides = [1, 1]} : vector<16x256xf32> to vector<16x128xf32>
    %95 = vector.extract_strided_slice %93 {offsets = [0, 128], sizes = [16, 128], strides = [1, 1]} : vector<16x256xf32> to vector<16x128xf32>
    %c0_40 = arith.constant 0 : index
    %c0_41 = arith.constant 0 : index
    %96 = vector.load %arg10[%c0_40, %c0_41] : memref<128x128xbf16, #tpu.memory_space<vmem>>, vector<128x128xbf16>
    %c0_42 = arith.constant 0 : index
    %c0_43 = arith.constant 0 : index
    %97 = vector.load %arg11[%c0_42, %c0_43] : memref<1x128xf32, #tpu.memory_space<vmem>>, vector<1x128xf32>
    %98 = vector.shape_cast %91 : vector<16x128xf32> to vector<16x4x32xf32>
    %99 = tpu.transpose %98, [1, 0, 2] : vector<16x4x32xf32> -> vector<4x16x32xf32>
    %100 = vector.shape_cast %99 : vector<4x16x32xf32> to vector<8x8x32xf32>
    %101 = vector.shape_cast %94 : vector<16x128xf32> to vector<16x4x32xf32>
    %102 = tpu.transpose %101, [1, 0, 2] : vector<16x4x32xf32> -> vector<4x16x32xf32>
    %103 = vector.shape_cast %102 : vector<4x16x32xf32> to vector<8x8x32xf32>
    %104 = vector.shape_cast %95 : vector<16x128xf32> to vector<16x4x32xf32>
    %105 = tpu.transpose %104, [1, 0, 2] : vector<16x4x32xf32> -> vector<4x16x32xf32>
    %106 = vector.shape_cast %105 : vector<4x16x32xf32> to vector<8x8x32xf32>
    %107 = arith.truncf %100 : vector<8x8x32xf32> to vector<8x8x32xbf16>
    %108 = arith.truncf %103 : vector<8x8x32xf32> to vector<8x8x32xbf16>
    "tpu.trace_start"() <{level = 10 : i32, message = "bqd,bkd->bqk"}> : () -> ()
    %cst_44 = arith.constant dense<0.000000e+00> : vector<8x8x8xf32>
    %109 = tpu.matmul %107, %108, %cst_44 {dimension_numbers = #tpu.dot_dimension_numbers<[2], [2], [1], [1], [0, 0, 0, 1, 1, 1], [0], [0]>} : vector<8x8x32xbf16>, vector<8x8x32xbf16>, vector<8x8x8xf32> -> vector<8x8x8xf32>
    "tpu.trace_stop"() : () -> ()
    %cst_45 = arith.constant 0.176776692 : f32
    %110 = vector.broadcast %cst_45 : f32 to vector<8x8x8xf32>
    %111 = arith.mulf %109, %110 : vector<8x8x8xf32>
    %112 = vector.shape_cast %111 : vector<8x8x8xf32> to vector<4x16x8xf32>
    %113 = vector.shape_cast %12 : vector<16x8xf32> to vector<1x16x8xf32>
    %cst_46 = arith.constant 0.000000e+00 : f32
    %114 = vector.broadcast %cst_46 : f32 to vector<1x16x8xf32>
    %115 = arith.cmpf one, %113, %114 : vector<1x16x8xf32>
    %cst_47 = arith.constant -1.000000e+04 : f32
    %116 = vector.shape_cast %115 : vector<1x16x8xi1> to vector<1x16x8xi1>
    %117 = vector.broadcast %116 : vector<1x16x8xi1> to vector<4x16x8xi1>
    %118 = vector.broadcast %cst_47 : f32 to vector<4x16x8xf32>
    %119 = arith.select %117, %112, %118 : vector<4x16x8xi1>, vector<4x16x8xf32>
    %cst_48 = arith.constant dense<0xFF800000> : vector<4x16xf32>
    %120 = vector.multi_reduction <maximumf>, %119, %cst_48 [2] : vector<4x16x8xf32> to vector<4x16xf32>
    %121 = vector.shape_cast %120 : vector<4x16xf32> to vector<4x16x1xf32>
    %122 = vector.broadcast %121 : vector<4x16x1xf32> to vector<4x16x8xf32>
    %123 = arith.subf %119, %122 : vector<4x16x8xf32>
    %124 = math.exp %123 : vector<4x16x8xf32>
    %cst_49 = arith.constant dense<0.000000e+00> : vector<4x16xf32>
    %125 = vector.multi_reduction <add>, %124, %cst_49 [2] : vector<4x16x8xf32> to vector<4x16xf32>
    %126 = vector.shape_cast %125 : vector<4x16xf32> to vector<4x16x1xf32>
    %127 = tpu.reciprocal %126 {approx = true} : vector<4x16x1xf32> -> vector<4x16x1xf32>
    %128 = vector.broadcast %127 : vector<4x16x1xf32> to vector<4x16x8xf32>
    %129 = arith.mulf %124, %128 : vector<4x16x8xf32>
    %130 = vector.shape_cast %129 : vector<4x16x8xf32> to vector<8x8x8xf32>
    %131 = arith.truncf %130 : vector<8x8x8xf32> to vector<8x8x8xbf16>
    %132 = arith.truncf %106 : vector<8x8x32xf32> to vector<8x8x32xbf16>
    "tpu.trace_start"() <{level = 10 : i32, message = "bqk,bkd->bqd"}> : () -> ()
    %cst_50 = arith.constant dense<0.000000e+00> : vector<8x8x32xf32>
    %133 = tpu.matmul %131, %132, %cst_50 {dimension_numbers = #tpu.dot_dimension_numbers<[2], [1], [1], [2], [0, 0, 0, 1, 1, 2], [0], [0]>} : vector<8x8x8xbf16>, vector<8x8x32xbf16>, vector<8x8x32xf32> -> vector<8x8x32xf32>
    "tpu.trace_stop"() : () -> ()
    %134 = vector.shape_cast %133 : vector<8x8x32xf32> to vector<4x16x32xf32>
    %135 = tpu.transpose %134, [1, 0, 2] : vector<4x16x32xf32> -> vector<16x4x32xf32>
    %136 = vector.shape_cast %135 : vector<16x4x32xf32> to vector<16x128xf32>
    %137 = arith.truncf %136 : vector<16x128xf32> to vector<16x128xbf16>
    %cst_51 = arith.constant dense<0.000000e+00> : vector<16x128xf32>
    %138 = tpu.matmul %137, %96, %cst_51 {dimension_numbers = #tpu.dot_dimension_numbers<[1], [0], [0], [1], [0, 0, 1, 1], [], []>} : vector<16x128xbf16>, vector<128x128xbf16>, vector<16x128xf32> -> vector<16x128xf32>
    %139 = vector.broadcast %97 : vector<1x128xf32> to vector<16x128xf32>
    %140 = arith.addf %138, %139 : vector<16x128xf32>
    %141 = arith.addf %88, %140 : vector<16x128xf32>
    %c0_52 = arith.constant 0 : index
    %c0_53 = arith.constant 0 : index
    %142 = vector.load %arg18[%c0_52, %c0_53] : memref<1x128xf32, #tpu.memory_space<vmem>>, vector<1x128xf32>
    %c0_54 = arith.constant 0 : index
    %c0_55 = arith.constant 0 : index
    %143 = vector.load %arg19[%c0_54, %c0_55] : memref<1x128xf32, #tpu.memory_space<vmem>>, vector<1x128xf32>
    %cst_56 = arith.constant dense<0.000000e+00> : vector<16xf32>
    %144 = vector.multi_reduction <add>, %141, %cst_56 [1] : vector<16x128xf32> to vector<16xf32>
    %145 = vector.shape_cast %144 : vector<16xf32> to vector<16x1xf32>
    %cst_57 = arith.constant 1.280000e+02 : f32
    %146 = vector.broadcast %cst_57 : f32 to vector<16x1xf32>
    %147 = arith.divf %145, %146 : vector<16x1xf32>
    %148 = arith.mulf %141, %141 : vector<16x128xf32>
    %cst_58 = arith.constant dense<0.000000e+00> : vector<16xf32>
    %149 = vector.multi_reduction <add>, %148, %cst_58 [1] : vector<16x128xf32> to vector<16xf32>
    %150 = vector.shape_cast %149 : vector<16xf32> to vector<16x1xf32>
    %cst_59 = arith.constant 1.280000e+02 : f32
    %151 = vector.broadcast %cst_59 : f32 to vector<16x1xf32>
    %152 = arith.divf %150, %151 : vector<16x1xf32>
    %153 = arith.mulf %147, %147 : vector<16x1xf32>
    %154 = arith.subf %152, %153 : vector<16x1xf32>
    %155 = vector.broadcast %147 : vector<16x1xf32> to vector<16x128xf32>
    %156 = arith.subf %141, %155 : vector<16x128xf32>
    %cst_60 = arith.constant 9.99999974E-6 : f32
    %157 = vector.broadcast %cst_60 : f32 to vector<16x1xf32>
    %158 = arith.addf %154, %157 : vector<16x1xf32>
    %159 = math.rsqrt %158 : vector<16x1xf32>
    %160 = vector.broadcast %159 : vector<16x1xf32> to vector<16x128xf32>
    %161 = arith.mulf %156, %160 : vector<16x128xf32>
    %162 = vector.broadcast %142 : vector<1x128xf32> to vector<16x128xf32>
    %163 = arith.mulf %161, %162 : vector<16x128xf32>
    %164 = vector.broadcast %143 : vector<1x128xf32> to vector<16x128xf32>
    %165 = arith.addf %163, %164 : vector<16x128xf32>
    %166 = arith.truncf %165 : vector<16x128xf32> to vector<16x128xbf16>
    %c0_61 = arith.constant 0 : index
    %c0_62 = arith.constant 0 : index
    %167 = vector.load %arg12[%c0_61, %c0_62] : memref<128x256xbf16, #tpu.memory_space<vmem>>, vector<128x256xbf16>
    %cst_63 = arith.constant dense<0.000000e+00> : vector<16x256xf32>
    %168 = tpu.matmul %166, %167, %cst_63 {dimension_numbers = #tpu.dot_dimension_numbers<[1], [0], [0], [1], [0, 0, 1, 1], [], []>} : vector<16x128xbf16>, vector<128x256xbf16>, vector<16x256xf32> -> vector<16x256xf32>
    %c0_64 = arith.constant 0 : index
    %c0_65 = arith.constant 0 : index
    %169 = vector.load %arg13[%c0_64, %c0_65] : memref<1x256xf32, #tpu.memory_space<vmem>>, vector<1x256xf32>
    %170 = vector.broadcast %169 : vector<1x256xf32> to vector<16x256xf32>
    %171 = arith.addf %168, %170 : vector<16x256xf32>
    %cst_66 = arith.constant 0.000000e+00 : f32
    %172 = vector.broadcast %cst_66 : f32 to vector<16x256xf32>
    %173 = arith.maximumf %171, %172 : vector<16x256xf32>
    %174 = arith.truncf %173 : vector<16x256xf32> to vector<16x256xbf16>
    %c0_67 = arith.constant 0 : index
    %c0_68 = arith.constant 0 : index
    %175 = vector.load %arg14[%c0_67, %c0_68] : memref<256x128xbf16, #tpu.memory_space<vmem>>, vector<256x128xbf16>
    %cst_69 = arith.constant dense<0.000000e+00> : vector<16x128xf32>
    %176 = tpu.matmul %174, %175, %cst_69 {dimension_numbers = #tpu.dot_dimension_numbers<[1], [0], [0], [1], [0, 0, 1, 1], [], []>} : vector<16x256xbf16>, vector<256x128xbf16>, vector<16x128xf32> -> vector<16x128xf32>
    %c0_70 = arith.constant 0 : index
    %c0_71 = arith.constant 0 : index
    %177 = vector.load %arg15[%c0_70, %c0_71] : memref<1x128xf32, #tpu.memory_space<vmem>>, vector<1x128xf32>
    %178 = vector.broadcast %177 : vector<1x128xf32> to vector<16x128xf32>
    %179 = arith.addf %176, %178 : vector<16x128xf32>
    %180 = arith.addf %165, %179 : vector<16x128xf32>
    %c0_72 = arith.constant 0 : index
    %c0_73 = arith.constant 0 : index
    %181 = vector.load %arg20[%c0_72, %c0_73] : memref<1x128xf32, #tpu.memory_space<vmem>>, vector<1x128xf32>
    %c0_74 = arith.constant 0 : index
    %c0_75 = arith.constant 0 : index
    %182 = vector.load %arg21[%c0_74, %c0_75] : memref<1x128xf32, #tpu.memory_space<vmem>>, vector<1x128xf32>
    %cst_76 = arith.constant dense<0.000000e+00> : vector<16xf32>
    %183 = vector.multi_reduction <add>, %180, %cst_76 [1] : vector<16x128xf32> to vector<16xf32>
    %184 = vector.shape_cast %183 : vector<16xf32> to vector<16x1xf32>
    %cst_77 = arith.constant 1.280000e+02 : f32
    %185 = vector.broadcast %cst_77 : f32 to vector<16x1xf32>
    %186 = arith.divf %184, %185 : vector<16x1xf32>
    %187 = arith.mulf %180, %180 : vector<16x128xf32>
    %cst_78 = arith.constant dense<0.000000e+00> : vector<16xf32>
    %188 = vector.multi_reduction <add>, %187, %cst_78 [1] : vector<16x128xf32> to vector<16xf32>
    %189 = vector.shape_cast %188 : vector<16xf32> to vector<16x1xf32>
    %cst_79 = arith.constant 1.280000e+02 : f32
    %190 = vector.broadcast %cst_79 : f32 to vector<16x1xf32>
    %191 = arith.divf %189, %190 : vector<16x1xf32>
    %192 = arith.mulf %186, %186 : vector<16x1xf32>
    %193 = arith.subf %191, %192 : vector<16x1xf32>
    %194 = vector.broadcast %186 : vector<16x1xf32> to vector<16x128xf32>
    %195 = arith.subf %180, %194 : vector<16x128xf32>
    %cst_80 = arith.constant 9.99999974E-6 : f32
    %196 = vector.broadcast %cst_80 : f32 to vector<16x1xf32>
    %197 = arith.addf %193, %196 : vector<16x1xf32>
    %198 = math.rsqrt %197 : vector<16x1xf32>
    %199 = vector.broadcast %198 : vector<16x1xf32> to vector<16x128xf32>
    %200 = arith.mulf %195, %199 : vector<16x128xf32>
    %201 = vector.broadcast %181 : vector<1x128xf32> to vector<16x128xf32>
    %202 = arith.mulf %200, %201 : vector<16x128xf32>
    %203 = vector.broadcast %182 : vector<1x128xf32> to vector<16x128xf32>
    %204 = arith.addf %202, %203 : vector<16x128xf32>
    %205 = vector.shape_cast %204 : vector<16x128xf32> to vector<2x8x128xf32>
    %c0_81 = arith.constant 0 : index
    %c0_82 = arith.constant 0 : index
    %c0_83 = arith.constant 0 : index
    %206 = vector.load %arg22[%c0_81, %c0_82, %c0_83] : memref<2x8x128xf32, #tpu.memory_space<vmem>>, vector<2x8x128xf32>
    tpu.vector_store %arg22[%c0_81, %c0_82, %c0_83], %205 {strides = array<i32>} : memref<2x8x128xf32, #tpu.memory_space<vmem>>, vector<2x8x128xf32>,
    return
  }
  func.func @transform_0(%arg0: i32) -> (i32, i32, i32) {
    %c0_i32 = arith.constant 0 : i32
    %c0_i32_0 = arith.constant 0 : i32
    %c0_i32_1 = arith.constant 0 : i32
    return %arg0, %c0_i32, %c0_i32_0 : i32, i32, i32
  }
  func.func @transform_1(%arg0: i32) -> (i32, i32, i32) {
    %c0_i32 = arith.constant 0 : i32
    %c0_i32_0 = arith.constant 0 : i32
    %c0_i32_1 = arith.constant 0 : i32
    return %arg0, %c0_i32, %c0_i32_0 : i32, i32, i32
  }
  func.func @transform_2(%arg0: i32) -> (i32, i32, i32) {
    %c0_i32 = arith.constant 0 : i32
    %c0_i32_0 = arith.constant 0 : i32
    %c0_i32_1 = arith.constant 0 : i32
    return %arg0, %c0_i32, %c0_i32_0 : i32, i32, i32
  }
  func.func @transform_3(%arg0: i32) -> (i32, i32, i32) {
    %c0_i32 = arith.constant 0 : i32
    %c0_i32_0 = arith.constant 0 : i32
    %c0_i32_1 = arith.constant 0 : i32
    return %arg0, %c0_i32, %c0_i32_0 : i32, i32, i32
  }
  func.func @transform_4(%arg0: i32) -> (i32, i32) {
    %c0_i32 = arith.constant 0 : i32
    %c0_i32_0 = arith.constant 0 : i32
    %c0_i32_1 = arith.constant 0 : i32
    return %c0_i32, %c0_i32_0 : i32, i32
  }
  func.func @transform_5(%arg0: i32) -> (i32, i32) {
    %c0_i32 = arith.constant 0 : i32
    %c0_i32_0 = arith.constant 0 : i32
    %c0_i32_1 = arith.constant 0 : i32
    return %c0_i32, %c0_i32_0 : i32, i32
  }
  func.func @transform_6(%arg0: i32) -> (i32, i32) {
    %c0_i32 = arith.constant 0 : i32
    %c0_i32_0 = arith.constant 0 : i32
    %c0_i32_1 = arith.constant 0 : i32
    return %c0_i32, %c0_i32_0 : i32, i32
  }
  func.func @transform_7(%arg0: i32) -> (i32, i32) {
    %c0_i32 = arith.constant 0 : i32
    %c0_i32_0 = arith.constant 0 : i32
    %c0_i32_1 = arith.constant 0 : i32
    return %c0_i32, %c0_i32_0 : i32, i32
  }
  func.func @transform_8(%arg0: i32) -> (i32, i32) {
    %c0_i32 = arith.constant 0 : i32
    %c0_i32_0 = arith.constant 0 : i32
    %c0_i32_1 = arith.constant 0 : i32
    return %c0_i32, %c0_i32_0 : i32, i32
  }
  func.func @transform_9(%arg0: i32) -> (i32, i32) {
    %c0_i32 = arith.constant 0 : i32
    %c0_i32_0 = arith.constant 0 : i32
    %c0_i32_1 = arith.constant 0 : i32
    return %c0_i32, %c0_i32_0 : i32, i32
  }
  func.func @transform_10(%arg0: i32) -> (i32, i32) {
    %c0_i32 = arith.constant 0 : i32
    %c0_i32_0 = arith.constant 0 : i32
    %c0_i32_1 = arith.constant 0 : i32
    return %c0_i32, %c0_i32_0 : i32, i32
  }
  func.func @transform_11(%arg0: i32) -> (i32, i32) {
    %c0_i32 = arith.constant 0 : i32
    %c0_i32_0 = arith.constant 0 : i32
    %c0_i32_1 = arith.constant 0 : i32
    return %c0_i32, %c0_i32_0 : i32, i32
  }
  func.func @transform_12(%arg0: i32) -> (i32, i32) {
    %c0_i32 = arith.constant 0 : i32
    %c0_i32_0 = arith.constant 0 : i32
    %c0_i32_1 = arith.constant 0 : i32
    return %c0_i32, %c0_i32_0 : i32, i32
  }
  func.func @transform_13(%arg0: i32) -> (i32, i32) {
    %c0_i32 = arith.constant 0 : i32
    %c0_i32_0 = arith.constant 0 : i32
    %c0_i32_1 = arith.constant 0 : i32
    return %c0_i32, %c0_i32_0 : i32, i32
  }
  func.func @transform_14(%arg0: i32) -> (i32, i32) {
    %c0_i32 = arith.constant 0 : i32
    %c0_i32_0 = arith.constant 0 : i32
    %c0_i32_1 = arith.constant 0 : i32
    return %c0_i32, %c0_i32_0 : i32, i32
  }
  func.func @transform_15(%arg0: i32) -> (i32, i32) {
    %c0_i32 = arith.constant 0 : i32
    %c0_i32_0 = arith.constant 0 : i32
    %c0_i32_1 = arith.constant 0 : i32
    return %c0_i32, %c0_i32_0 : i32, i32
  }
  func.func @transform_16(%arg0: i32) -> (i32, i32) {
    %c0_i32 = arith.constant 0 : i32
    %c0_i32_0 = arith.constant 0 : i32
    %c0_i32_1 = arith.constant 0 : i32
    return %c0_i32, %c0_i32_0 : i32, i32
  }
  func.func @transform_17(%arg0: i32) -> (i32, i32) {
    %c0_i32 = arith.constant 0 : i32
    %c0_i32_0 = arith.constant 0 : i32
    %c0_i32_1 = arith.constant 0 : i32
    return %c0_i32, %c0_i32_0 : i32, i32
  }
  func.func @transform_18(%arg0: i32) -> (i32, i32) {
    %c0_i32 = arith.constant 0 : i32
    %c0_i32_0 = arith.constant 0 : i32
    %c0_i32_1 = arith.constant 0 : i32
    return %c0_i32, %c0_i32_0 : i32, i32
  }
  func.func @transform_19(%arg0: i32) -> (i32, i32) {
    %c0_i32 = arith.constant 0 : i32
    %c0_i32_0 = arith.constant 0 : i32
    %c0_i32_1 = arith.constant 0 : i32
    return %c0_i32, %c0_i32_0 : i32, i32
  }
  func.func @transform_20(%arg0: i32) -> (i32, i32) {
    %c0_i32 = arith.constant 0 : i32
    %c0_i32_0 = arith.constant 0 : i32
    %c0_i32_1 = arith.constant 0 : i32
    return %c0_i32, %c0_i32_0 : i32, i32
  }
  func.func @transform_21(%arg0: i32) -> (i32, i32, i32) {
    %c0_i32 = arith.constant 0 : i32
    %c0_i32_0 = arith.constant 0 : i32
    %c0_i32_1 = arith.constant 0 : i32
    return %arg0, %c0_i32, %c0_i32_0 : i32, i32, i32
  }
}

</mosaic_0001>

<bundles_post_ra>
// kernel: tpu_custom_call.1
= control target key start
LH: loop header
LB: loop body
LE: loop exit
PB: predicated region body
PF: predicated region fallthrough
CT: control target
= control target key end

     0   :  { %s7724_s0 = inlined_call_operand.hbm [shape: f32[2,8,128], index: 0, kind: input, shape index: {}]   ;;  %s7725_s1 = inlined_call_operand.hbm [shape: f32[2,8,128], index: 1, kind: input, shape index: {}]   ;;  %s7726_s2 = inlined_call_operand.hbm [shape: bf16[2,8,8], index: 2, kind: input, shape index: {}]   ;;  %s7727_s3 = inlined_call_operand.vmem [shape: bf16[2,1,8], index: 3, kind: input, shape index: {}]   ;;  %s7728_s4 = inlined_call_operand.hbm [shape: bf16[128,384], index: 4, kind: input, shape index: {}]   ;;  %s7729_s5 = inlined_call_operand.hbm [shape: bf16[128,128], index: 5, kind: input, shape index: {}]   ;;  %s7730_s6 = inlined_call_operand.vmem [shape: f32[1,128], index: 6, kind: input, shape index: {}]   ;;  %s7731_s7 = inlined_call_operand.hbm [shape: bf16[128,128], index: 7, kind: input, shape index: {}]   ;;  %s7732_s8 = inlined_call_operand.hbm [shape: bf16[128,256], index: 8, kind: input, shape index: {}]   ;;  %s7733_s9 = inlined_call_operand.hbm [shape: bf16[128,128], index: 9, kind: input, shape index: {}]   ;;  %s7734_s10 = inlined_call_operand.vmem [shape: f32[1,128], index: 10, kind: input, shape index: {}]   ;;  %s7735_s11 = inlined_call_operand.hbm [shape: bf16[128,256], index: 11, kind: input, shape index: {}]   ;;  %s7736_s12 = inlined_call_operand.vmem [shape: f32[1,256], index: 12, kind: input, shape index: {}]   ;;  %s7737_s13 = inlined_call_operand.hbm [shape: bf16[256,128], index: 13, kind: input, shape index: {}]   ;;  %s7738_s14 = inlined_call_operand.vmem [shape: f32[1,128], index: 14, kind: input, shape index: {}]   ;;  %s7739_s15 = inlined_call_operand.vmem [shape: f32[1,128], index: 15, kind: input, shape index: {}]   ;;  %s7740_s16 = inlined_call_operand.vmem [shape: f32[1,128], index: 16, kind: input, shape index: {}]   ;;  %s7741_s17 = inlined_call_operand.vmem [shape: f32[1,128], index: 17, kind: input, shape index: {}]   ;;  %s7742_s18 = inlined_call_operand.vmem [shape: f32[1,128], index: 18, kind: input, shape index: {}]   ;;  %s7743_s19 = inlined_call_operand.vmem [shape: f32[1,128], index: 19, kind: input, shape index: {}]   ;;  %s7744_s20 = inlined_call_operand.vmem [shape: f32[1,128], index: 20, kind: input, shape index: {}]   ;;  %s7745_s21 = inlined_call_operand.hbm [shape: f32[2,8,128], index: 21, kind: output, shape index: {}]  }
   0x1   :  { %7747 = sst [smem:[#allocation27_spill]] %s7724_s0 }
   0x2   :  { %7748 = sst [smem:[#allocation28_spill]] %s7725_s1 }
   0x3   :  { %7749 = sst [smem:[#allocation29_spill]] %s7726_s2 }
   0x4   :  { %7750 = sst [smem:[#allocation30_spill]] %s7727_s3 }
   0x5   :  { %7751 = sst [smem:[#allocation31_spill]] %s7728_s4 }
   0x6   :  { %7752 = sst [smem:[#allocation32_spill]] %s7729_s5 }
   0x7   :  { %7753 = sst [smem:[#allocation33_spill]] %s7744_s20 }
   0x8   :  { %7754 = sst [smem:[#allocation34_spill]] %s7745_s21 }
   0x9   :  { %26 = vsyncpa [#allocation3], 0 }
   0xa   :  { %27 = vsyncpa [#allocation6], 0 }
   0xb   :  { %28 = vsyncpa [#allocation9], 0 }
   0xc   :  { %29 = vsyncpa [#allocation12], 0 }
   0xd   :  { %30 = vsyncpa [#allocation15], 0 }
   0xe   :  { %31 = vsyncpa [#allocation18], 0 }
   0xf   :  { %32 = vsyncpa [#allocation4], 0  ;;  %s6610_s2 = smov [#allocation5]   ;;  %s6611_s26 = smov [#allocation8]  }
  0x10   :  { %s50_s25 = sshll.u32 %s6610_s2, 4  ;;  %s76_s27 = sshll.u32 %s6611_s26, 4  ;;  %s51_s25 = int_to_ptr.vmem [resolvable:$true] %s50_s25  ;;  %s77_s27 = int_to_ptr.vmem [resolvable:$true] %s76_s27 }
  0x11   :  { %s6384_s3 = scalar_lea.vmem %s51_s25, 256  ;;  %p6389_p1 = scmp.lt.s32.totalorder %s51_s25, %s51_s25 }
  0x12   :  { %p6385_p0 = scmp.ne.s32.totalorder %s51_s25, %s6384_s3  ;;  %p6390_p2 = scmp.lt.s32.totalorder %s6384_s3, %s6384_s3 }
  0x14   :  { %p6391_p3 = por %p6390_p2, %p6389_p1 }
  0x16   :  { %p6392_p4 = pnand %p6391_p3, %p6385_p0 }
  0x18   :  { %6395 = shalt.err (!%p6392_p4)
}
  0x19   :  { %s6612_s28 = smov 128   ;;  %s6613_s29 = smov 8  }
  0x1a   :  { %s7755_s30 = sld [smem:[#allocation28_spill]]  ;;  %s6404_s5 = scalar_lea.vmem %s77_s27, 3072 }
  0x1b   :  { %p6405_p5 = scmp.ne.s32.totalorder %s77_s27, %s6404_s5  ;;  %p6409_p6 = scmp.lt.s32.totalorder %s77_s27, %s77_s27 }
  0x1c   :  { %p6410_p7 = scmp.lt.s32.totalorder %s6404_s5, %s6404_s5 }
  0x1e   :  { %p6411_p8 = por %p6410_p7, %p6409_p6 }
  0x20   :  { %56 = dma.hbm_to_vmem [thread:$0]  %s7755_s30, 256, %s51_s25, [#allocation6], %s6612_s28, %s6612_s28, %s6613_s29  }
  0x21   :  { %p6412_p9 = pnand %p6411_p8, %p6405_p5 }
  0x23   :  { %6415 = shalt.err (!%p6412_p9)
}
  0x24   :  { %s6614_s22 = smov 192   ;;  %s6615_s23 = smov 12  }
  0x25   :  { %s7756_s2 = sld [smem:[#allocation31_spill]]  ;;  %s6616_s26 = smov [#allocation11]  }
  0x26   :  { %s102_s3 = sshll.u32 %s6616_s26, 4  ;;  %s6617_s21 = smov [#allocation14]   ;;  %s103_s3 = int_to_ptr.vmem [resolvable:$true] %s102_s3 }
  0x27   :  { %s126_s20 = sshll.u32 %s6617_s21, 4  ;;  %s6424_s25 = scalar_lea.vmem %s103_s3, 1024  ;;  %s127_s20 = int_to_ptr.vmem [resolvable:$true] %s126_s20 }
  0x28   :  { %p6425_p10 = scmp.ne.s32.totalorder %s103_s3, %s6424_s25  ;;  %p6429_p11 = scmp.lt.s32.totalorder %s103_s3, %s103_s3 }
  0x29   :  { %p6430_p12 = scmp.lt.s32.totalorder %s6424_s25, %s6424_s25 }
  0x2b   :  { %82 = dma.hbm_to_vmem [thread:$0]  %s7756_s2, 3072, %s77_s27, [#allocation9], %s6614_s22, %s6614_s22, %s6615_s23  }
  0x2c   :  { %p6431_p13 = por %p6430_p12, %p6429_p11 }
  0x2e   :  { %p6432_p0 = pnand %p6431_p13, %p6425_p10 }
  0x30   :  { %6435 = shalt.err (!%p6432_p0)
}
  0x31   :  { %s6618_s0 = smov 64   ;;  %s6619_s4 = smov 4  }
  0x32   :  { %108 = dma.hbm_to_vmem [thread:$0]  %s7731_s7, 1024, %s103_s3, [#allocation12], %s6618_s0, %s6618_s0, %s6619_s4  }
  0x33   :  { %s6444_s5 = scalar_lea.vmem %s127_s20, 1024  ;;  %p6449_p2 = scmp.lt.s32.totalorder %s127_s20, %s127_s20 }
  0x34   :  { %p6445_p1 = scmp.ne.s32.totalorder %s127_s20, %s6444_s5  ;;  %p6450_p3 = scmp.lt.s32.totalorder %s6444_s5, %s6444_s5 }
  0x36   :  { %p6451_p4 = por %p6450_p3, %p6449_p2 }
  0x38   :  { %p6452_p5 = pnand %p6451_p4, %p6445_p1 }
  0x3a   :  { %6455 = shalt.err (!%p6452_p5)
}
  0x3b   :  { %132 = dma.hbm_to_vmem [thread:$0]  %s7733_s9, 1024, %s127_s20, [#allocation15], %s6618_s0, %s6618_s0, %s6619_s4  }
  0x3c   :  { %s6620_s23 = smov [#allocation2]   ;;  %s6621_s24 = smov [#allocation7]  }
  0x3d   :  { %s38_s1 = sshll.u32 %s6620_s23, 4  ;;  %s62_s2 = sshll.u32 %s6621_s24, 4  ;;  %s39_s1 = int_to_ptr.vmem [resolvable:$true] %s38_s1  ;;  %s63_s2 = int_to_ptr.vmem [resolvable:$true] %s62_s2 }
  0x3e   :  { %s6464_s7 = scalar_lea.vmem %s39_s1, 256  ;;  %p6469_p7 = scmp.lt.s32.totalorder %s39_s1, %s39_s1 }
  0x3f   :  { %p6465_p6 = scmp.ne.s32.totalorder %s39_s1, %s6464_s7  ;;  %p6470_p8 = scmp.lt.s32.totalorder %s6464_s7, %s6464_s7 }
  0x41   :  { %p6471_p9 = por %p6470_p8, %p6469_p7 }
  0x43   :  { %p6472_p10 = pnand %p6471_p9, %p6465_p6 }
  0x45   :  { %6475 = shalt.err (!%p6472_p10)
}
  0x46   :  { %s7757_s25 = sld [smem:[#allocation27_spill]]  ;;  %s6484_s9 = scalar_lea.vmem %s63_s2, 128 }
  0x47   :  { %p6485_p11 = scmp.ne.s32.totalorder %s63_s2, %s6484_s9  ;;  %p6489_p12 = scmp.lt.s32.totalorder %s63_s2, %s63_s2 }
  0x48   :  { %p6490_p13 = scmp.lt.s32.totalorder %s6484_s9, %s6484_s9 }
  0x4a   :  { %p6491_p0 = por %p6490_p13, %p6489_p12 }
  0x4c   :  { %44 = dma.hbm_to_vmem [thread:$0]  %s7757_s25, 256, %s39_s1, [#allocation3], %s6612_s28, %s6612_s28, %s6613_s29  }
  0x4d   :  { %p6492_p1 = pnand %p6491_p0, %p6485_p11 }
  0x4f   :  { %6495 = shalt.err (!%p6492_p1)
}
  0x50   :  { %s7758_s27 = sld [smem:[#allocation29_spill]]  ;;  %s6622_s5 = smov [#allocation10]  }
  0x51   :  { %s88_s21 = sshll.u32 %s6622_s5, 4  ;;  %s6623_s22 = smov [#allocation13]   ;;  %s89_s21 = int_to_ptr.vmem [resolvable:$true] %s88_s21 }
  0x52   :  { %s114_s23 = sshll.u32 %s6623_s22, 4  ;;  %s6504_s1 = scalar_lea.vmem %s89_s21, 1024  ;;  %s115_s23 = int_to_ptr.vmem [resolvable:$true] %s114_s23 }
  0x53   :  { %p6505_p2 = scmp.ne.s32.totalorder %s89_s21, %s6504_s1  ;;  %p6509_p3 = scmp.lt.s32.totalorder %s89_s21, %s89_s21 }
  0x54   :  { %p6510_p4 = scmp.lt.s32.totalorder %s6504_s1, %s6504_s1 }
  0x56   :  { %68 = dma.hbm_to_vmem [thread:$0]  %s7758_s27, 128, %s63_s2, [#allocation6], %s6618_s0, %s6618_s0, %s6619_s4  }
  0x57   :  { %p6511_p5 = por %p6510_p4, %p6509_p3 }
  0x59   :  { %p6512_p6 = pnand %p6511_p5, %p6505_p2 }
  0x5b   :  { %6515 = shalt.err (!%p6512_p6)
}
  0x5c   :  { %s7759_s26 = sld [smem:[#allocation32_spill]]  ;;  %s6524_s2 = scalar_lea.vmem %s115_s23, 2048 }
  0x5d   :  { %p6525_p7 = scmp.ne.s32.totalorder %s115_s23, %s6524_s2  ;;  %p6529_p8 = scmp.lt.s32.totalorder %s115_s23, %s115_s23 }
  0x5e   :  { %p6530_p9 = scmp.lt.s32.totalorder %s6524_s2, %s6524_s2 }
  0x60   :  { %p6531_p10 = por %p6530_p9, %p6529_p8 }
  0x62   :  { %94 = dma.hbm_to_vmem [thread:$0]  %s7759_s26, 1024, %s89_s21, [#allocation9], %s6618_s0, %s6618_s0, %s6619_s4  }
  0x63   :  { %p6532_p11 = pnand %p6531_p10, %p6525_p7 }
  0x65   :  { %6535 = shalt.err (!%p6532_p11)
}
  0x66   :  { %120 = dma.hbm_to_vmem [thread:$0]  %s7732_s8, 2048, %s115_s23, [#allocation12], %s6612_s28, %s6612_s28, %s6613_s29  }
  0x67   :  { %s6624_s9 = smov [#allocation16]   ;;  %s6625_s30 = smov [#allocation17]  }
  0x68   :  { %s140_s20 = sshll.u32 %s6624_s9, 4  ;;  %s154_s27 = sshll.u32 %s6625_s30, 4  ;;  %s141_s20 = int_to_ptr.vmem [resolvable:$true] %s140_s20  ;;  %s155_s27 = int_to_ptr.vmem [resolvable:$true] %s154_s27 }
  0x69   :  { %s6544_s5 = scalar_lea.vmem %s141_s20, 2048  ;;  %p6549_p13 = scmp.lt.s32.totalorder %s141_s20, %s141_s20 }
  0x6a   :  { %p6545_p12 = scmp.ne.s32.totalorder %s141_s20, %s6544_s5  ;;  %p6550_p0 = scmp.lt.s32.totalorder %s6544_s5, %s6544_s5 }
  0x6c   :  { %p6551_p1 = por %p6550_p0, %p6549_p13 }
  0x6e   :  { %p6552_p2 = pnand %p6551_p1, %p6545_p12 }
  0x70   :  { %6555 = shalt.err (!%p6552_p2)
}
  0x71   :  { %146 = dma.hbm_to_vmem [thread:$0]  %s7735_s11, 2048, %s141_s20, [#allocation15], %s6612_s28, %s6612_s28, %s6613_s29  }
  0x72   :  { %s6564_s8 = scalar_lea.vmem %s155_s27, 2048  ;;  %p6569_p4 = scmp.lt.s32.totalorder %s155_s27, %s155_s27 }
  0x73   :  { %p6565_p3 = scmp.ne.s32.totalorder %s155_s27, %s6564_s8  ;;  %p6570_p5 = scmp.lt.s32.totalorder %s6564_s8, %s6564_s8 }
  0x75   :  { %p6571_p6 = por %p6570_p5, %p6569_p4 }
  0x77   :  { %p6572_p7 = pnand %p6571_p6, %p6565_p3 }
  0x79   :  { %6575 = shalt.err (!%p6572_p7)
}
  0x7a   :  { %160 = dma.hbm_to_vmem [thread:$0]  %s7737_s13, 2048, %s155_s27, [#allocation18], %s6618_s0, %s6618_s0, %s6619_s4  }
  0x7b   :  { %6596 = dma.done.wait [#allocation3], 256  }
  0x7c   :  { %6597 = vsyncadd [#allocation3], 4294967040 }
  0x7d   :  { %6598 = dma.done.wait [#allocation6], 384  }
  0x7e   :  { %6599 = vsyncadd [#allocation6], 4294966912 }
  0x7f   :  { %6600 = dma.done.wait [#allocation9], 4096  }
  0x80   :  { %6601 = vsyncadd [#allocation9], 4294963200 }
  0x81   :  { %6602 = dma.done.wait [#allocation12], 3072  }
  0x82   :  { %6603 = vsyncadd [#allocation12], 4294964224 }
  0x83   :  { %6604 = dma.done.wait [#allocation15], 3072  }
  0x84   :  { %6605 = vsyncadd [#allocation15], 4294964224 }
  0x85   :  { %6606 = dma.done.wait [#allocation18], 2048  }
  0x86   :  { %6607 = vsyncadd [#allocation18], 4294965248  ;;  %v6626_v0 = vmov 0   ;;  %v6178_v1 = vld [vmem:[#allocation8 + $0xac] ss:$12 sps:$4 sm:$0xff]   ;;  %v207_v18 = vld [vmem:[#allocation2 + $0x8] sm:$0xff]  ;;  %v219_v33 = vlaneseq }
  0x87   :  { %420 = vmatprep.mubr.bf16.mxu0 %v6626_v0  ;;  %v6180_v2 = vld [vmem:[#allocation8 + $0xa8] ss:$12 sps:$4 sm:$0xff]   ;;  %388 = vmatprep.subr.bf16.mxu0 %v6178_v1  ;;  %v6183_v4 = vld [vmem:[#allocation8 + $0x90] ss:$12 sps:$4 sm:$0xff]   ;;  %v6186_v6 = vld [vmem:[#allocation8 + $0x78] ss:$12 sps:$4 sm:$0xff]  }
  0x88   :  { %v6181_v3 = vld [vmem:[#allocation8 + $0x94] ss:$12 sps:$4 sm:$0xff]   ;;  %389 = vmatpush1.bf16.msra.mxu0 %v6180_v2  ;;  %v6184_v5 = vld [vmem:[#allocation8 + $0x7c] ss:$12 sps:$4 sm:$0xff]   ;;  %v6187_v7 = vld [vmem:[#allocation8 + $0x64] ss:$12 sps:$4 sm:$0xff]  }
  0x89   :  { %390 = vmatprep.subr.bf16.mxu0 %v6181_v3  ;;  %v6189_v8 = vld [vmem:[#allocation8 + $0x60] ss:$12 sps:$4 sm:$0xff]   ;;  %v6192_v10 = vld [vmem:[#allocation8 + $0x48] ss:$12 sps:$4 sm:$0xff]   ;;  %v6195_v12 = vld [vmem:[#allocation8 + $0x30] ss:$12 sps:$4 sm:$0xff]  }
  0x8a   :  { %v6190_v9 = vld [vmem:[#allocation8 + $0x4c] ss:$12 sps:$4 sm:$0xff]   ;;  %v6193_v11 = vld [vmem:[#allocation8 + $0x34] ss:$12 sps:$4 sm:$0xff]   ;;  %v6196_v13 = vld [vmem:[#allocation8 + $0x1c] ss:$12 sps:$4 sm:$0xff]  }
  0x8b   :  { %v6198_v14 = vld [vmem:[#allocation8 + $0x18] ss:$12 sps:$4 sm:$0xff]   ;;  %v6201_v16 = vld [vmem:[#allocation8] ss:$12 sps:$4 sm:$0xff]   ;;  %v6202_v20 = vld [vmem:[#allocation8 + $0xb0] ss:$12 sps:$4 sm:$0xff]  }
  0x8c   :  { %391 = vmatpush1.bf16.msra.mxu0 %v6183_v4  ;;  %v6199_v15 = vld [vmem:[#allocation8 + $0x4] ss:$12 sps:$4 sm:$0xff]   ;;  %v206_v17 = vld [vmem:[#allocation2] sm:$0xff]  ;;  %v6627_v21 = vmov 0.0   ;;  %v6204_v23 = vld [vmem:[#allocation8 + $0x80] ss:$12 sps:$4 sm:$0xff]  }
  0x8d   :  { %392 = vmatprep.subr.bf16.mxu0 %v6184_v5  ;;  %v227_v19 = vpack.c.bf16 %v207_v18, %v206_v17  ;;  %5852 = vmatprep.subr.bf16.mxu1 %v6627_v21  ;;  %v6203_v22 = vld [vmem:[#allocation8 + $0x98] ss:$12 sps:$4 sm:$0xff]   ;;  %v6205_v24 = vld [vmem:[#allocation8 + $0x68] ss:$12 sps:$4 sm:$0xff]   ;;  %v6206_v25 = vld [vmem:[#allocation8 + $0x50] ss:$12 sps:$4 sm:$0xff]  }
  0x8e   :  { %5853 = vmatpush3.bf16.msra.mxu1 %v6202_v20  ;;  %v6207_v26 = vld [vmem:[#allocation8 + $0x38] ss:$12 sps:$4 sm:$0xff]   ;;  %v6208_v27 = vld [vmem:[#allocation8 + $0x20] ss:$12 sps:$4 sm:$0xff]   ;;  %v6209_v28 = vld [vmem:[#allocation8 + $0x8] ss:$12 sps:$4 sm:$0xff]  }
  0x8f   :  { %5854 = vmatprep.subr.bf16.mxu1 %v6627_v21  ;;  %vm6628_vm0 = vmmov 0   ;;  %s6629_s11 = smov 96   ;;  %s6630_s13 = smov 32   ;;  %v6631_v34 = vmov 1983009808   ;;  %v6840_v38 = vshrl.u32 %v219_v33, 7 }
  0x90   :  { %393 = vmatpush1.bf16.msra.mxu0 %v6186_v6  ;;  %5868 = vmatprep.mubr.msk.bf16.mxu1 %vm6628_vm0, %v6627_v21  ;;  %v512_v35 = vunpack.c.l.s4 %v6631_v34  ;;  %v6632_v40 = vmov 1934713408   ;;  %vm1381_vm1 = vcmask 261120   ;;  %vm1772_vm3 = vcmask 64512   ;;  %s7764_s3 = sld [smem:[#allocation30_spill]] }
  0x91   :  { %394 = vmatprep.subr.bf16.mxu0 %v6187_v7  ;;  %v544_v41 = vunpack.c.l.s4 %v6632_v40  ;;  %vm1880_vm5 = vcmask 1043456   ;;  %vm2544_vm6 = vcmask 523264   ;;  %vm2547_vm7 = vcmask 785408   ;;  %s7765_s1 = sld [smem:[#allocation33_spill]] }
  0x92   :  { %5855 = vmatpush3.bf16.msra.mxu1 %v6203_v22  ;;  %v513_v39 = vunpack.c.0.s8 %v512_v35 }
  0x93   :  { %5856 = vmatprep.subr.bf16.mxu1 %v6627_v21  ;;  %v545_v47 = vunpack.c.0.s8 %v544_v41 }
  0x94   :  { %395 = vmatpush1.bf16.msra.mxu0 %v6189_v8  ;;  %v6843_v44 = vsub.s32 %v513_v39, %v6840_v38 }
  0x95   :  { %396 = vmatprep.subr.bf16.mxu0 %v6190_v9  ;;  %v6848_v58 = vsub.s32 %v545_v47, %v6840_v38 }
  0x96   :  { %5857 = vmatpush3.bf16.msra.mxu1 %v6204_v23 }
  0x97   :  { %5858 = vmatprep.subr.bf16.mxu1 %v6627_v21 }
  0x98   :  { %397 = vmatpush1.bf16.msra.mxu0 %v6192_v10 }
  0x99   :  { %398 = vmatprep.subr.bf16.mxu0 %v6193_v11 }
  0x9a   :  { %5859 = vmatpush3.bf16.msra.mxu1 %v6205_v24 }
  0x9b   :  { %5860 = vmatprep.subr.bf16.mxu1 %v6627_v21 }
  0x9c   :  { %399 = vmatpush1.bf16.msra.mxu0 %v6195_v12 }
  0x9d   :  { %400 = vmatprep.subr.bf16.mxu0 %v6196_v13 }
  0x9e   :  { %5861 = vmatpush3.bf16.msra.mxu1 %v6206_v25 }
  0x9f   :  { %5862 = vmatprep.subr.bf16.mxu1 %v6627_v21 }
  0xa0   :  { %401 = vmatpush1.bf16.msra.mxu0 %v6198_v14 }
  0xa1   :  { %402 = vmatprep.subr.bf16.mxu0 %v6199_v15 }
  0xa2   :  { %5863 = vmatpush3.bf16.msra.mxu1 %v6207_v26 }
  0xa3   :  { %5864 = vmatprep.subr.bf16.mxu1 %v6627_v21 }
  0xa4   :  { %403 = vmatpush1.bf16.msra.mxu0 %v6201_v16 }
  0xa5   :  { %5896 = vmatprep.subr.bf16.mxu0 %v6627_v21 }
  0xa6   :  { %5865 = vmatpush3.bf16.msra.mxu1 %v6208_v27 }
  0xa7   :  { %421 = vmatmul.mubr.bf16.vlgmr.msra.gmra.mxu0 %v227_v19  ;;  %5866 = vmatprep.subr.bf16.mxu1 %v6627_v21 }
  0xa8   :  { %5898 = vmatprep.mubr.msk.bf16.mxu0 %vm6628_vm0, %v6627_v21 }
  0xaa   :  { %5867 = vmatpush3.bf16.msra.mxu1 %v6209_v28 }
  0xab   :  { %5872 = vmatprep.subr.bf16.mxu1 %v6627_v21 }
  0xad   :  { %5869 = vmatmul.mubr.bf16.vlgmr.msra.gmra.mxu1 %v227_v19 }
  0xae   :  { %5874 = vmatprep.mubr.msk.bf16.mxu1 %vm6628_vm0, %v6627_v21 }
 0x167   :  { %v422_v29 = vpop.f32.mrf.mxu0 }
 0x168   :  { %497 = vrot.lane.b32.xlu0 %v422_v29, %s6618_s0  ;;  %491 = vrot.lane.b32.xlu1 %v422_v29, %s6629_s11 }
 0x169   :  { %v424_v30 = vpop.f32.mrf.mxu0 }
 0x16b   :  { %v6822_v31 = vpop.f32.mrf.mxu0 }
 0x16c   :  { %795 = vrot.lane.b32.xlu1 %v424_v30, %s6630_s13  ;;  %783 = vrot.lane.b32.xlu0 %v424_v30, %s6629_s11 }
 0x16d   :  { %v6826_v32 = vpop.f32.mrf.mxu0 }
 0x170   :  { %503 = vrot.lane.b32.xlu1 %v422_v29, %s6630_s13  ;;  %789 = vrot.lane.b32.xlu0 %v424_v30, %s6618_s0 }
 0x174   :  { %791 = vrot.lane.b32.xlu1 %v6826_v32, %s6618_s0  ;;  %785 = vrot.lane.b32.xlu0 %v6826_v32, %s6629_s11 }
 0x178   :  { %493 = vrot.lane.b32.xlu1 %v6822_v31, %s6629_s11  ;;  %797 = vrot.lane.b32.xlu0 %v6826_v32, %s6630_s13 }
 0x17c   :  { %505 = vrot.lane.b32.xlu1 %v6822_v31, %s6630_s13  ;;  %499 = vrot.lane.b32.xlu0 %v6822_v31, %s6618_s0 }
 0x1da   :  { %v498_v36 = vpop.permute.xlu0 %497  ;;  %v492_v37 = vpop.permute.xlu1 %491 }
 0x1db   :  { %v509_v45 = vcombine.low %v422_v29, %v498_v36  ;;  %v510_v46 = vcombine.high %v422_v29, %v498_v36 }
 0x1dd   :  { %v517_v56 = vrot.slane %v509_v45, %v6843_v44  ;;  %v524_v57 = vrot.slane %v510_v46, %v6843_v44 }
 0x1de   :  { %v796_v42 = vpop.permute.xlu1 %795  ;;  %v784_v43 = vpop.permute.xlu0 %783 }
 0x1df   :  { %v817_v48 = vcombine.low %v784_v43, %v796_v42  ;;  %v818_v49 = vcombine.high %v784_v43, %v796_v42 }
 0x1e1   :  { %v825_v63 = vrot.slane %v817_v48, %v6843_v44  ;;  %v832_v1 = vrot.slane %v818_v49, %v6843_v44 }
 0x1e2   :  { %v504_v50 = vpop.permute.xlu1 %503  ;;  %v790_v51 = vpop.permute.xlu0 %789 }
 0x1e3   :  { %v525_v52 = vcombine.low %v492_v37, %v504_v50  ;;  %v526_v53 = vcombine.high %v492_v37, %v504_v50  ;;  %v801_v54 = vcombine.low %v424_v30, %v790_v51  ;;  %v802_v55 = vcombine.high %v424_v30, %v790_v51 }
 0x1e5   :  { %v533_v59 = vrot.slane %v525_v52, %v6843_v44  ;;  %v540_v60 = vrot.slane %v526_v53, %v6843_v44  ;;  %v809_v61 = vrot.slane %v801_v54, %v6843_v44  ;;  %v816_v62 = vrot.slane %v802_v55, %v6843_v44 }
 0x1e6   :  { %v792_v2 = vpop.permute.xlu1 %791  ;;  %v786_v3 = vpop.permute.xlu0 %785 }
 0x1e7   :  { %v541_v4 = vcombine.low %v517_v56, %v533_v59  ;;  %v542_v5 = vcombine.high %v517_v56, %v533_v59  ;;  %v557_v6 = vcombine.low %v524_v57, %v540_v60  ;;  %v558_v7 = vcombine.high %v524_v57, %v540_v60 }
 0x1e8   :  { %v833_v8 = vcombine.low %v809_v61, %v825_v63  ;;  %v834_v9 = vcombine.high %v809_v61, %v825_v63  ;;  %v849_v10 = vcombine.low %v816_v62, %v832_v1  ;;  %v850_v11 = vcombine.high %v816_v62, %v832_v1 }
 0x1e9   :  { %v549_v12 = vrot.slane %v541_v4, %v6848_v58  ;;  %v556_v13 = vrot.slane %v542_v5, %v6848_v58  ;;  %v565_v14 = vrot.slane %v557_v6, %v6848_v58  ;;  %v572_v15 = vrot.slane %v558_v7, %v6848_v58 }
 0x1ea   :  { %v841_v16 = vrot.slane %v833_v8, %v6848_v58  ;;  %v848_v17 = vrot.slane %v834_v9, %v6848_v58  ;;  %v857_v18 = vrot.slane %v849_v10, %v6848_v58  ;;  %v864_v19 = vrot.slane %v850_v11, %v6848_v58  ;;  %v494_v20 = vpop.permute.xlu1 %493  ;;  %v798_v22 = vpop.permute.xlu0 %797 }
 0x1eb   :  { %v645_v27 = vcombine.low %v549_v12, %v556_v13  ;;  %v5581_v28 = vcombine.high %v549_v12, %v556_v13  ;;  %v661_v29 = vcombine.low %v565_v14, %v572_v15  ;;  %v5582_v30 = vcombine.high %v565_v14, %v572_v15 }
 0x1ec   :  { %v937_v23 = vcombine.low %v841_v16, %v848_v17  ;;  %v5585_v24 = vcombine.high %v841_v16, %v848_v17  ;;  %v953_v25 = vcombine.low %v857_v18, %v864_v19  ;;  %v5586_v26 = vcombine.high %v857_v18, %v864_v19 }
 0x1ed   :  { %v869_v40 = vcombine.low %v6826_v32, %v792_v2  ;;  %v870_v41 = vcombine.high %v6826_v32, %v792_v2  ;;  %v885_v42 = vcombine.low %v786_v3, %v798_v22  ;;  %v886_v43 = vcombine.high %v786_v3, %v798_v22 }
 0x1ee   :  { %v506_v33 = vpop.permute.xlu1 %505  ;;  %v500_v34 = vpop.permute.xlu0 %499  ;;  %v6865_v35 = vrot.slane %v937_v23, %v6843_v44  ;;  %v6868_v36 = vrot.slane %v5585_v24, %v6843_v44  ;;  %v6871_v37 = vrot.slane %v953_v25, %v6843_v44  ;;  %v968_v39 = vrot.slane %v5586_v26, %v6843_v44 }
 0x1ef   :  { %v593_v45 = vcombine.low %v494_v20, %v506_v33  ;;  %v594_v46 = vcombine.high %v494_v20, %v506_v33  ;;  %v577_v47 = vcombine.low %v6822_v31, %v500_v34  ;;  %v578_v48 = vcombine.high %v6822_v31, %v500_v34 }
 0x1f0   :  { %v877_v49 = vrot.slane %v869_v40, %v6843_v44  ;;  %v884_v50 = vrot.slane %v870_v41, %v6843_v44  ;;  %v893_v51 = vrot.slane %v885_v42, %v6843_v44  ;;  %v900_v52 = vrot.slane %v886_v43, %v6843_v44 }
 0x1f1   :  { %v601_v53 = vrot.slane %v593_v45, %v6843_v44  ;;  %v608_v32 = vrot.slane %v594_v46, %v6843_v44  ;;  %v585_v54 = vrot.slane %v577_v47, %v6843_v44  ;;  %v592_v55 = vrot.slane %v578_v48, %v6843_v44 }
 0x1f2   :  { %v901_v56 = vcombine.low %v877_v49, %v893_v51  ;;  %v902_v57 = vcombine.high %v877_v49, %v893_v51  ;;  %v917_v59 = vcombine.low %v884_v50, %v900_v52  ;;  %v918_v31 = vcombine.high %v884_v50, %v900_v52 }
 0x1f3   :  { %v609_v60 = vcombine.low %v585_v54, %v601_v53  ;;  %v610_v61 = vcombine.high %v585_v54, %v601_v53  ;;  %v625_v62 = vcombine.low %v592_v55, %v608_v32  ;;  %v626_v63 = vcombine.high %v592_v55, %v608_v32 }
 0x1f4   :  { %v909_v1 = vrot.slane %v901_v56, %v6848_v58  ;;  %v916_v2 = vrot.slane %v902_v57, %v6848_v58  ;;  %v925_v3 = vrot.slane %v917_v59, %v6848_v58  ;;  %v932_v4 = vrot.slane %v918_v31, %v6848_v58 }
 0x1f5   :  { %v617_v5 = vrot.slane %v609_v60, %v6848_v58  ;;  %v624_v6 = vrot.slane %v610_v61, %v6848_v58  ;;  %v633_v7 = vrot.slane %v625_v62, %v6848_v58  ;;  %v640_v8 = vrot.slane %v626_v63, %v6848_v58 }
 0x1f6   :  { %v1005_v9 = vcombine.low %v909_v1, %v916_v2  ;;  %v5587_v10 = vcombine.high %v909_v1, %v916_v2  ;;  %v1021_v11 = vcombine.low %v925_v3, %v932_v4  ;;  %v5588_v12 = vcombine.high %v925_v3, %v932_v4 }
 0x1f7   :  { %v652_v13 = vrot.slane %v645_v27, %v6843_v44  ;;  %v660_v14 = vrot.slane %v5581_v28, %v6843_v44  ;;  %v668_v15 = vrot.slane %v661_v29, %v6843_v44  ;;  %v676_v16 = vrot.slane %v5582_v30, %v6843_v44 }
 0x1f8   :  { %v713_v17 = vcombine.low %v617_v5, %v624_v6  ;;  %v5583_v18 = vcombine.high %v617_v5, %v624_v6  ;;  %v729_v19 = vcombine.low %v633_v7, %v640_v8  ;;  %v5584_v20 = vcombine.high %v633_v7, %v640_v8 }
 0x1f9   :  { %v6899_v22 = vrot.slane %v1005_v9, %v6843_v44  ;;  %v6902_v23 = vrot.slane %v5587_v10, %v6843_v44  ;;  %v6905_v24 = vrot.slane %v1021_v11, %v6843_v44  ;;  %v6908_v25 = vrot.slane %v5588_v12, %v6843_v44 }
 0x1fa   :  { %v969_v26 = vcombine.low %v6865_v35, %v6868_v36  ;;  %v985_v27 = vcombine.low %v6871_v37, %v968_v39  ;;  %v970_v28 = vcombine.high %v6865_v35, %v6868_v36  ;;  %v986_v29 = vcombine.high %v6871_v37, %v968_v39 }
 0x1fb   :  { %v677_v30 = vcombine.low %v652_v13, %v660_v14  ;;  %v678_v33 = vcombine.high %v652_v13, %v660_v14  ;;  %v693_v34 = vcombine.low %v668_v15, %v676_v16  ;;  %v694_v40 = vcombine.high %v668_v15, %v676_v16 }
 0x1fc   :  { %v977_v41 = vrot.slane %v969_v26, %v6848_v58  ;;  %v993_v42 = vrot.slane %v985_v27, %v6848_v58  ;;  %v984_v43 = vrot.slane %v970_v28, %v6848_v58  ;;  %v1000_v45 = vrot.slane %v986_v29, %v6848_v58 }
 0x1fd   :  { %v6921_v46 = vrot.slane %v713_v17, %v6843_v44  ;;  %v6924_v47 = vrot.slane %v5583_v18, %v6843_v44  ;;  %v6927_v35 = vrot.slane %v729_v19, %v6843_v44  ;;  %v6930_v36 = vrot.slane %v5584_v20, %v6843_v44 }
 0x1fe   :  { %v1001_v37 = vcombine.low %v977_v41, %v993_v42  ;;  %v1003_v39 = vcombine.low %v984_v43, %v1000_v45  ;;  %v1037_v48 = vcombine.low %v6899_v22, %v6902_v23  ;;  %v1053_v49 = vcombine.low %v6905_v24, %v6908_v25 }
 0x1ff   :  { %v685_v50 = vrot.slane %v677_v30, %v6848_v58  ;;  %v701_v51 = vrot.slane %v693_v34, %v6848_v58  ;;  %v692_v52 = vrot.slane %v678_v33, %v6848_v58  ;;  %v708_v53 = vrot.slane %v694_v40, %v6848_v58 }
 0x200   :  { %v1373_v32 = vpack.c.bf16 %v1001_v37, %v1001_v37  ;;  %v1377_v54 = vpack.c.bf16 %v1003_v39, %v1003_v39  ;;  %v1045_v55 = vrot.slane %v1037_v48, %v6848_v58  ;;  %v1061_v56 = vrot.slane %v1053_v49, %v6848_v58 }
 0x201   :  { %v1004_v60 = vcombine.high %v984_v43, %v1000_v45  ;;  %v745_v61 = vcombine.low %v6921_v46, %v6924_v47  ;;  %v761_v62 = vcombine.low %v6927_v35, %v6930_v36  ;;  %v709_v63 = vcombine.low %v685_v50, %v701_v51 }
 0x202   :  { %v1386_v57 = vsel %vm1381_vm1, %v1373_v32, 0  ;;  %v1570_v59 = vsel %vm1381_vm1, %v1377_v54, 0  ;;  %v1069_v31 = vcombine.low %v1045_v55, %v1061_v56  ;;  %v711_v1 = vcombine.low %v692_v52, %v708_v53 }
 0x203   :  { %5873 = vmatpush3.bf16.xpose.msra.mxu1 %v1386_v57  ;;  %5897 = vmatpush3.bf16.xpose.msra.mxu0 %v1570_v59  ;;  %v1379_v3 = vpack.c.bf16 %v1004_v60, %v1004_v60  ;;  %v753_v4 = vrot.slane %v745_v61, %v6848_v58  ;;  %v1365_v5 = vpack.c.bf16 %v709_v63, %v709_v63 }
 0x204   :  { %5878 = vmatprep.subr.bf16.mxu1 %v6627_v21  ;;  %5908 = vmatprep.subr.bf16.mxu0 %v6627_v21  ;;  %v1374_v2 = vpack.c.bf16 %v1069_v31, %v1069_v31  ;;  %v1369_v6 = vpack.c.bf16 %v711_v1, %v711_v1  ;;  %v769_v8 = vrot.slane %v761_v62, %v6848_v58 }
 0x205   :  { %v1662_v9 = vsel %vm1381_vm1, %v1379_v3, 0  ;;  %v1002_v10 = vcombine.high %v977_v41, %v993_v42  ;;  %v712_v12 = vcombine.high %v692_v52, %v708_v53  ;;  %v1070_v17 = vcombine.high %v1045_v55, %v1061_v56 }
 0x206   :  { %v1432_v7 = vsel %vm1381_vm1, %v1374_v2, 0  ;;  %v777_v11 = vcombine.low %v753_v4, %v769_v8  ;;  %v1038_v18 = vcombine.high %v6899_v22, %v6902_v23  ;;  %v1054_v19 = vcombine.high %v6905_v24, %v6908_v25  ;;  %v6980_v24 = vpop.f32.mrf.mxu1 }
 0x207   :  { %v1375_v13 = vpack.c.bf16 %v1002_v10, %v1002_v10  ;;  %v1371_v15 = vpack.c.bf16 %v712_v12, %v712_v12  ;;  %v710_v20 = vcombine.high %v685_v50, %v701_v51  ;;  %v1376_v26 = vpack.c.bf16 %v1070_v17, %v1070_v17  ;;  %1075 = vrot.lane.b32.xlu1 %v6980_v24, %s6629_s11  ;;  %v5727_v51 = vld [vmem:[#allocation7] sm:$0xff]  }
 0x208   :  { %v1366_v14 = vpack.c.bf16 %v777_v11, %v777_v11  ;;  %v1052_v27 = vrot.slane %v1038_v18, %v6848_v58  ;;  %v1068_v28 = vrot.slane %v1054_v19, %v6848_v58  ;;  %v746_v25 = vcombine.high %v6921_v46, %v6924_v47  ;;  %v5870_v34 = vpop.f32.mrf.mxu1 }
 0x209   :  { %v1478_v16 = vsel %vm1381_vm1, %v1375_v13, 0  ;;  %v1367_v29 = vpack.c.bf16 %v710_v20, %v710_v20  ;;  %v1524_v22 = vsel %vm1381_vm1, %v1376_v26, 0  ;;  %v762_v30 = vcombine.high %v6927_v35, %v6930_v36 }
 0x20a   :  { %5875 = vmatmul.mubr.msk.bf16.vlgmr.msra.gmra.mxu1 %vm1381_vm1, %v1365_v5  ;;  %5899 = vmatmul.mubr.msk.bf16.vlgmr.msra.gmra.mxu0 %vm1381_vm1, %v1369_v6  ;;  %v1071_v23 = vcombine.low %v1052_v27, %v1068_v28  ;;  %v778_v33 = vcombine.high %v753_v4, %v769_v8  ;;  %v6989_v41 = vpop.f32.mrf.mxu1  ;;  %v760_v43 = vrot.slane %v746_v25, %v6848_v58  ;;  %v5728_v52 = vunpack.c.l.bf16 %v5727_v51 }
 0x20b   :  { %5879 = vmatpush3.bf16.xpose.msra.mxu1 %v1432_v7  ;;  %5909 = vmatpush3.bf16.xpose.msra.mxu0 %v1662_v9  ;;  %v776_v45 = vrot.slane %v762_v30, %v6848_v58  ;;  %v1072_v47 = vcombine.high %v1052_v27, %v1068_v28  ;;  %v5729_v2 = vunpack.c.h.bf16 %v5727_v51 }
 0x20c   :  { %5880 = vmatprep.mubr.msk.bf16.mxu1 %vm6628_vm0, %v6627_v21  ;;  %5910 = vmatprep.mubr.msk.bf16.mxu0 %vm6628_vm0, %v6627_v21  ;;  %v1378_v40 = vpack.c.bf16 %v1071_v23, %v1071_v23  ;;  %v1368_v42 = vpack.c.bf16 %v778_v33, %v778_v33  ;;  %v5871_v37 = vpop.f32.mrf.mxu1  ;;  %vm7006_vm2 = vcmp.ne.f32.partialorder %v5728_v52, 0.0 }
 0x20d   :  { %5884 = vmatprep.subr.bf16.mxu1 %v6627_v21  ;;  %5920 = vmatprep.subr.bf16.mxu0 %v6627_v21  ;;  %v779_v35 = vcombine.low %v760_v43, %v776_v45  ;;  %v1380_v36 = vpack.c.bf16 %v1072_v47, %v1072_v47  ;;  %v780_v49 = vcombine.high %v760_v43, %v776_v45  ;;  %vm7022_vm4 = vcmp.ne.f32.partialorder %v5729_v2, 0.0 }
 0x20e   :  { %v1616_v46 = vsel %vm1381_vm1, %v1378_v40, 0 }
 0x20f   :  { %v1370_v39 = vpack.c.bf16 %v779_v35, %v779_v35  ;;  %v1708_v48 = vsel %vm1381_vm1, %v1380_v36, 0  ;;  %v1372_v50 = vpack.c.bf16 %v780_v49, %v780_v49 }
 0x212   :  { %5881 = vmatmul.mubr.msk.bf16.vlgmr.msra.gmra.mxu1 %vm1381_vm1, %v1366_v14  ;;  %5911 = vmatmul.mubr.msk.bf16.vlgmr.msra.gmra.mxu0 %vm1381_vm1, %v1371_v15 }
 0x213   :  { %5885 = vmatpush3.bf16.xpose.msra.mxu1 %v1478_v16  ;;  %5886 = vmatprep.mubr.msk.bf16.mxu1 %vm6628_vm0, %v6627_v21 }
 0x214   :  { %5890 = vmatprep.subr.bf16.mxu1 %v6627_v21  ;;  %5922 = vmatprep.mubr.msk.bf16.mxu0 %vm6628_vm0, %v6627_v21 }
 0x21a   :  { %5887 = vmatmul.mubr.msk.bf16.vlgmr.msra.gmra.mxu1 %vm1381_vm1, %v1367_v29 }
 0x21b   :  { %5891 = vmatpush3.bf16.xpose.msra.mxu1 %v1524_v22  ;;  %5892 = vmatprep.mubr.msk.bf16.mxu1 %vm6628_vm0, %v6627_v21 }
 0x21c   :  { %5902 = vmatprep.subr.bf16.mxu1 %v6627_v21 }
 0x222   :  { %5893 = vmatmul.mubr.msk.bf16.vlgmr.msra.gmra.mxu1 %vm1381_vm1, %v1368_v42 }
 0x223   :  { %5903 = vmatpush3.bf16.xpose.msra.mxu1 %v1616_v46  ;;  %5904 = vmatprep.mubr.msk.bf16.mxu1 %vm6628_vm0, %v6627_v21 }
 0x224   :  { %5914 = vmatprep.subr.bf16.mxu1 %v6627_v21 }
 0x22a   :  { %5905 = vmatmul.mubr.msk.bf16.vlgmr.msra.gmra.mxu1 %vm1381_vm1, %v1370_v39 }
 0x22b   :  { %5915 = vmatpush3.bf16.xpose.msra.mxu1 %v1708_v48  ;;  %5916 = vmatprep.mubr.msk.bf16.mxu1 %vm6628_vm0, %v6627_v21 }
 0x22c   :  { %5926 = vmatprep.subr.bf16.mxu1 %v6627_v21 }
 0x232   :  { %5917 = vmatmul.mubr.msk.bf16.vlgmr.msra.gmra.mxu1 %vm1381_vm1, %v1372_v50 }
 0x233   :  { %5928 = vmatprep.mubr.msk.bf16.mxu1 %vm6628_vm0, %v6627_v21 }
 0x279   :  { %v7053_v54 = vpop.permute.xlu1 %1075 }
 0x2ca   :  { %v1422_v53 = vpop.f32.mrf.mxu1  ;;  %v1606_v32 = vpop.f32.mrf.mxu0 }
 0x2cb   :  { %v1750_v55 = vmul.f32 0.17677669, %v1422_v53  ;;  %v1754_v56 = vmul.f32 0.17677669, %v1606_v32 }
 0x2cc   :  { %v5876_v57 = vpop.f32.mrf.mxu1  ;;  %v5900_v59 = vpop.f32.mrf.mxu0 }
 0x2cd   :  { %v7012_v31 = vsel %vm7006_vm2, %v1750_v55, -10000.0  ;;  %v7016_v60 = vsel %vm7006_vm2, %v1754_v56, -10000.0 }
 0x2ce   :  { %v1425_v61 = vpop.f32.mrf.mxu1  ;;  %v1609_v62 = vpop.f32.mrf.mxu0  ;;  %v1773_v63 = vsel %vm1772_vm3, %v7012_v31, -inf  ;;  %v1785_v1 = vsel %vm1772_vm3, %v7016_v60, -inf }
 0x2cf   :  { %1774 = vmax.xlane.f32.xlu0 %v1773_v63  ;;  %1786 = vmax.xlane.f32.xlu1 %v1785_v1 }
 0x2d0   :  { %v5877_v3 = vpop.f32.mrf.mxu1  ;;  %v5901_v4 = vpop.f32.mrf.mxu0 }
 0x2d2   :  { %v1468_v5 = vpop.f32.mrf.mxu1  ;;  %v1698_v6 = vpop.f32.mrf.mxu0 }
 0x2d3   :  { %v1751_v8 = vmul.f32 0.17677669, %v1468_v5  ;;  %v1756_v9 = vmul.f32 0.17677669, %v1698_v6 }
 0x2d4   :  { %v5882_v10 = vpop.f32.mrf.mxu1  ;;  %v5912_v11 = vpop.f32.mrf.mxu0 }
 0x2d5   :  { %v1765_v12 = vsel %vm7022_vm4, %v1751_v8, -10000.0  ;;  %v7031_v16 = vsel %vm7006_vm2, %v1756_v9, -10000.0 }
 0x2d6   :  { %v1471_v13 = vpop.f32.mrf.mxu1  ;;  %v1701_v14 = vpop.f32.mrf.mxu0  ;;  %v1776_v15 = vsel %vm1772_vm3, %v1765_v12, -inf  ;;  %v1791_v20 = vsel %vm1772_vm3, %v7031_v16, -inf }
 0x2d7   :  { %1777 = vmax.xlane.f32.xlu1 %v1776_v15 }
 0x2d8   :  { %v5883_v17 = vpop.f32.mrf.mxu1  ;;  %v5913_v18 = vpop.f32.mrf.mxu0 }
 0x2da   :  { %v1514_v19 = vpop.f32.mrf.mxu1 }
 0x2db   :  { %v1752_v26 = vmul.f32 0.17677669, %v1514_v19  ;;  %1792 = vmax.xlane.f32.xlu1 %v1791_v20 }
 0x2dc   :  { %v5888_v27 = vpop.f32.mrf.mxu1 }
 0x2dd   :  { %v1766_v28 = vsel %vm7006_vm2, %v1752_v26, -10000.0 }
 0x2de   :  { %v1517_v29 = vpop.f32.mrf.mxu1  ;;  %v1779_v22 = vsel %vm1772_vm3, %v1766_v28, -inf }
 0x2df   :  { %1780 = vmax.xlane.f32.xlu0 %v1779_v22 }
 0x2e0   :  { %v5889_v23 = vpop.f32.mrf.mxu1 }
 0x2e2   :  { %v1560_v25 = vpop.f32.mrf.mxu1 }
 0x2e3   :  { %v1753_v30 = vmul.f32 0.17677669, %v1560_v25 }
 0x2e4   :  { %v5894_v33 = vpop.f32.mrf.mxu1 }
 0x2e5   :  { %v1767_v34 = vsel %vm7022_vm4, %v1753_v30, -10000.0 }
 0x2e6   :  { %v1563_v40 = vpop.f32.mrf.mxu1  ;;  %v1782_v42 = vsel %vm1772_vm3, %v1767_v34, -inf }
 0x2e7   :  { %1783 = vmax.xlane.f32.xlu0 %v1782_v42 }
 0x2e8   :  { %v5895_v43 = vpop.f32.mrf.mxu1 }
 0x2ea   :  { %v1652_v45 = vpop.f32.mrf.mxu1 }
 0x2eb   :  { %v1755_v37 = vmul.f32 0.17677669, %v1652_v45 }
 0x2ec   :  { %v5906_v46 = vpop.f32.mrf.mxu1  ;;  %1081 = vrot.lane.b32.xlu1 %v6980_v24, %s6618_s0 }
 0x2ed   :  { %v1769_v47 = vsel %vm7022_vm4, %v1755_v37, -10000.0 }
 0x2ee   :  { %v1655_v35 = vpop.f32.mrf.mxu1  ;;  %v1788_v36 = vsel %vm1772_vm3, %v1769_v47, -inf }
 0x2ef   :  { %1789 = vmax.xlane.f32.xlu0 %v1788_v36 }
 0x2f0   :  { %v5907_v39 = vpop.f32.mrf.mxu1  ;;  %1083 = vrot.lane.b32.xlu1 %v6989_v41, %s6618_s0 }
 0x2f2   :  { %v1744_v48 = vpop.f32.mrf.mxu1 }
 0x2f3   :  { %v1757_v49 = vmul.f32 0.17677669, %v1744_v48 }
 0x2f4   :  { %v5918_v50 = vpop.f32.mrf.mxu1 }
 0x2f5   :  { %v1771_v51 = vsel %vm7022_vm4, %v1757_v49, -10000.0 }
 0x2f6   :  { %v1747_v52 = vpop.f32.mrf.mxu1  ;;  %v1794_v53 = vsel %vm1772_vm3, %v1771_v51, -inf }
 0x2f7   :  { %1795 = vmax.xlane.f32.xlu0 %v1794_v53 }
 0x2f8   :  { %v5919_v32 = vpop.f32.mrf.mxu1 }
 0x30d   :  { %1077 = vrot.lane.b32.xlu0 %v6989_v41, %s6629_s11 }
 0x358   :  { %v1775_v55 = vpop.xlane.xlu0 %1774  ;;  %v1787_v59 = vpop.xlane.xlu1 %1786 }
 0x359   :  { %v1797_v56 = vsub.f32 %v7012_v31, %v1775_v55 }
 0x35b   :  { %v1805_v57 = vmul.f32 1.442695, %v1797_v56 }
 0x35d   :  { %6298 = vpow2.f32 %v1805_v57 }
 0x360   :  { %v1778_v61 = vpop.xlane.xlu1 %1777 }
 0x361   :  { %v1798_v62 = vsub.f32 %v1765_v12, %v1778_v61  ;;  %v1801_v12 = vsub.f32 %v7016_v60, %v1787_v59 }
 0x363   :  { %v1807_v63 = vmul.f32 1.442695, %v1798_v62  ;;  %v1813_v15 = vmul.f32 1.442695, %v1801_v12 }
 0x364   :  { %v1793_v7 = vpop.xlane.xlu1 %1792 }
 0x365   :  { %6300 = vpow2.f32 %v1807_v63  ;;  %v1803_v8 = vsub.f32 %v7031_v16, %v1793_v7 }
 0x367   :  { %v1817_v10 = vmul.f32 1.442695, %v1803_v8 }
 0x368   :  { %v1781_v31 = vpop.xlane.xlu0 %1780  ;;  %v1082_v42 = vpop.permute.xlu1 %1081 }
 0x369   :  { %v1799_v11 = vsub.f32 %v1766_v28, %v1781_v31  ;;  %v1093_v57 = vcombine.low %v6980_v24, %v1082_v42  ;;  %v1094_v63 = vcombine.high %v6980_v24, %v1082_v42 }
 0x36a   :  { %v7056_v1 = vpop.eup %6298 }
 0x36b   :  { %v1821_v2 = vsel %vm1772_vm3, %v7056_v1, 0.0  ;;  %v1809_v13 = vmul.f32 1.442695, %v1799_v11  ;;  %v1101_v7 = vrot.slane %v1093_v57, %v6843_v44 }
 0x36c   :  { %1822 = vadd.xlane.f32.xlu1 %v1821_v2  ;;  %v1084_v43 = vpop.permute.xlu1 %1083 }
 0x36d   :  { %v1161_v37 = vcombine.low %v6989_v41, %v1084_v43  ;;  %v1162_v46 = vcombine.high %v6989_v41, %v1084_v43 }
 0x36f   :  { %v1169_v48 = vrot.slane %v1161_v37, %v6843_v44  ;;  %v1176_v49 = vrot.slane %v1162_v46, %v6843_v44 }
 0x370   :  { %v1784_v5 = vpop.xlane.xlu0 %1783 }
 0x371   :  { %v1800_v6 = vsub.f32 %v1767_v34, %v1784_v5 }
 0x372   :  { %v7060_v3 = vpop.eup %6300 }
 0x373   :  { %v1824_v4 = vsel %vm1772_vm3, %v7060_v3, 0.0  ;;  %v1811_v9 = vmul.f32 1.442695, %v1800_v6 }
 0x374   :  { %1825 = vadd.xlane.f32.xlu0 %v1824_v4 }
 0x375   :  { %6302 = vpow2.f32 %v1811_v9 }
 0x376   :  { %6304 = vpow2.f32 %v1817_v10 }
 0x377   :  { %6306 = vpow2.f32 %v1809_v13  ;;  %v1108_v13 = vrot.slane %v1094_v63, %v6843_v44 }
 0x378   :  { %v1790_v14 = vpop.xlane.xlu0 %1789  ;;  %6308 = vpow2.f32 %v1813_v15 }
 0x379   :  { %v1802_v17 = vsub.f32 %v1769_v47, %v1790_v14 }
 0x37b   :  { %v1815_v19 = vmul.f32 1.442695, %v1802_v17 }
 0x37d   :  { %1089 = vrot.lane.b32.xlu1 %v6989_v41, %s6630_s13  ;;  %6310 = vpow2.f32 %v1815_v19 }
 0x380   :  { %v1796_v18 = vpop.xlane.xlu0 %1795 }
 0x381   :  { %v1804_v20 = vsub.f32 %v1771_v51, %v1796_v18 }
 0x382   :  { %v7070_v26 = vpop.eup %6302 }
 0x383   :  { %v1819_v16 = vmul.f32 1.442695, %v1804_v20  ;;  %v1830_v27 = vsel %vm1772_vm3, %v7070_v26, 0.0  ;;  %v7074_v28 = vpop.eup %6304 }
 0x384   :  { %v1839_v60 = vsel %vm1772_vm3, %v7074_v28, 0.0  ;;  %v7078_v29 = vpop.eup %6306  ;;  %v1078_v47 = vpop.permute.xlu0 %1077 }
 0x385   :  { %6312 = vpow2.f32 %v1819_v16  ;;  %v1827_v22 = vsel %vm1772_vm3, %v7078_v29, 0.0  ;;  %v7082_v23 = vpop.eup %6308 }
 0x386   :  { %v1833_v25 = vsel %vm1772_vm3, %v7082_v23, 0.0 }
 0x38a   :  { %1087 = vrot.lane.b32.xlu0 %v6980_v24, %s6630_s13  ;;  %v7086_v30 = vpop.eup %6310 }
 0x38b   :  { %v1836_v33 = vsel %vm1772_vm3, %v7086_v30, 0.0 }
 0x392   :  { %v7090_v34 = vpop.eup %6312 }
 0x393   :  { %v1842_v40 = vsel %vm1772_vm3, %v7090_v34, 0.0 }
 0x3a1   :  { %1831 = vadd.xlane.f32.xlu1 %v1830_v27 }
 0x3a5   :  { %1840 = vadd.xlane.f32.xlu1 %v1839_v60 }
 0x3a9   :  { %1828 = vadd.xlane.f32.xlu0 %v1827_v22 }
 0x3ad   :  { %1834 = vadd.xlane.f32.xlu0 %v1833_v25 }
 0x3b1   :  { %1837 = vadd.xlane.f32.xlu0 %v1836_v33 }
 0x3b5   :  { %1843 = vadd.xlane.f32.xlu0 %v1842_v40 }
 0x3f5   :  { %v1823_v45 = vpop.xlane.xlu1 %1822 }
 0x3f9   :  { %v1090_v35 = vpop.permute.xlu1 %1089 }
 0x3fa   :  { %v1177_v36 = vcombine.low %v1078_v47, %v1090_v35  ;;  %v1178_v39 = vcombine.high %v1078_v47, %v1090_v35 }
 0x3fc   :  { %v1185_v50 = vrot.slane %v1177_v36, %v6843_v44  ;;  %v1192_v51 = vrot.slane %v1178_v39, %v6843_v44 }
 0x3fd   :  { %v1826_v52 = vpop.xlane.xlu0 %1825 }
 0x3fe   :  { %v1193_v53 = vcombine.low %v1169_v48, %v1185_v50  ;;  %v1194_v32 = vcombine.high %v1169_v48, %v1185_v50  ;;  %v1209_v55 = vcombine.low %v1176_v49, %v1192_v51  ;;  %v1210_v56 = vcombine.high %v1176_v49, %v1192_v51 }
 0x3ff   :  { %6314 = vrcp.f32 %v1826_v52 }
 0x400   :  { %v1201_v41 = vrot.slane %v1193_v53, %v6848_v58  ;;  %v1208_v59 = vrot.slane %v1194_v32, %v6848_v58  ;;  %v1217_v61 = vrot.slane %v1209_v55, %v6848_v58  ;;  %v1224_v62 = vrot.slane %v1210_v56, %v6848_v58 }
 0x401   :  { %v1088_v2 = vpop.permute.xlu0 %1087  ;;  %6316 = vrcp.f32 %v1823_v45 }
 0x402   :  { %v1297_v4 = vcombine.low %v1201_v41, %v1208_v59  ;;  %v5591_v31 = vcombine.high %v1201_v41, %v1208_v59  ;;  %v1313_v5 = vcombine.low %v1217_v61, %v1224_v62  ;;  %v5592_v6 = vcombine.high %v1217_v61, %v1224_v62 }
 0x403   :  { %v1109_v8 = vcombine.low %v7053_v54, %v1088_v2  ;;  %v1110_v9 = vcombine.high %v7053_v54, %v1088_v2 }
 0x404   :  { %v7110_v10 = vrot.slane %v1297_v4, %v6843_v44  ;;  %v7113_v11 = vrot.slane %v5591_v31, %v6843_v44  ;;  %v7116_v12 = vrot.slane %v1313_v5, %v6843_v44  ;;  %v7119_v24 = vrot.slane %v5592_v6, %v6843_v44 }
 0x405   :  { %v1117_v14 = vrot.slane %v1109_v8, %v6843_v44  ;;  %v1124_v15 = vrot.slane %v1110_v9, %v6843_v44 }
 0x406   :  { %v1329_v54 = vcombine.low %v7110_v10, %v7113_v11  ;;  %v1345_v17 = vcombine.low %v7116_v12, %v7119_v24  ;;  %v1346_v8 = vcombine.high %v7116_v12, %v7119_v24 }
 0x407   :  { %v1125_v18 = vcombine.low %v1101_v7, %v1117_v14  ;;  %v1126_v19 = vcombine.high %v1101_v7, %v1117_v14  ;;  %v1141_v20 = vcombine.low %v1108_v13, %v1124_v15  ;;  %v1142_v16 = vcombine.high %v1108_v13, %v1124_v15 }
 0x408   :  { %v1337_v27 = vrot.slane %v1329_v54, %v6848_v58  ;;  %v1353_v60 = vrot.slane %v1345_v17, %v6848_v58  ;;  %v1360_v13 = vrot.slane %v1346_v8, %v6848_v58 }
 0x409   :  { %v1133_v22 = vrot.slane %v1125_v18, %v6848_v58  ;;  %v1140_v25 = vrot.slane %v1126_v19, %v6848_v58  ;;  %v1149_v33 = vrot.slane %v1141_v20, %v6848_v58  ;;  %v1156_v40 = vrot.slane %v1142_v16, %v6848_v58 }
 0x40a   :  { %v1361_v42 = vcombine.low %v1337_v27, %v1353_v60  ;;  %v1362_v43 = vcombine.high %v1337_v27, %v1353_v60 }
 0x40b   :  { %v1229_v45 = vcombine.low %v1133_v22, %v1140_v25  ;;  %v5589_v37 = vcombine.high %v1133_v22, %v1140_v25  ;;  %v1245_v46 = vcombine.low %v1149_v33, %v1156_v40  ;;  %v5590_v47 = vcombine.high %v1149_v33, %v1156_v40 }
 0x40c   :  { %v6315_v35 = vpop.eup %6314  ;;  %v1870_v36 = vpack.c.bf16 %v1361_v42, %v1361_v42  ;;  %v1872_v53 = vpack.c.bf16 %v1362_v43, %v1362_v43 }
 0x40d   :  { %v1236_v39 = vrot.slane %v1229_v45, %v6843_v44  ;;  %v1244_v48 = vrot.slane %v5589_v37, %v6843_v44  ;;  %v1252_v49 = vrot.slane %v1245_v46, %v6843_v44  ;;  %v1260_v50 = vrot.slane %v5590_v47, %v6843_v44 }
 0x40e   :  { %v1928_v51 = vsel %vm1880_vm5, %v1870_v36, 0  ;;  %v1854_v52 = vmul.f32 %v6315_v35, %v7060_v3  ;;  %v6317_v59 = vpop.eup %6316  ;;  %v2020_v61 = vsel %vm1880_vm5, %v1872_v53, 0 }
 0x40f   :  { %5927 = vmatpush3.bf16.msra.mxu1 %v1928_v51  ;;  %v1261_v32 = vcombine.low %v1236_v39, %v1244_v48  ;;  %v1277_v55 = vcombine.low %v1252_v49, %v1260_v50  ;;  %v1853_v2 = vmul.f32 %v6317_v59, %v7056_v1  ;;  %v1330_v1 = vcombine.high %v7110_v10, %v7113_v11  ;;  %v6215_v59 = vld [vmem:[#allocation10 + $0x10] sm:$0xff]  }
 0x410   :  { %v1862_v56 = vpack.c.bf16 %v1854_v52, %v1854_v52  ;;  %5938 = vmatprep.subr.bf16.mxu1 %v6627_v21  ;;  %v1262_v54 = vcombine.high %v1236_v39, %v1244_v48  ;;  %v1278_v17 = vcombine.high %v1252_v49, %v1260_v50 }
 0x411   :  { %v1269_v57 = vrot.slane %v1261_v32, %v6848_v58  ;;  %v1285_v41 = vrot.slane %v1277_v55, %v6848_v58  ;;  %v1861_v5 = vpack.c.bf16 %v1853_v2, %v1853_v2  ;;  %v1344_v9 = vrot.slane %v1330_v1, %v6848_v58 }
 0x412   :  { %5929 = vmatmul.mubr.msk.bf16.vlgmr.msra.gmra.mxu1 %vm1772_vm3, %v1862_v56  ;;  %v1276_v10 = vrot.slane %v1262_v54, %v6848_v58  ;;  %v1292_v11 = vrot.slane %v1278_v17, %v6848_v58  ;;  %v6210_v56 = vld [vmem:[#allocation10 + $0x38] sm:$0xff]  }
 0x413   :  { %5939 = vmatpush3.bf16.msra.mxu1 %v2020_v61  ;;  %v1293_v62 = vcombine.low %v1269_v57, %v1285_v41  ;;  %v1294_v63 = vcombine.high %v1269_v57, %v1285_v41  ;;  %5940 = vmatprep.mubr.msk.bf16.mxu1 %vm6628_vm0, %v6627_v21  ;;  %v1363_v15 = vcombine.low %v1344_v9, %v1360_v13  ;;  %v6213_v57 = vld [vmem:[#allocation10 + $0x20] sm:$0xff]   ;;  %v6214_v41 = vld [vmem:[#allocation10 + $0x18] sm:$0xff]  }
 0x414   :  { %5950 = vmatprep.subr.bf16.mxu1 %v6627_v21  ;;  %v1295_v22 = vcombine.low %v1276_v10, %v1292_v11  ;;  %v1296_v37 = vcombine.high %v1276_v10, %v1292_v11  ;;  %v1364_v46 = vcombine.high %v1344_v9, %v1360_v13 }
 0x415   :  { %v1869_v3 = vpack.c.bf16 %v1293_v62, %v1293_v62  ;;  %v1871_v31 = vpack.c.bf16 %v1294_v63, %v1294_v63  ;;  %v1874_v16 = vpack.c.bf16 %v1363_v15, %v1363_v15 }
 0x416   :  { %v1873_v40 = vpack.c.bf16 %v1295_v22, %v1295_v22  ;;  %v1875_v36 = vpack.c.bf16 %v1296_v37, %v1296_v37  ;;  %v1876_v39 = vpack.c.bf16 %v1364_v46, %v1364_v46 }
 0x417   :  { %v1882_v4 = vsel %vm1880_vm5, %v1869_v3, 0  ;;  %v1974_v6 = vsel %vm1880_vm5, %v1871_v31, 0  ;;  %v2112_v60 = vsel %vm1880_vm5, %v1874_v16, 0 }
 0x418   :  { %5921 = vmatpush3.bf16.msra.mxu0 %v1882_v4  ;;  %v2066_v45 = vsel %vm1880_vm5, %v1873_v40, 0  ;;  %v2158_v52 = vsel %vm1880_vm5, %v1875_v36, 0  ;;  %v2204_v53 = vsel %vm1880_vm5, %v1876_v39, 0 }
 0x419   :  { %5932 = vmatprep.subr.bf16.mxu0 %v6627_v21 }
 0x41b   :  { %5923 = vmatmul.mubr.msk.bf16.vlgmr.msra.gmra.mxu0 %vm1772_vm3, %v1861_v5 }
 0x41c   :  { %5933 = vmatpush3.bf16.msra.mxu0 %v1974_v6  ;;  %5934 = vmatprep.mubr.msk.bf16.mxu0 %vm6628_vm0, %v6627_v21 }
 0x41d   :  { %5944 = vmatprep.subr.bf16.mxu0 %v6627_v21 }
 0x42a   :  { %v1832_v7 = vpop.xlane.xlu1 %1831 }
 0x42b   :  { %6318 = vrcp.f32 %v1832_v7 }
 0x42e   :  { %v1841_v24 = vpop.xlane.xlu1 %1840 }
 0x432   :  { %v1829_v14 = vpop.xlane.xlu0 %1828 }
 0x433   :  { %6320 = vrcp.f32 %v1829_v14 }
 0x436   :  { %v1835_v18 = vpop.xlane.xlu0 %1834 }
 0x437   :  { %6322 = vrcp.f32 %v1835_v18 }
 0x438   :  { %v6319_v19 = vpop.eup %6318 }
 0x439   :  { %v1856_v20 = vmul.f32 %v6319_v19, %v7070_v26 }
 0x43a   :  { %v1838_v12 = vpop.xlane.xlu0 %1837 }
 0x43b   :  { %6324 = vrcp.f32 %v1838_v12  ;;  %v1864_v27 = vpack.c.bf16 %v1856_v20, %v1856_v20 }
 0x43c   :  { %6326 = vrcp.f32 %v1841_v24 }
 0x43d   :  { %5941 = vmatmul.mubr.msk.bf16.vlgmr.msra.gmra.mxu1 %vm1772_vm3, %v1864_v27 }
 0x43e   :  { %5951 = vmatpush3.bf16.msra.mxu1 %v2112_v60  ;;  %v1844_v25 = vpop.xlane.xlu0 %1843  ;;  %5952 = vmatprep.mubr.msk.bf16.mxu1 %vm6628_vm0, %v6627_v21 }
 0x43f   :  { %6328 = vrcp.f32 %v1844_v25  ;;  %5962 = vmatprep.subr.bf16.mxu1 %v6627_v21 }
 0x440   :  { %v6321_v26 = vpop.eup %6320 }
 0x441   :  { %v1855_v33 = vmul.f32 %v6321_v26, %v7078_v29 }
 0x443   :  { %v1863_v42 = vpack.c.bf16 %v1855_v33, %v1855_v33 }
 0x444   :  { %v6323_v43 = vpop.eup %6322 }
 0x445   :  { %5935 = vmatmul.mubr.msk.bf16.vlgmr.msra.gmra.mxu0 %vm1772_vm3, %v1863_v42  ;;  %v1857_v47 = vmul.f32 %v6323_v43, %v7082_v23 }
 0x446   :  { %5945 = vmatpush3.bf16.msra.mxu0 %v2066_v45  ;;  %5946 = vmatprep.mubr.msk.bf16.mxu0 %vm6628_vm0, %v6627_v21 }
 0x447   :  { %5956 = vmatprep.subr.bf16.mxu0 %v6627_v21  ;;  %v1865_v49 = vpack.c.bf16 %v1857_v47, %v1857_v47 }
 0x448   :  { %v6325_v35 = vpop.eup %6324 }
 0x449   :  { %v1858_v29 = vmul.f32 %v6325_v35, %v7086_v30  ;;  %v6327_v48 = vpop.eup %6326 }
 0x44a   :  { %v1859_v23 = vmul.f32 %v6327_v48, %v7074_v28  ;;  %v6211_v28 = vld [vmem:[#allocation10 + $0x30] sm:$0xff]  }
 0x44b   :  { %v1866_v50 = vpack.c.bf16 %v1858_v29, %v1858_v29 }
 0x44c   :  { %v6329_v51 = vpop.eup %6328  ;;  %v1867_v32 = vpack.c.bf16 %v1859_v23, %v1859_v23 }
 0x44d   :  { %5947 = vmatmul.mubr.msk.bf16.vlgmr.msra.gmra.mxu0 %vm1772_vm3, %v1865_v49  ;;  %5953 = vmatmul.mubr.msk.bf16.vlgmr.msra.gmra.mxu1 %vm1772_vm3, %v1866_v50  ;;  %v1860_v30 = vmul.f32 %v6329_v51, %v7090_v34  ;;  %v6212_v34 = vld [vmem:[#allocation10 + $0x28] sm:$0xff]  }
 0x44e   :  { %5957 = vmatpush3.bf16.msra.mxu0 %v2158_v52  ;;  %5963 = vmatpush3.bf16.msra.mxu1 %v2204_v53 }
 0x44f   :  { %5958 = vmatprep.mubr.msk.bf16.mxu0 %vm6628_vm0, %v6627_v21  ;;  %5964 = vmatprep.mubr.msk.bf16.mxu1 %vm6628_vm0, %v6627_v21  ;;  %v1868_v55 = vpack.c.bf16 %v1860_v30, %v1860_v30 }
 0x450   :  { %5968 = vmatprep.subr.bf16.mxu0 %v6627_v21  ;;  %5988 = vmatprep.subr.bf16.mxu1 %v6627_v21 }
 0x455   :  { %5959 = vmatmul.mubr.msk.bf16.vlgmr.msra.gmra.mxu0 %vm1772_vm3, %v1867_v32  ;;  %5965 = vmatmul.mubr.msk.bf16.vlgmr.msra.gmra.mxu1 %vm1772_vm3, %v1868_v55 }
 0x456   :  { %5984 = vmatprep.mubr.msk.bf16.mxu0 %vm6628_vm0, %v6627_v21  ;;  %6004 = vmatprep.mubr.msk.bf16.mxu1 %vm6628_vm0, %v6627_v21 }
 0x457   :  { %5969 = vmatpush3.bf16.msra.mxu0 %v6210_v56 }
 0x458   :  { %5970 = vmatprep.subr.bf16.mxu0 %v6627_v21 }
 0x45b   :  { %5971 = vmatpush3.bf16.msra.mxu0 %v6211_v28 }
 0x45c   :  { %5972 = vmatprep.subr.bf16.mxu0 %v6627_v21 }
 0x45f   :  { %5973 = vmatpush3.bf16.msra.mxu0 %v6212_v34 }
 0x460   :  { %5974 = vmatprep.subr.bf16.mxu0 %v6627_v21 }
 0x463   :  { %5975 = vmatpush3.bf16.msra.mxu0 %v6213_v57 }
 0x464   :  { %5976 = vmatprep.subr.bf16.mxu0 %v6627_v21 }
 0x467   :  { %5977 = vmatpush3.bf16.msra.mxu0 %v6214_v41 }
 0x468   :  { %5978 = vmatprep.subr.bf16.mxu0 %v6627_v21 }
 0x46b   :  { %5979 = vmatpush3.bf16.msra.mxu0 %v6215_v59 }
 0x46c   :  { %5980 = vmatprep.subr.bf16.mxu0 %v6627_v21 }
 0x4d2   :  { %v1964_v61 = vpop.f32.mrf.mxu1 }
 0x4d4   :  { %v5930_v62 = vpop.f32.mrf.mxu1 }
 0x4d6   :  { %v1967_v63 = vpop.f32.mrf.mxu1 }
 0x4d8   :  { %v5931_v3 = vpop.f32.mrf.mxu1 }
 0x4db   :  { %v1918_v2 = vpop.f32.mrf.mxu0 }
 0x4dd   :  { %v5924_v4 = vpop.f32.mrf.mxu0 }
 0x4df   :  { %v1921_v31 = vpop.f32.mrf.mxu0 }
 0x4e1   :  { %v5925_v5 = vpop.f32.mrf.mxu0 }
 0x4fd   :  { %v2056_v6 = vpop.f32.mrf.mxu1 }
 0x4ff   :  { %v5942_v7 = vpop.f32.mrf.mxu1 }
 0x501   :  { %v2059_v1 = vpop.f32.mrf.mxu1 }
 0x503   :  { %v5943_v8 = vpop.f32.mrf.mxu1 }
 0x505   :  { %v2010_v9 = vpop.f32.mrf.mxu0 }
 0x507   :  { %v5936_v13 = vpop.f32.mrf.mxu0 }
 0x509   :  { %v2013_v14 = vpop.f32.mrf.mxu0 }
 0x50b   :  { %v5937_v15 = vpop.f32.mrf.mxu0 }
 0x50d   :  { %v2102_v54 = vpop.f32.mrf.mxu0  ;;  %v2148_v17 = vpop.f32.mrf.mxu1 }
 0x50e   :  { %v2246_v10 = vcombine.low %v1918_v2, %v2102_v54  ;;  %v2247_v11 = vcombine.high %v1918_v2, %v2102_v54  ;;  %v2314_v27 = vcombine.low %v1964_v61, %v2148_v17  ;;  %v2315_v60 = vcombine.high %v1964_v61, %v2148_v17  ;;  %v6216_v17 = vld [vmem:[#allocation10 + $0x8] sm:$0xff]  }
 0x50f   :  { %v5948_v18 = vpop.f32.mrf.mxu0  ;;  %v5954_v19 = vpop.f32.mrf.mxu1  ;;  %5981 = vmatpush3.bf16.msra.mxu0 %v6216_v17  ;;  %v6235_v17 = vld [vmem:[#allocation13 + $0x24] ss:$8 sps:$4 sm:$0xff]  }
 0x510   :  { %v2254_v43 = vrot.slane %v2246_v10, %v6843_v44  ;;  %v2261_v45 = vrot.slane %v2247_v11, %v6843_v44  ;;  %v2322_v39 = vrot.slane %v2314_v27, %v6843_v44  ;;  %v2329_v48 = vrot.slane %v2315_v60, %v6843_v44  ;;  %5982 = vmatprep.subr.bf16.mxu0 %v6627_v21 }
 0x511   :  { %v2105_v20 = vpop.f32.mrf.mxu0  ;;  %v2151_v16 = vpop.f32.mrf.mxu1 }
 0x513   :  { %v5949_v12 = vpop.f32.mrf.mxu0  ;;  %v5955_v24 = vpop.f32.mrf.mxu1 }
 0x515   :  { %v2194_v22 = vpop.f32.mrf.mxu0  ;;  %v2240_v25 = vpop.f32.mrf.mxu1 }
 0x516   :  { %v2262_v26 = vcombine.low %v2010_v9, %v2194_v22  ;;  %v2263_v33 = vcombine.high %v2010_v9, %v2194_v22  ;;  %v2330_v40 = vcombine.low %v2056_v6, %v2240_v25  ;;  %v2331_v42 = vcombine.high %v2056_v6, %v2240_v25 }
 0x517   :  { %v5960_v37 = vpop.f32.mrf.mxu0  ;;  %v5966_v46 = vpop.f32.mrf.mxu1 }
 0x518   :  { %v2270_v47 = vrot.slane %v2262_v26, %v6843_v44  ;;  %v2277_v35 = vrot.slane %v2263_v33, %v6843_v44  ;;  %v2338_v29 = vrot.slane %v2330_v40, %v6843_v44  ;;  %v2345_v36 = vrot.slane %v2331_v42, %v6843_v44 }
 0x519   :  { %v2197_v49 = vpop.f32.mrf.mxu0  ;;  %v2243_v50 = vpop.f32.mrf.mxu1 }
 0x51a   :  { %v2278_v51 = vcombine.low %v2254_v43, %v2270_v47  ;;  %v2279_v52 = vcombine.high %v2254_v43, %v2270_v47  ;;  %v2294_v53 = vcombine.low %v2261_v45, %v2277_v35  ;;  %v2295_v23 = vcombine.high %v2261_v45, %v2277_v35  ;;  %v6217_v47 = vld [vmem:[#allocation10] sm:$0xff]  }
 0x51b   :  { %v2346_v30 = vcombine.low %v2322_v39, %v2338_v29  ;;  %v2347_v32 = vcombine.high %v2322_v39, %v2338_v29  ;;  %v2362_v55 = vcombine.low %v2329_v48, %v2345_v36  ;;  %v2363_v56 = vcombine.high %v2329_v48, %v2345_v36  ;;  %v5961_v28 = vpop.f32.mrf.mxu0  ;;  %v5967_v34 = vpop.f32.mrf.mxu1  ;;  %5983 = vmatpush3.bf16.msra.mxu0 %v6217_v47 }
 0x51c   :  { %v2286_v57 = vrot.slane %v2278_v51, %v6848_v58  ;;  %v2293_v41 = vrot.slane %v2279_v52, %v6848_v58  ;;  %v2302_v59 = vrot.slane %v2294_v53, %v6848_v58  ;;  %v2309_v61 = vrot.slane %v2295_v23, %v6848_v58 }
 0x51d   :  { %v2354_v62 = vrot.slane %v2346_v30, %v6848_v58  ;;  %v2361_v63 = vrot.slane %v2347_v32, %v6848_v58  ;;  %v2370_v3 = vrot.slane %v2362_v55, %v6848_v58  ;;  %v2377_v2 = vrot.slane %v2363_v56, %v6848_v58 }
 0x51e   :  { %v2382_v4 = vcombine.low %v2286_v57, %v2293_v41  ;;  %v5609_v31 = vcombine.high %v2286_v57, %v2293_v41  ;;  %v2398_v5 = vcombine.low %v2302_v59, %v2309_v61  ;;  %v5610_v6 = vcombine.high %v2302_v59, %v2309_v61 }
 0x51f   :  { %v2450_v7 = vcombine.low %v2354_v62, %v2361_v63  ;;  %v5611_v1 = vcombine.high %v2354_v62, %v2361_v63  ;;  %v2466_v8 = vcombine.low %v2370_v3, %v2377_v2  ;;  %v5612_v9 = vcombine.high %v2370_v3, %v2377_v2 }
 0x520   :  { %v2389_v13 = vrot.slane %v2382_v4, %v6843_v44  ;;  %v2397_v14 = vrot.slane %v5609_v31, %v6843_v44  ;;  %v2405_v15 = vrot.slane %v2398_v5, %v6843_v44  ;;  %v2413_v54 = vrot.slane %v5610_v6, %v6843_v44  ;;  %v6218_v5 = vld [vmem:[#allocation13 + $0x70] ss:$8 sps:$4 sm:$0xff]   ;;  %v6220_v6 = vld [vmem:[#allocation13 + $0x74] ss:$8 sps:$4 sm:$0xff]  }
 0x521   :  { %v2457_v18 = vrot.slane %v2450_v7, %v6843_v44  ;;  %v2465_v19 = vrot.slane %v5611_v1, %v6843_v44  ;;  %v2473_v20 = vrot.slane %v2466_v8, %v6843_v44  ;;  %v2481_v16 = vrot.slane %v5612_v9, %v6843_v44  ;;  %v6223_v7 = vld [vmem:[#allocation13 + $0x64] ss:$8 sps:$4 sm:$0xff]   ;;  %2895 = vmatprep.subr.bf16.mxu0 %v6220_v6  ;;  %v6221_v1 = vld [vmem:[#allocation13 + $0x60] ss:$8 sps:$4 sm:$0xff]   ;;  %v6226_v8 = vld [vmem:[#allocation13 + $0x54] ss:$8 sps:$4 sm:$0xff]  }
 0x522   :  { %v2415_v10 = vcombine.high %v2389_v13, %v2397_v14  ;;  %v2431_v11 = vcombine.high %v2405_v15, %v2413_v54  ;;  %v2414_v12 = vcombine.low %v2389_v13, %v2397_v14  ;;  %v2430_v24 = vcombine.low %v2405_v15, %v2413_v54  ;;  %v6224_v9 = vld [vmem:[#allocation13 + $0x50] ss:$8 sps:$4 sm:$0xff]   ;;  %v6229_v13 = vld [vmem:[#allocation13 + $0x44] ss:$8 sps:$4 sm:$0xff]   ;;  %v6227_v14 = vld [vmem:[#allocation13 + $0x40] ss:$8 sps:$4 sm:$0xff]  }
 0x523   :  { %v2483_v27 = vcombine.high %v2457_v18, %v2465_v19  ;;  %v2499_v60 = vcombine.high %v2473_v20, %v2481_v16  ;;  %v2482_v22 = vcombine.low %v2457_v18, %v2465_v19  ;;  %v2498_v25 = vcombine.low %v2473_v20, %v2481_v16  ;;  %v6232_v15 = vld [vmem:[#allocation13 + $0x34] ss:$8 sps:$4 sm:$0xff]   ;;  %v6230_v54 = vld [vmem:[#allocation13 + $0x30] ss:$8 sps:$4 sm:$0xff]   ;;  %v6233_v18 = vld [vmem:[#allocation13 + $0x20] ss:$8 sps:$4 sm:$0xff]  }
 0x524   :  { %v2429_v26 = vrot.slane %v2415_v10, %v6848_v58  ;;  %v2445_v33 = vrot.slane %v2431_v11, %v6848_v58  ;;  %v2422_v40 = vrot.slane %v2414_v12, %v6848_v58  ;;  %v2438_v42 = vrot.slane %v2430_v24, %v6848_v58  ;;  %v6238_v19 = vld [vmem:[#allocation13 + $0x14] ss:$8 sps:$4 sm:$0xff]   ;;  %v6236_v20 = vld [vmem:[#allocation13 + $0x10] ss:$8 sps:$4 sm:$0xff]   ;;  %v6241_v16 = vld [vmem:[#allocation13 + $0x4] ss:$8 sps:$4 sm:$0xff]  }
 0x525   :  { %v2497_v43 = vrot.slane %v2483_v27, %v6848_v58  ;;  %v2513_v45 = vrot.slane %v2499_v60, %v6848_v58  ;;  %v2490_v37 = vrot.slane %v2482_v22, %v6848_v58  ;;  %v2506_v46 = vrot.slane %v2498_v25, %v6848_v58  ;;  %v6239_v10 = vld [vmem:[#allocation13] ss:$8 sps:$4 sm:$0xff]   ;;  %v209_v12 = vld [vmem:[#allocation5 + $0x8] sm:$0xff]  ;;  %v5613_v27 = vld [vmem:[%s7730_s6] ss:$0 sm:$0xff] }
 0x526   :  { %v2448_v35 = vcombine.low %v2429_v26, %v2445_v33  ;;  %v2447_v29 = vcombine.high %v2422_v40, %v2438_v42  ;;  %v2446_v36 = vcombine.low %v2422_v40, %v2438_v42  ;;  %v2449_v52 = vcombine.high %v2429_v26, %v2445_v33  ;;  %v208_v11 = vld [vmem:[#allocation5] sm:$0xff]  ;;  %v6374_v26 = vld [vmem:[#allocation2] sm:$0xff] }
 0x527   :  { %v2516_v39 = vcombine.low %v2497_v43, %v2513_v45  ;;  %v2514_v48 = vcombine.low %v2490_v37, %v2506_v46  ;;  %v2515_v49 = vcombine.high %v2490_v37, %v2506_v46  ;;  %v2517_v53 = vcombine.high %v2497_v43, %v2513_v45  ;;  %v6375_v45 = vld [vmem:[#allocation2 + $0x8] sm:$0xff] }
 0x528   :  { %v210_v24 = vpack.c.bf16 %v209_v12, %v208_v11 }
 0x529   :  { %v6153_v50 = vpack.i.bf16 %v2516_v39, %v2448_v35  ;;  %v6148_v51 = vpack.i.bf16 %v2515_v49, %v2447_v29  ;;  %v6158_v23 = vpack.i.bf16 %v2517_v53, %v2449_v52  ;;  %v6242_v35 = vld [vmem:[#allocation11 + $0x38] sm:$0xff]   ;;  %v6243_v29 = vld [vmem:[#allocation11 + $0x30] sm:$0xff]   ;;  %v6245_v39 = vld [vmem:[#allocation11 + $0x20] sm:$0xff]  }
 0x52a   :  { %5989 = vmatpush3.bf16.msra.mxu1 %v6242_v35  ;;  %v6247_v49 = vld [vmem:[#allocation11 + $0x10] sm:$0xff]  }
 0x52b   :  { %6154 = vrot.lane.b32.xlu0 %v6153_v50, %s6618_s0  ;;  %6149 = vrot.lane.b32.xlu1 %v6148_v51, %s6630_s13  ;;  %v6248_v50 = vld [vmem:[#allocation11 + $0x8] sm:$0xff]   ;;  %v6249_v51 = vld [vmem:[#allocation11] sm:$0xff]  }
 0x52c   :  { %5990 = vmatprep.subr.bf16.mxu1 %v6627_v21 }
 0x52e   :  { %5991 = vmatpush3.bf16.msra.mxu1 %v6243_v29 }
 0x52f   :  { %6159 = vrot.lane.b32.xlu1 %v6158_v23, %s6629_s11  ;;  %5992 = vmatprep.subr.bf16.mxu1 %v6627_v21 }
 0x59d   :  { %v6155_v30 = vpop.permute.xlu0 %6154  ;;  %v6150_v32 = vpop.permute.xlu1 %6149 }
 0x59e   :  { %v6152_v55 = vunpack.i.h.bf16 %v6150_v32  ;;  %v6151_v56 = vunpack.i.l.bf16 %v6150_v32  ;;  %v6157_v28 = vunpack.i.h.bf16 %v6155_v30  ;;  %v6156_v34 = vunpack.i.l.bf16 %v6155_v30 }
 0x5a0   :  { %v2543_v57 = vsel %vm1381_vm1, %v2514_v48, %v6152_v55  ;;  %v2542_v41 = vsel %vm1381_vm1, %v2446_v36, %v6151_v56  ;;  %v6244_v36 = vld [vmem:[#allocation11 + $0x28] sm:$0xff]   ;;  %v6246_v48 = vld [vmem:[#allocation11 + $0x18] sm:$0xff]  }
 0x5a1   :  { %v6160_v59 = vpop.permute.xlu1 %6159  ;;  %v2545_v63 = vsel %vm2544_vm6, %v2542_v41, %v6156_v34  ;;  %v2546_v3 = vsel %vm2544_vm6, %v2543_v57, %v6157_v28  ;;  %5993 = vmatpush3.bf16.msra.mxu1 %v6244_v36 }
 0x5a2   :  { %v6162_v61 = vunpack.i.h.bf16 %v6160_v59  ;;  %v6161_v62 = vunpack.i.l.bf16 %v6160_v59  ;;  %5994 = vmatprep.subr.bf16.mxu1 %v6627_v21 }
 0x5a4   :  { %v2548_v2 = vsel %vm2547_vm7, %v2545_v63, %v6161_v62  ;;  %v2549_v4 = vsel %vm2547_vm7, %v2546_v3, %v6162_v61 }
 0x5a5   :  { %v2550_v31 = vpack.c.bf16 %v2549_v4, %v2548_v2  ;;  %5995 = vmatpush3.bf16.msra.mxu1 %v6245_v39 }
 0x5a6   :  { %5996 = vmatprep.subr.bf16.mxu1 %v6627_v21 }
 0x5a7   :  { %5985 = vmatmul.mubr.bf16.vlgmr.msra.gmra.mxu0 %v2550_v31 }
 0x5a8   :  { %2927 = vmatprep.mubr.bf16.mxu0 %v6626_v0  ;;  %2896 = vmatpush1.bf16.msra.mxu0 %v6218_v5  ;;  %v5622_v5 = vld [vmem:[%s7739_s15] ss:$0 sm:$0xff] }
 0x5a9   :  { %2897 = vmatprep.subr.bf16.mxu0 %v6223_v7  ;;  %5997 = vmatpush3.bf16.msra.mxu1 %v6246_v48 }
 0x5aa   :  { %5998 = vmatprep.subr.bf16.mxu1 %v6627_v21 }
 0x5ac   :  { %2898 = vmatpush1.bf16.msra.mxu0 %v6221_v1 }
 0x5ad   :  { %2899 = vmatprep.subr.bf16.mxu0 %v6226_v8  ;;  %5999 = vmatpush3.bf16.msra.mxu1 %v6247_v49 }
 0x5ae   :  { %6000 = vmatprep.subr.bf16.mxu1 %v6627_v21 }
 0x5b0   :  { %2900 = vmatpush1.bf16.msra.mxu0 %v6224_v9 }
 0x5b1   :  { %2901 = vmatprep.subr.bf16.mxu0 %v6229_v13  ;;  %6001 = vmatpush3.bf16.msra.mxu1 %v6248_v50  ;;  %v5623_v13 = vld [vmem:[%s7740_s16] ss:$0 sm:$0xff] }
 0x5b2   :  { %6002 = vmatprep.subr.bf16.mxu1 %v6627_v21 }
 0x5b4   :  { %2902 = vmatpush1.bf16.msra.mxu0 %v6227_v14 }
 0x5b5   :  { %2903 = vmatprep.subr.bf16.mxu0 %v6232_v15  ;;  %6003 = vmatpush3.bf16.msra.mxu1 %v6249_v51 }
 0x5b6   :  { %6008 = vmatprep.subr.bf16.mxu1 %v6627_v21 }
 0x5b8   :  { %2904 = vmatpush1.bf16.msra.mxu0 %v6230_v54 }
 0x5b9   :  { %2905 = vmatprep.subr.bf16.mxu0 %v6235_v17 }
 0x5bc   :  { %2906 = vmatpush1.bf16.msra.mxu0 %v6233_v18 }
 0x5bd   :  { %2907 = vmatprep.subr.bf16.mxu0 %v6238_v19 }
 0x5c0   :  { %2908 = vmatpush1.bf16.msra.mxu0 %v6236_v20 }
 0x5c1   :  { %2909 = vmatprep.subr.bf16.mxu0 %v6241_v16 }
 0x5c4   :  { %2910 = vmatpush1.bf16.msra.mxu0 %v6239_v10 }
 0x5c5   :  { %6032 = vmatprep.subr.bf16.mxu0 %v6627_v21 }
 0x5c7   :  { %2928 = vmatmul.mubr.bf16.vlgmr.msra.gmra.mxu0 %v210_v24 }
 0x5c8   :  { %6034 = vmatprep.mubr.msk.bf16.mxu0 %vm6628_vm0, %v6627_v21 }
 0x667   :  { %v2639_v60 = vpop.f32.mrf.mxu0 }
 0x668   :  { %v2640_v22 = vadd.f32 %v5613_v27, %v2639_v60 }
 0x669   :  { %v5986_v25 = vpop.f32.mrf.mxu0 }
 0x66a   :  { %v7251_v33 = vadd.f32 %v6374_v26, %v2640_v22 }
 0x66b   :  { %v2642_v40 = vpop.f32.mrf.mxu0 }
 0x66c   :  { %v2643_v42 = vadd.f32 %v5613_v27, %v2642_v40  ;;  %2650 = vadd.xlane.f32.xlu1 %v7251_v33  ;;  %v2657_v47 = vmul.f32 %v7251_v33, %v7251_v33 }
 0x66d   :  { %v5987_v43 = vpop.f32.mrf.mxu0 }
 0x66e   :  { %v2647_v37 = vadd.f32 %v6375_v45, %v2643_v42 }
 0x670   :  { %2652 = vadd.xlane.f32.xlu0 %v2647_v37  ;;  %v2658_v46 = vmul.f32 %v2647_v37, %v2647_v37 }
 0x672   :  { %2661 = vadd.xlane.f32.xlu1 %v2658_v46 }
 0x674   :  { %2659 = vadd.xlane.f32.xlu0 %v2657_v47 }
 0x687   :  { %v2929_v52 = vpop.f32.mrf.mxu0 }
 0x688   :  { %3255 = vrot.lane.b32.xlu1 %v2929_v52, %s6618_s0 }
 0x689   :  { %v7266_v53 = vpop.f32.mrf.mxu0 }
 0x68a   :  { %3249 = vrot.lane.b32.xlu0 %v2929_v52, %s6629_s11 }
 0x68b   :  { %v7268_v23 = vpop.f32.mrf.mxu0 }
 0x68c   :  { %3261 = vrot.lane.b32.xlu1 %v2929_v52, %s6630_s13 }
 0x68e   :  { %3257 = vrot.lane.b32.xlu0 %v7268_v23, %s6618_s0 }
 0x690   :  { %3251 = vrot.lane.b32.xlu1 %v7268_v23, %s6629_s11 }
 0x6f5   :  { %v2651_v30 = vpop.xlane.xlu1 %2650 }
 0x6f6   :  { %v2655_v55 = vmul.f32 0.0078125, %v2651_v30 }
 0x6f8   :  { %v2665_v59 = vmul.f32 %v2655_v55, %v2655_v55  ;;  %v2669_v6 = vsub.f32 %v7251_v33, %v2655_v55 }
 0x6f9   :  { %v2653_v32 = vpop.xlane.xlu0 %2652 }
 0x6fa   :  { %v2656_v56 = vmul.f32 0.0078125, %v2653_v32 }
 0x6fb   :  { %v2662_v28 = vpop.xlane.xlu1 %2661 }
 0x6fc   :  { %v2666_v34 = vmul.f32 %v2656_v56, %v2656_v56  ;;  %v2664_v57 = vmul.f32 0.0078125, %v2662_v28  ;;  %v2670_v4 = vsub.f32 %v2647_v37, %v2656_v56 }
 0x6fd   :  { %v2660_v41 = vpop.xlane.xlu0 %2659 }
 0x6fe   :  { %v2668_v61 = vsub.f32 %v2664_v57, %v2666_v34  ;;  %v2663_v62 = vmul.f32 0.0078125, %v2660_v41 }
 0x6ff   :  { %v3256_v18 = vpop.permute.xlu1 %3255 }
 0x700   :  { %v2672_v63 = vadd.f32 1e-05, %v2668_v61  ;;  %v2667_v3 = vsub.f32 %v2663_v62, %v2665_v59  ;;  %v3267_v19 = vcombine.low %v2929_v52, %v3256_v18  ;;  %v3268_v20 = vcombine.high %v2929_v52, %v3256_v18 }
 0x701   :  { %v3250_v16 = vpop.permute.xlu0 %3249 }
 0x702   :  { %6330 = vrsqrt.f32 %v2672_v63  ;;  %v2671_v2 = vadd.f32 1e-05, %v2667_v3  ;;  %v3275_v11 = vrot.slane %v3267_v19, %v6843_v44  ;;  %v3282_v12 = vrot.slane %v3268_v20, %v6843_v44 }
 0x703   :  { %v3262_v10 = vpop.permute.xlu1 %3261 }
 0x704   :  { %6332 = vrsqrt.f32 %v2671_v2  ;;  %v3283_v24 = vcombine.low %v3250_v16, %v3262_v10  ;;  %v3284_v27 = vcombine.high %v3250_v16, %v3262_v10 }
 0x706   :  { %v3291_v60 = vrot.slane %v3283_v24, %v6843_v44  ;;  %v3298_v22 = vrot.slane %v3284_v27, %v6843_v44 }
 0x708   :  { %v3299_v25 = vcombine.low %v3275_v11, %v3291_v60  ;;  %v3300_v26 = vcombine.high %v3275_v11, %v3291_v60  ;;  %v3315_v33 = vcombine.low %v3282_v12, %v3298_v22  ;;  %v3316_v40 = vcombine.high %v3282_v12, %v3298_v22 }
 0x70a   :  { %v3307_v42 = vrot.slane %v3299_v25, %v6848_v58  ;;  %v3314_v43 = vrot.slane %v3300_v26, %v6848_v58  ;;  %v3323_v45 = vrot.slane %v3315_v33, %v6848_v58  ;;  %v3330_v37 = vrot.slane %v3316_v40, %v6848_v58 }
 0x70c   :  { %v3403_v46 = vcombine.low %v3307_v42, %v3314_v43  ;;  %v5652_v47 = vcombine.high %v3307_v42, %v3314_v43  ;;  %v3419_v35 = vcombine.low %v3323_v45, %v3330_v37  ;;  %v5653_v29 = vcombine.high %v3323_v45, %v3330_v37 }
 0x70e   :  { %v3410_v36 = vrot.slane %v3403_v46, %v6843_v44  ;;  %v3418_v39 = vrot.slane %v5652_v47, %v6843_v44  ;;  %v3426_v48 = vrot.slane %v3419_v35, %v6843_v44  ;;  %v3434_v49 = vrot.slane %v5653_v29, %v6843_v44 }
 0x70f   :  { %v6331_v31 = vpop.eup %6330 }
 0x710   :  { %v2676_v7 = vmul.f32 %v6331_v31, %v2670_v4  ;;  %v3435_v50 = vcombine.low %v3410_v36, %v3418_v39  ;;  %v3451_v51 = vcombine.low %v3426_v48, %v3434_v49  ;;  %v3436_v52 = vcombine.high %v3410_v36, %v3418_v39 }
 0x711   :  { %v6333_v1 = vpop.eup %6332  ;;  %v3452_v30 = vcombine.high %v3426_v48, %v3434_v49 }
 0x712   :  { %v2675_v8 = vmul.f32 %v6333_v1, %v2669_v6  ;;  %v2684_v9 = vmul.f32 %v5622_v5, %v2676_v7  ;;  %v3443_v32 = vrot.slane %v3435_v50, %v6848_v58  ;;  %v3459_v55 = vrot.slane %v3451_v51, %v6848_v58  ;;  %v7325_v6 = vpop.f32.mrf.mxu0  ;;  %v3258_v7 = vpop.permute.xlu0 %3257 }
 0x713   :  { %v3450_v56 = vrot.slane %v3436_v52, %v6848_v58  ;;  %v3466_v28 = vrot.slane %v3452_v30, %v6848_v58  ;;  %v3252_v1 = vpop.permute.xlu1 %3251  ;;  %v3336_v18 = vcombine.high %v7268_v23, %v3258_v7 }
 0x714   :  { %v2683_v14 = vmul.f32 %v5622_v5, %v2675_v8  ;;  %v7284_v54 = vadd.f32 %v5623_v13, %v2684_v9  ;;  %v3467_v34 = vcombine.low %v3443_v32, %v3459_v55  ;;  %v7310_v3 = vcombine.high %v3443_v32, %v3459_v55 }
 0x715   :  { %v3469_v57 = vcombine.low %v3450_v56, %v3466_v28  ;;  %v7308_v63 = vcombine.high %v3450_v56, %v3466_v28  ;;  %v3350_v33 = vrot.slane %v3336_v18, %v6843_v44 }
 0x716   :  { %v7282_v15 = vadd.f32 %v5623_v13, %v2683_v14  ;;  %v3839_v41 = vpack.c.bf16 %v3467_v34, %v3467_v34 }
 0x717   :  { %v3843_v59 = vpack.c.bf16 %v3469_v57, %v3469_v57  ;;  %v3845_v40 = vpack.c.bf16 %v7308_v63, %v7308_v63 }
 0x718   :  { %v2693_v17 = vpack.c.bf16 %v7284_v54, %v7282_v15  ;;  %v3851_v61 = vsel %vm1381_vm1, %v3839_v41, 0 }
 0x719   :  { %v4035_v62 = vsel %vm1381_vm1, %v3843_v59, 0 }
 0x71a   :  { %6005 = vmatmul.mubr.bf16.vlgmr.msra.gmra.mxu1 %v2693_v17  ;;  %6033 = vmatpush3.bf16.xpose.msra.mxu0 %v4035_v62  ;;  %v3335_v17 = vcombine.low %v7268_v23, %v3258_v7 }
 0x71b   :  { %6010 = vmatprep.mubr.msk.bf16.mxu1 %vm6628_vm0, %v6627_v21  ;;  %6009 = vmatpush3.bf16.xpose.msra.mxu1 %v3851_v61 }
 0x71c   :  { %6044 = vmatprep.subr.bf16.mxu0 %v6627_v21  ;;  %6014 = vmatprep.subr.bf16.mxu1 %v6627_v21 }
 0x7da   :  { %v2792_v2 = vpop.f32.mrf.mxu1 }
 0x7db   :  { %2957 = vrot.lane.b32.xlu0 %v2792_v2, %s6629_s11  ;;  %2963 = vrot.lane.b32.xlu1 %v2792_v2, %s6618_s0 }
 0x7dc   :  { %v6006_v4 = vpop.f32.mrf.mxu1 }
 0x7de   :  { %v7316_v31 = vpop.f32.mrf.mxu1 }
 0x7df   :  { %2969 = vrot.lane.b32.xlu0 %v2792_v2, %s6630_s13  ;;  %3263 = vrot.lane.b32.xlu1 %v7268_v23, %s6630_s13  ;;  %v3343_v23 = vrot.slane %v3335_v17, %v6843_v44 }
 0x7e0   :  { %v6007_v5 = vpop.f32.mrf.mxu1 }
 0x7e3   :  { %2959 = vrot.lane.b32.xlu0 %v7316_v31, %s6629_s11  ;;  %2965 = vrot.lane.b32.xlu1 %v7316_v31, %s6618_s0 }
 0x7e7   :  { %2971 = vrot.lane.b32.xlu0 %v7316_v31, %s6630_s13  ;;  %3543 = vrot.lane.b32.xlu1 %v7325_v6, %s6629_s11 }
 0x7eb   :  { %3541 = vrot.lane.b32.xlu0 %v7266_v53, %s6629_s11 }
 0x84d   :  { %v2958_v8 = vpop.permute.xlu0 %2957  ;;  %v2964_v9 = vpop.permute.xlu1 %2963 }
 0x84e   :  { %v2975_v13 = vcombine.low %v2792_v2, %v2964_v9  ;;  %v2976_v14 = vcombine.high %v2792_v2, %v2964_v9 }
 0x850   :  { %v2983_v24 = vrot.slane %v2975_v13, %v6843_v44  ;;  %v2990_v27 = vrot.slane %v2976_v14, %v6843_v44 }
 0x851   :  { %v2970_v19 = vpop.permute.xlu0 %2969  ;;  %v3264_v20 = vpop.permute.xlu1 %3263 }
 0x852   :  { %v2991_v16 = vcombine.low %v2958_v8, %v2970_v19  ;;  %v2992_v10 = vcombine.high %v2958_v8, %v2970_v19  ;;  %v3351_v11 = vcombine.low %v3252_v1, %v3264_v20  ;;  %v3352_v12 = vcombine.high %v3252_v1, %v3264_v20 }
 0x854   :  { %v2999_v60 = vrot.slane %v2991_v16, %v6843_v44  ;;  %v3006_v22 = vrot.slane %v2992_v10, %v6843_v44  ;;  %v3359_v25 = vrot.slane %v3351_v11, %v6843_v44  ;;  %v3366_v26 = vrot.slane %v3352_v12, %v6843_v44 }
 0x855   :  { %v2960_v46 = vpop.permute.xlu0 %2959  ;;  %v2966_v7 = vpop.permute.xlu1 %2965 }
 0x856   :  { %v3007_v42 = vcombine.low %v2983_v24, %v2999_v60  ;;  %v3008_v43 = vcombine.high %v2983_v24, %v2999_v60  ;;  %v3023_v45 = vcombine.low %v2990_v27, %v3006_v22  ;;  %v3024_v37 = vcombine.high %v2990_v27, %v3006_v22 }
 0x857   :  { %v3367_v47 = vcombine.low %v3343_v23, %v3359_v25  ;;  %v3368_v35 = vcombine.high %v3343_v23, %v3359_v25  ;;  %v3383_v29 = vcombine.low %v3350_v33, %v3366_v26  ;;  %v3384_v36 = vcombine.high %v3350_v33, %v3366_v26 }
 0x858   :  { %v3015_v39 = vrot.slane %v3007_v42, %v6848_v58  ;;  %v3022_v48 = vrot.slane %v3008_v43, %v6848_v58  ;;  %v3031_v49 = vrot.slane %v3023_v45, %v6848_v58  ;;  %v3038_v50 = vrot.slane %v3024_v37, %v6848_v58 }
 0x859   :  { %v3375_v51 = vrot.slane %v3367_v47, %v6848_v58  ;;  %v3382_v52 = vrot.slane %v3368_v35, %v6848_v58  ;;  %v3391_v30 = vrot.slane %v3383_v29, %v6848_v58  ;;  %v3398_v32 = vrot.slane %v3384_v36, %v6848_v58  ;;  %v2972_v1 = vpop.permute.xlu0 %2971 }
 0x85a   :  { %v3111_v55 = vcombine.low %v3015_v39, %v3022_v48  ;;  %v5648_v56 = vcombine.high %v3015_v39, %v3022_v48  ;;  %v3127_v28 = vcombine.low %v3031_v49, %v3038_v50  ;;  %v5649_v34 = vcombine.high %v3031_v49, %v3038_v50 }
 0x85b   :  { %v3471_v57 = vcombine.low %v3375_v51, %v3382_v52  ;;  %v5654_v41 = vcombine.high %v3375_v51, %v3382_v52  ;;  %v3487_v59 = vcombine.low %v3391_v30, %v3398_v32  ;;  %v5655_v61 = vcombine.high %v3391_v30, %v3398_v32 }
 0x85c   :  { %v3118_v62 = vrot.slane %v3111_v55, %v6843_v44  ;;  %v3126_v2 = vrot.slane %v5648_v56, %v6843_v44  ;;  %v3134_v4 = vrot.slane %v3127_v28, %v6843_v44  ;;  %v3142_v5 = vrot.slane %v5649_v34, %v6843_v44 }
 0x85d   :  { %v7358_v8 = vrot.slane %v3471_v57, %v6843_v44  ;;  %v7361_v9 = vrot.slane %v5654_v41, %v6843_v44  ;;  %v7364_v13 = vrot.slane %v3487_v59, %v6843_v44  ;;  %v7367_v14 = vrot.slane %v5655_v61, %v6843_v44 }
 0x85e   :  { %v3143_v17 = vcombine.low %v3118_v62, %v3126_v2  ;;  %v3144_v18 = vcombine.high %v3118_v62, %v3126_v2  ;;  %v3159_v19 = vcombine.low %v3134_v4, %v3142_v5  ;;  %v3160_v20 = vcombine.high %v3134_v4, %v3142_v5 }
 0x85f   :  { %v3043_v16 = vcombine.low %v7316_v31, %v2966_v7  ;;  %v3044_v10 = vcombine.high %v7316_v31, %v2966_v7  ;;  %v3059_v11 = vcombine.low %v2960_v46, %v2972_v1  ;;  %v3060_v12 = vcombine.high %v2960_v46, %v2972_v1 }
 0x860   :  { %v3151_v24 = vrot.slane %v3143_v17, %v6848_v58  ;;  %v3167_v27 = vrot.slane %v3159_v19, %v6848_v58  ;;  %v3158_v60 = vrot.slane %v3144_v18, %v6848_v58  ;;  %v3174_v22 = vrot.slane %v3160_v20, %v6848_v58 }
 0x861   :  { %v3051_v25 = vrot.slane %v3043_v16, %v6843_v44  ;;  %v3058_v26 = vrot.slane %v3044_v10, %v6843_v44  ;;  %v3067_v23 = vrot.slane %v3059_v11, %v6843_v44  ;;  %v3074_v33 = vrot.slane %v3060_v12, %v6843_v44 }
 0x862   :  { %v3175_v42 = vcombine.low %v3151_v24, %v3167_v27  ;;  %v3177_v31 = vcombine.low %v3158_v60, %v3174_v22  ;;  %v3503_v43 = vcombine.low %v7358_v8, %v7361_v9  ;;  %v3519_v45 = vcombine.low %v7364_v13, %v7367_v14 }
 0x863   :  { %v3075_v37 = vcombine.low %v3051_v25, %v3067_v23  ;;  %v3076_v46 = vcombine.high %v3051_v25, %v3067_v23  ;;  %v3091_v47 = vcombine.low %v3058_v26, %v3074_v33  ;;  %v3092_v35 = vcombine.high %v3058_v26, %v3074_v33 }
 0x864   :  { %v3831_v29 = vpack.c.bf16 %v3175_v42, %v3175_v42  ;;  %v3835_v36 = vpack.c.bf16 %v3177_v31, %v3177_v31  ;;  %v3511_v39 = vrot.slane %v3503_v43, %v6848_v58  ;;  %v3527_v48 = vrot.slane %v3519_v45, %v6848_v58 }
 0x865   :  { %v3083_v49 = vrot.slane %v3075_v37, %v6848_v58  ;;  %v3090_v50 = vrot.slane %v3076_v46, %v6848_v58  ;;  %v3099_v51 = vrot.slane %v3091_v47, %v6848_v58  ;;  %v3106_v52 = vrot.slane %v3092_v35, %v6848_v58 }
 0x866   :  { %6011 = vmatmul.mubr.msk.bf16.vlgmr.msra.gmra.mxu1 %vm1381_vm1, %v3831_v29  ;;  %6035 = vmatmul.mubr.msk.bf16.vlgmr.msra.gmra.mxu0 %vm1381_vm1, %v3835_v36  ;;  %v4127_v30 = vsel %vm1381_vm1, %v3845_v40, 0  ;;  %v3535_v32 = vcombine.low %v3511_v39, %v3527_v48  ;;  %v3178_v41 = vcombine.high %v3158_v60, %v3174_v22  ;;  %v3841_v18 = vpack.c.bf16 %v7310_v3, %v7310_v3  ;;  %v215_v29 = vld [vmem:[%s7764_s3] sm:$0x1] }
 0x867   :  { %v3179_v55 = vcombine.low %v3083_v49, %v3090_v50  ;;  %v5650_v56 = vcombine.high %v3083_v49, %v3090_v50  ;;  %v3195_v28 = vcombine.low %v3099_v51, %v3106_v52  ;;  %v5651_v34 = vcombine.high %v3099_v51, %v3106_v52  ;;  %6045 = vmatpush3.bf16.xpose.msra.mxu0 %v4127_v30 }
 0x868   :  { %v3840_v57 = vpack.c.bf16 %v3535_v32, %v3535_v32  ;;  %6016 = vmatprep.mubr.msk.bf16.mxu1 %vm6628_vm0, %v6627_v21  ;;  %6046 = vmatprep.mubr.msk.bf16.mxu0 %vm6628_vm0, %v6627_v21  ;;  %v3837_v5 = vpack.c.bf16 %v3178_v41, %v3178_v41  ;;  %v3943_v20 = vsel %vm1381_vm1, %v3841_v18, 0  ;;  %v3536_v16 = vcombine.high %v3511_v39, %v3527_v48 }
 0x869   :  { %v3186_v59 = vrot.slane %v3179_v55, %v6843_v44  ;;  %v3194_v63 = vrot.slane %v5650_v56, %v6843_v44  ;;  %v3202_v40 = vrot.slane %v3195_v28, %v6843_v44  ;;  %v3210_v61 = vrot.slane %v5651_v34, %v6843_v44  ;;  %6056 = vmatprep.subr.bf16.mxu0 %v6627_v21  ;;  %v216_v55 = vld [vmem:[%s7764_s3 + $0x1] sm:$0x1] }
 0x86a   :  { %v3897_v62 = vsel %vm1381_vm1, %v3840_v57, 0  ;;  %v3504_v10 = vcombine.high %v7358_v8, %v7361_v9  ;;  %v3520_v11 = vcombine.high %v7364_v13, %v7367_v14  ;;  %v3176_v3 = vcombine.high %v3151_v24, %v3167_v27 }
 0x86b   :  { %v3211_v2 = vcombine.low %v3186_v59, %v3194_v63  ;;  %v3227_v4 = vcombine.low %v3202_v40, %v3210_v61  ;;  %6015 = vmatpush3.bf16.xpose.msra.mxu1 %v3897_v62  ;;  %v3842_v12 = vpack.c.bf16 %v3536_v16, %v3536_v16  ;;  %v3212_v13 = vcombine.high %v3186_v59, %v3194_v63 }
 0x86c   :  { %6020 = vmatprep.subr.bf16.mxu1 %v6627_v21  ;;  %v3518_v60 = vrot.slane %v3504_v10, %v6848_v58  ;;  %v3534_v22 = vrot.slane %v3520_v11, %v6848_v58  ;;  %v3833_v25 = vpack.c.bf16 %v3176_v3, %v3176_v3  ;;  %v3228_v14 = vcombine.high %v3202_v40, %v3210_v61 }
 0x86d   :  { %v3219_v7 = vrot.slane %v3211_v2, %v6848_v58  ;;  %v3235_v1 = vrot.slane %v3227_v4, %v6848_v58  ;;  %v3989_v8 = vsel %vm1381_vm1, %v3842_v12, 0  ;;  %v3226_v23 = vrot.slane %v3212_v13, %v6848_v58 }
 0x86e   :  { %6047 = vmatmul.mubr.msk.bf16.vlgmr.msra.gmra.mxu0 %vm1381_vm1, %v3837_v5  ;;  %v3537_v9 = vcombine.low %v3518_v60, %v3534_v22  ;;  %v3242_v33 = vrot.slane %v3228_v14, %v6848_v58  ;;  %v3538_v31 = vcombine.high %v3518_v60, %v3534_v22  ;;  %v217_v36 = vunpack.c.l.bf16 %v215_v29 }
 0x86f   :  { %v3243_v17 = vcombine.low %v3219_v7, %v3235_v1  ;;  %6058 = vmatprep.mubr.msk.bf16.mxu0 %vm6628_vm0, %v6627_v21  ;;  %v3244_v24 = vcombine.high %v3219_v7, %v3235_v1  ;;  %v7448_v39 = vsub.s32 0, %v6840_v38  ;;  %v218_v63 = vunpack.c.l.bf16 %v216_v55 }
 0x870   :  { %v3844_v27 = vpack.c.bf16 %v3537_v9, %v3537_v9  ;;  %v3245_v43 = vcombine.low %v3226_v23, %v3242_v33  ;;  %v3846_v45 = vpack.c.bf16 %v3538_v31, %v3538_v31  ;;  %v3246_v47 = vcombine.high %v3226_v23, %v3242_v33 }
 0x871   :  { %v3832_v19 = vpack.c.bf16 %v3243_v17, %v3243_v17  ;;  %v3834_v26 = vpack.c.bf16 %v3244_v24, %v3244_v24  ;;  %v222_v48 = vrot.slane %v217_v36, %v7448_v39  ;;  %v226_v2 = vrot.slane %v218_v63, %v7448_v39 }
 0x872   :  { %v4081_v42 = vsel %vm1381_vm1, %v3844_v27, 0  ;;  %v3836_v37 = vpack.c.bf16 %v3245_v43, %v3245_v43  ;;  %v4173_v46 = vsel %vm1381_vm1, %v3846_v45, 0  ;;  %v3838_v35 = vpack.c.bf16 %v3246_v47, %v3246_v47 }
 0x873   :  { %6017 = vmatmul.mubr.msk.bf16.vlgmr.msra.gmra.mxu1 %vm1381_vm1, %v3832_v19  ;;  %vm4223_vm8 = vcmp.ne.f32.partialorder %v222_v48, 0.0  ;;  %vm4224_vm9 = vcmp.ne.f32.partialorder %v226_v2, 0.0 }
 0x874   :  { %6021 = vmatpush3.bf16.xpose.msra.mxu1 %v3943_v20  ;;  %6022 = vmatprep.mubr.msk.bf16.mxu1 %vm6628_vm0, %v6627_v21 }
 0x875   :  { %6026 = vmatprep.subr.bf16.mxu1 %v6627_v21 }
 0x87b   :  { %6023 = vmatmul.mubr.msk.bf16.vlgmr.msra.gmra.mxu1 %vm1381_vm1, %v3833_v25 }
 0x87c   :  { %6027 = vmatpush3.bf16.xpose.msra.mxu1 %v3989_v8  ;;  %6028 = vmatprep.mubr.msk.bf16.mxu1 %vm6628_vm0, %v6627_v21 }
 0x87d   :  { %6038 = vmatprep.subr.bf16.mxu1 %v6627_v21 }
 0x883   :  { %6029 = vmatmul.mubr.msk.bf16.vlgmr.msra.gmra.mxu1 %vm1381_vm1, %v3834_v26 }
 0x884   :  { %6039 = vmatpush3.bf16.xpose.msra.mxu1 %v4081_v42  ;;  %6040 = vmatprep.mubr.msk.bf16.mxu1 %vm6628_vm0, %v6627_v21 }
 0x885   :  { %6050 = vmatprep.subr.bf16.mxu1 %v6627_v21 }
 0x88b   :  { %6041 = vmatmul.mubr.msk.bf16.vlgmr.msra.gmra.mxu1 %vm1381_vm1, %v3836_v37 }
 0x88c   :  { %6051 = vmatpush3.bf16.xpose.msra.mxu1 %v4173_v46  ;;  %6052 = vmatprep.mubr.msk.bf16.mxu1 %vm6628_vm0, %v6627_v21 }
 0x88d   :  { %6062 = vmatprep.subr.bf16.mxu1 %v6627_v21 }
 0x893   :  { %6053 = vmatmul.mubr.msk.bf16.vlgmr.msra.gmra.mxu1 %vm1381_vm1, %v3838_v35 }
 0x894   :  { %6064 = vmatprep.mubr.msk.bf16.mxu1 %vm6628_vm0, %v6627_v21 }
 0x926   :  { %v3887_v49 = vpop.f32.mrf.mxu1  ;;  %v4071_v50 = vpop.f32.mrf.mxu0 }
 0x927   :  { %v4215_v51 = vmul.f32 0.17677669, %v3887_v49  ;;  %v4219_v52 = vmul.f32 0.17677669, %v4071_v50 }
 0x928   :  { %v6012_v30 = vpop.f32.mrf.mxu1  ;;  %v6036_v32 = vpop.f32.mrf.mxu0 }
 0x929   :  { %v7455_v56 = vsel %vm4223_vm8, %v4215_v51, -10000.0  ;;  %v7458_v28 = vsel %vm4223_vm8, %v4219_v52, -10000.0  ;;  %v7487_v32 = vpop.permute.xlu1 %3543 }
 0x92a   :  { %v3890_v34 = vpop.f32.mrf.mxu1  ;;  %v4074_v57 = vpop.f32.mrf.mxu0  ;;  %v4237_v41 = vsel %vm1772_vm3, %v7455_v56, -inf  ;;  %v4249_v59 = vsel %vm1772_vm3, %v7458_v28, -inf }
 0x92b   :  { %4238 = vmax.xlane.f32.xlu1 %v4237_v41  ;;  %4250 = vmax.xlane.f32.xlu0 %v4249_v59  ;;  %v7490_v41 = vpop.permute.xlu0 %3541 }
 0x92c   :  { %v6013_v40 = vpop.f32.mrf.mxu1  ;;  %v6037_v61 = vpop.f32.mrf.mxu0 }
 0x92e   :  { %v4163_v62 = vpop.f32.mrf.mxu0 }
 0x92f   :  { %v4221_v17 = vmul.f32 0.17677669, %v4163_v62 }
 0x930   :  { %v6048_v4 = vpop.f32.mrf.mxu0 }
 0x931   :  { %v7468_v11 = vsel %vm4223_vm8, %v4221_v17, -10000.0 }
 0x932   :  { %v4166_v5 = vpop.f32.mrf.mxu0  ;;  %v4255_v60 = vsel %vm1772_vm3, %v7468_v11, -inf }
 0x933   :  { %v3933_v7 = vpop.f32.mrf.mxu1 }
 0x934   :  { %v4216_v1 = vmul.f32 0.17677669, %v3933_v7  ;;  %v6049_v18 = vpop.f32.mrf.mxu0 }
 0x935   :  { %v6018_v19 = vpop.f32.mrf.mxu1 }
 0x936   :  { %v4230_v20 = vsel %vm4224_vm9, %v4216_v1, -10000.0 }
 0x937   :  { %v3936_v16 = vpop.f32.mrf.mxu1  ;;  %v4240_v10 = vsel %vm1772_vm3, %v4230_v20, -inf }
 0x938   :  { %4241 = vmax.xlane.f32.xlu0 %v4240_v10 }
 0x939   :  { %v6019_v3 = vpop.f32.mrf.mxu1 }
 0x93b   :  { %v3979_v12 = vpop.f32.mrf.mxu1 }
 0x93c   :  { %v4217_v22 = vmul.f32 0.17677669, %v3979_v12  ;;  %4256 = vmax.xlane.f32.xlu0 %v4255_v60 }
 0x93d   :  { %v6024_v25 = vpop.f32.mrf.mxu1 }
 0x93e   :  { %v7473_v8 = vsel %vm4223_vm8, %v4217_v22, -10000.0 }
 0x93f   :  { %v3982_v9 = vpop.f32.mrf.mxu1  ;;  %v4243_v13 = vsel %vm1772_vm3, %v7473_v8, -inf }
 0x940   :  { %4244 = vmax.xlane.f32.xlu0 %v4243_v13 }
 0x941   :  { %v6025_v14 = vpop.f32.mrf.mxu1 }
 0x943   :  { %v4025_v24 = vpop.f32.mrf.mxu1 }
 0x944   :  { %v4218_v27 = vmul.f32 0.17677669, %v4025_v24 }
 0x945   :  { %v6030_v26 = vpop.f32.mrf.mxu1 }
 0x946   :  { %v4232_v23 = vsel %vm4224_vm9, %v4218_v27, -10000.0 }
 0x947   :  { %v4028_v33 = vpop.f32.mrf.mxu1  ;;  %v4246_v42 = vsel %vm1772_vm3, %v4232_v23, -inf }
 0x948   :  { %4247 = vmax.xlane.f32.xlu1 %v4246_v42 }
 0x949   :  { %v6031_v31 = vpop.f32.mrf.mxu1 }
 0x94b   :  { %v4117_v43 = vpop.f32.mrf.mxu1 }
 0x94c   :  { %v4220_v45 = vmul.f32 0.17677669, %v4117_v43 }
 0x94d   :  { %v6042_v37 = vpop.f32.mrf.mxu1 }
 0x94e   :  { %v4234_v46 = vsel %vm4224_vm9, %v4220_v45, -10000.0 }
 0x94f   :  { %v4120_v47 = vpop.f32.mrf.mxu1  ;;  %v4252_v35 = vsel %vm1772_vm3, %v4234_v46, -inf }
 0x950   :  { %4253 = vmax.xlane.f32.xlu1 %v4252_v35 }
 0x951   :  { %v6043_v29 = vpop.f32.mrf.mxu1 }
 0x953   :  { %v4209_v36 = vpop.f32.mrf.mxu1 }
 0x954   :  { %v4222_v48 = vmul.f32 0.17677669, %v4209_v36 }
 0x955   :  { %v6054_v49 = vpop.f32.mrf.mxu1 }
 0x956   :  { %3549 = vrot.lane.b32.xlu0 %v7325_v6, %s6618_s0  ;;  %v4236_v50 = vsel %vm4224_vm9, %v4222_v48, -10000.0 }
 0x957   :  { %v4212_v51 = vpop.f32.mrf.mxu1  ;;  %v4258_v52 = vsel %vm1772_vm3, %v4236_v50, -inf }
 0x958   :  { %4259 = vmax.xlane.f32.xlu1 %v4258_v52 }
 0x959   :  { %v6055_v30 = vpop.f32.mrf.mxu1 }
 0x969   :  { %3547 = vrot.lane.b32.xlu1 %v7266_v53, %s6618_s0 }
 0x9b4   :  { %v4239_v55 = vpop.xlane.xlu1 %4238  ;;  %v4251_v59 = vpop.xlane.xlu0 %4250 }
 0x9b5   :  { %v4261_v34 = vsub.f32 %v7455_v56, %v4239_v55  ;;  %v4265_v1 = vsub.f32 %v7458_v28, %v4251_v59 }
 0x9b7   :  { %v4269_v57 = vmul.f32 1.442695, %v4261_v34  ;;  %v4277_v19 = vmul.f32 1.442695, %v4265_v1 }
 0x9b9   :  { %6334 = vpow2.f32 %v4269_v57 }
 0x9c1   :  { %v4242_v63 = vpop.xlane.xlu0 %4241 }
 0x9c2   :  { %v4262_v40 = vsub.f32 %v4230_v20, %v4242_v63 }
 0x9c4   :  { %v4271_v61 = vmul.f32 1.442695, %v4262_v40 }
 0x9c5   :  { %v4257_v17 = vpop.xlane.xlu0 %4256 }
 0x9c6   :  { %v7492_v62 = vpop.eup %6334  ;;  %6336 = vpow2.f32 %v4271_v61  ;;  %v4267_v20 = vsub.f32 %v7468_v11, %v4257_v17 }
 0x9c7   :  { %v4285_v2 = vsel %vm1772_vm3, %v7492_v62, 0.0 }
 0x9c8   :  { %4286 = vadd.xlane.f32.xlu0 %v4285_v2  ;;  %v4281_v10 = vmul.f32 1.442695, %v4267_v20 }
 0x9c9   :  { %v4245_v16 = vpop.xlane.xlu0 %4244 }
 0x9ca   :  { %v4263_v3 = vsub.f32 %v7473_v8, %v4245_v16 }
 0x9cc   :  { %v4273_v60 = vmul.f32 1.442695, %v4263_v3 }
 0x9cd   :  { %v3550_v37 = vpop.permute.xlu0 %3549 }
 0x9ce   :  { %v3627_v47 = vcombine.low %v7325_v6, %v3550_v37  ;;  %v3628_v35 = vcombine.high %v7325_v6, %v3550_v37 }
 0x9d0   :  { %v3635_v49 = vrot.slane %v3627_v47, %v6843_v44 }
 0x9d1   :  { %v4248_v5 = vpop.xlane.xlu1 %4247 }
 0x9d2   :  { %v4264_v7 = vsub.f32 %v4232_v23, %v4248_v5 }
 0x9d3   :  { %v7496_v4 = vpop.eup %6336 }
 0x9d4   :  { %v4288_v56 = vsel %vm1772_vm3, %v7496_v4, 0.0  ;;  %v4275_v18 = vmul.f32 1.442695, %v4264_v7 }
 0x9d5   :  { %4289 = vadd.xlane.f32.xlu1 %v4288_v56 }
 0x9d6   :  { %6338 = vpow2.f32 %v4275_v18 }
 0x9d7   :  { %6340 = vpow2.f32 %v4277_v19 }
 0x9d8   :  { %6342 = vpow2.f32 %v4281_v10 }
 0x9d9   :  { %v4254_v12 = vpop.xlane.xlu1 %4253  ;;  %6344 = vpow2.f32 %v4273_v60 }
 0x9da   :  { %v4266_v22 = vsub.f32 %v4234_v46, %v4254_v12 }
 0x9dc   :  { %v4279_v28 = vmul.f32 1.442695, %v4266_v22 }
 0x9de   :  { %3555 = vrot.lane.b32.xlu0 %v7325_v6, %s6630_s13  ;;  %6346 = vpow2.f32 %v4279_v28 }
 0x9e1   :  { %v4260_v25 = vpop.xlane.xlu1 %4259 }
 0x9e2   :  { %v4268_v13 = vsub.f32 %v4236_v50, %v4260_v25  ;;  %v3642_v50 = vrot.slane %v3628_v35, %v6843_v44 }
 0x9e3   :  { %v7507_v9 = vpop.eup %6338 }
 0x9e4   :  { %v4294_v14 = vsel %vm1772_vm3, %v7507_v9, 0.0  ;;  %v7511_v11 = vpop.eup %6340  ;;  %v4283_v24 = vmul.f32 1.442695, %v4268_v13 }
 0x9e5   :  { %v4297_v8 = vsel %vm1772_vm3, %v7511_v11, 0.0  ;;  %v7515_v27 = vpop.eup %6342  ;;  %v3548_v30 = vpop.permute.xlu1 %3547 }
 0x9e6   :  { %3553 = vrot.lane.b32.xlu1 %v7266_v53, %s6630_s13  ;;  %6348 = vpow2.f32 %v4283_v24  ;;  %v4303_v26 = vsel %vm1772_vm3, %v7515_v27, 0.0  ;;  %v7519_v23 = vpop.eup %6344  ;;  %v3559_v1 = vcombine.low %v7266_v53, %v3548_v30  ;;  %v3560_v16 = vcombine.high %v7266_v53, %v3548_v30 }
 0x9e7   :  { %v4291_v33 = vsel %vm1772_vm3, %v7519_v23, 0.0 }
 0x9e8   :  { %v3567_v25 = vrot.slane %v3559_v1, %v6843_v44 }
 0x9eb   :  { %v7523_v42 = vpop.eup %6346 }
 0x9ec   :  { %v4300_v31 = vsel %vm1772_vm3, %v7523_v42, 0.0 }
 0x9f3   :  { %v7527_v43 = vpop.eup %6348 }
 0x9f4   :  { %v4306_v45 = vsel %vm1772_vm3, %v7527_v43, 0.0 }
 0x9fd   :  { %4295 = vadd.xlane.f32.xlu0 %v4294_v14  ;;  %v3574_v14 = vrot.slane %v3560_v16, %v6843_v44 }
 0xa01   :  { %4298 = vadd.xlane.f32.xlu0 %v4297_v8 }
 0xa05   :  { %4304 = vadd.xlane.f32.xlu0 %v4303_v26 }
 0xa0a   :  { %4292 = vadd.xlane.f32.xlu1 %v4291_v33 }
 0xa0e   :  { %4301 = vadd.xlane.f32.xlu1 %v4300_v31 }
 0xa12   :  { %4307 = vadd.xlane.f32.xlu1 %v4306_v45 }
 0xa51   :  { %v4287_v46 = vpop.xlane.xlu0 %4286 }
 0xa55   :  { %v3556_v29 = vpop.permute.xlu0 %3555 }
 0xa56   :  { %v3643_v36 = vcombine.low %v7487_v32, %v3556_v29  ;;  %v3644_v48 = vcombine.high %v7487_v32, %v3556_v29 }
 0xa58   :  { %v3651_v51 = vrot.slane %v3643_v36, %v6843_v44  ;;  %v3658_v52 = vrot.slane %v3644_v48, %v6843_v44 }
 0xa5a   :  { %v3659_v55 = vcombine.low %v3635_v49, %v3651_v51  ;;  %v3660_v34 = vcombine.high %v3635_v49, %v3651_v51  ;;  %v3675_v57 = vcombine.low %v3642_v50, %v3658_v52  ;;  %v3676_v59 = vcombine.high %v3642_v50, %v3658_v52 }
 0xa5c   :  { %v3667_v6 = vrot.slane %v3659_v55, %v6848_v58  ;;  %v3674_v63 = vrot.slane %v3660_v34, %v6848_v58  ;;  %v3683_v40 = vrot.slane %v3675_v57, %v6848_v58  ;;  %v3690_v32 = vrot.slane %v3676_v59, %v6848_v58 }
 0xa5e   :  { %v3763_v61 = vcombine.low %v3667_v6, %v3674_v63  ;;  %v5658_v2 = vcombine.high %v3667_v6, %v3674_v63  ;;  %v3779_v56 = vcombine.low %v3683_v40, %v3690_v32  ;;  %v5659_v5 = vcombine.high %v3683_v40, %v3690_v32  ;;  %v4290_v7 = vpop.xlane.xlu1 %4289 }
 0xa5f   :  { %6350 = vrcp.f32 %v4290_v7 }
 0xa60   :  { %v7545_v17 = vrot.slane %v3763_v61, %v6843_v44  ;;  %v7548_v18 = vrot.slane %v5658_v2, %v6843_v44  ;;  %v7551_v19 = vrot.slane %v3779_v56, %v6843_v44  ;;  %v7554_v20 = vrot.slane %v5659_v5, %v6843_v44 }
 0xa61   :  { %6352 = vrcp.f32 %v4287_v46 }
 0xa62   :  { %v3554_v10 = vpop.permute.xlu1 %3553  ;;  %v3795_v3 = vcombine.low %v7545_v17, %v7548_v18  ;;  %v3811_v12 = vcombine.low %v7551_v19, %v7554_v20 }
 0xa63   :  { %v3575_v60 = vcombine.low %v7490_v41, %v3554_v10  ;;  %v3576_v22 = vcombine.high %v7490_v41, %v3554_v10 }
 0xa64   :  { %v3803_v28 = vrot.slane %v3795_v3, %v6848_v58  ;;  %v3819_v13 = vrot.slane %v3811_v12, %v6848_v58 }
 0xa65   :  { %v3583_v53 = vrot.slane %v3575_v60, %v6843_v44  ;;  %v3590_v24 = vrot.slane %v3576_v22, %v6843_v44 }
 0xa66   :  { %v3827_v8 = vcombine.low %v3803_v28, %v3819_v13  ;;  %v3828_v36 = vcombine.high %v3803_v28, %v3819_v13 }
 0xa67   :  { %v3591_v26 = vcombine.low %v3567_v25, %v3583_v53  ;;  %v3592_v33 = vcombine.high %v3567_v25, %v3583_v53  ;;  %v3607_v31 = vcombine.low %v3574_v14, %v3590_v24  ;;  %v3608_v45 = vcombine.high %v3574_v14, %v3590_v24 }
 0xa68   :  { %v4334_v37 = vpack.c.bf16 %v3827_v8, %v3827_v8  ;;  %v4336_v6 = vpack.c.bf16 %v3828_v36, %v3828_v36  ;;  %v3812_v25 = vcombine.high %v7551_v19, %v7554_v20 }
 0xa69   :  { %v3599_v41 = vrot.slane %v3591_v26, %v6848_v58  ;;  %v3606_v47 = vrot.slane %v3592_v33, %v6848_v58  ;;  %v3615_v35 = vrot.slane %v3607_v31, %v6848_v58  ;;  %v3622_v29 = vrot.slane %v3608_v45, %v6848_v58 }
 0xa6a   :  { %v4391_v46 = vsel %vm1880_vm5, %v4334_v37, 0  ;;  %v4483_v5 = vsel %vm1880_vm5, %v4336_v6, 0  ;;  %v3826_v13 = vrot.slane %v3812_v25, %v6848_v58 }
 0xa6b   :  { %v3695_v48 = vcombine.low %v3599_v41, %v3606_v47  ;;  %v5656_v49 = vcombine.high %v3599_v41, %v3606_v47  ;;  %v3711_v50 = vcombine.low %v3615_v35, %v3622_v29  ;;  %v5657_v51 = vcombine.high %v3615_v35, %v3622_v29  ;;  %6063 = vmatpush3.bf16.msra.mxu1 %v4391_v46 }
 0xa6c   :  { %v6351_v52 = vpop.eup %6350  ;;  %6074 = vmatprep.subr.bf16.mxu1 %v6627_v21 }
 0xa6d   :  { %v3702_v30 = vrot.slane %v3695_v48, %v6843_v44  ;;  %v3710_v55 = vrot.slane %v5656_v49, %v6843_v44  ;;  %v3718_v34 = vrot.slane %v3711_v50, %v6843_v44  ;;  %v3726_v57 = vrot.slane %v5657_v51, %v6843_v44 }
 0xa6e   :  { %v4318_v59 = vmul.f32 %v6351_v52, %v7496_v4  ;;  %v6353_v56 = vpop.eup %6352 }
 0xa6f   :  { %v3727_v63 = vcombine.low %v3702_v30, %v3710_v55  ;;  %v3743_v40 = vcombine.low %v3718_v34, %v3726_v57  ;;  %v4317_v16 = vmul.f32 %v6353_v56, %v7492_v62  ;;  %v3796_v62 = vcombine.high %v7545_v17, %v7548_v18  ;;  %v6251_v56 = vld [vmem:[#allocation14 + $0x30] sm:$0xff]  }
 0xa70   :  { %v4326_v32 = vpack.c.bf16 %v4318_v59, %v4318_v59  ;;  %v3728_v31 = vcombine.high %v3702_v30, %v3710_v55  ;;  %v3744_v45 = vcombine.high %v3718_v34, %v3726_v57 }
 0xa71   :  { %v3735_v61 = vrot.slane %v3727_v63, %v6848_v58  ;;  %v3751_v2 = vrot.slane %v3743_v40, %v6848_v58  ;;  %v4325_v12 = vpack.c.bf16 %v4317_v16, %v4317_v16  ;;  %v3810_v28 = vrot.slane %v3796_v62, %v6848_v58 }
 0xa72   :  { %6065 = vmatmul.mubr.msk.bf16.vlgmr.msra.gmra.mxu1 %vm1772_vm3, %v4326_v32  ;;  %v3742_v19 = vrot.slane %v3728_v31, %v6848_v58  ;;  %v3758_v20 = vrot.slane %v3744_v45, %v6848_v58 }
 0xa73   :  { %6075 = vmatpush3.bf16.msra.mxu1 %v4483_v5  ;;  %v3759_v7 = vcombine.low %v3735_v61, %v3751_v2  ;;  %v3760_v1 = vcombine.high %v3735_v61, %v3751_v2  ;;  %6076 = vmatprep.mubr.msk.bf16.mxu1 %vm6628_vm0, %v6627_v21  ;;  %v3829_v14 = vcombine.low %v3810_v28, %v3826_v13  ;;  %v6252_v5 = vld [vmem:[#allocation14 + $0x28] sm:$0xff]  }
 0xa74   :  { %6086 = vmatprep.subr.bf16.mxu1 %v6627_v21  ;;  %v3761_v47 = vcombine.low %v3742_v19, %v3758_v20  ;;  %v3830_v36 = vcombine.high %v3810_v28, %v3826_v13  ;;  %v3762_v55 = vcombine.high %v3742_v19, %v3758_v20 }
 0xa75   :  { %v4333_v4 = vpack.c.bf16 %v3759_v7, %v3759_v7  ;;  %v4335_v3 = vpack.c.bf16 %v3760_v1, %v3760_v1  ;;  %v4338_v33 = vpack.c.bf16 %v3829_v14, %v3829_v14  ;;  %v6255_v7 = vld [vmem:[#allocation14 + $0x10] sm:$0xff]  }
 0xa76   :  { %v4337_v46 = vpack.c.bf16 %v3761_v47, %v3761_v47  ;;  %v4340_v30 = vpack.c.bf16 %v3830_v36, %v3830_v36  ;;  %v4339_v6 = vpack.c.bf16 %v3762_v55, %v3762_v55 }
 0xa77   :  { %v4345_v10 = vsel %vm1880_vm5, %v4333_v4, 0  ;;  %v4437_v60 = vsel %vm1880_vm5, %v4335_v3, 0  ;;  %v4575_v18 = vsel %vm1880_vm5, %v4338_v33, 0 }
 0xa78   :  { %6057 = vmatpush3.bf16.msra.mxu0 %v4345_v10  ;;  %v4529_v51 = vsel %vm1880_vm5, %v4337_v46, 0  ;;  %v4667_v59 = vsel %vm1880_vm5, %v4340_v30, 0  ;;  %v4621_v32 = vsel %vm1880_vm5, %v4339_v6, 0 }
 0xa79   :  { %6068 = vmatprep.subr.bf16.mxu0 %v6627_v21 }
 0xa7b   :  { %6059 = vmatmul.mubr.msk.bf16.vlgmr.msra.gmra.mxu0 %vm1772_vm3, %v4325_v12 }
 0xa7c   :  { %6069 = vmatpush3.bf16.msra.mxu0 %v4437_v60  ;;  %6070 = vmatprep.mubr.msk.bf16.mxu0 %vm6628_vm0, %v6627_v21 }
 0xa7d   :  { %6080 = vmatprep.subr.bf16.mxu0 %v6627_v21 }
 0xa86   :  { %v4296_v22 = vpop.xlane.xlu0 %4295 }
 0xa87   :  { %6354 = vrcp.f32 %v4296_v22 }
 0xa8a   :  { %v4299_v8 = vpop.xlane.xlu0 %4298 }
 0xa8e   :  { %v4305_v41 = vpop.xlane.xlu0 %4304 }
 0xa93   :  { %v4293_v53 = vpop.xlane.xlu1 %4292 }
 0xa94   :  { %v6355_v24 = vpop.eup %6354  ;;  %6356 = vrcp.f32 %v4293_v53 }
 0xa95   :  { %v4320_v26 = vmul.f32 %v6355_v24, %v7507_v9  ;;  %6358 = vrcp.f32 %v4299_v8 }
 0xa97   :  { %v4302_v37 = vpop.xlane.xlu1 %4301  ;;  %v4328_v17 = vpack.c.bf16 %v4320_v26, %v4320_v26 }
 0xa98   :  { %6360 = vrcp.f32 %v4302_v37 }
 0xa99   :  { %6077 = vmatmul.mubr.msk.bf16.vlgmr.msra.gmra.mxu1 %vm1772_vm3, %v4328_v17 }
 0xa9a   :  { %6087 = vmatpush3.bf16.msra.mxu1 %v4575_v18  ;;  %6088 = vmatprep.mubr.msk.bf16.mxu1 %vm6628_vm0, %v6627_v21 }
 0xa9b   :  { %v4308_v9 = vpop.xlane.xlu1 %4307  ;;  %6098 = vmatprep.subr.bf16.mxu1 %v6627_v21 }
 0xa9c   :  { %6362 = vrcp.f32 %v4308_v9 }
 0xa9d   :  { %6364 = vrcp.f32 %v4305_v41 }
 0xaa1   :  { %v6357_v35 = vpop.eup %6356 }
 0xaa2   :  { %v4319_v29 = vmul.f32 %v6357_v35, %v7519_v23  ;;  %v6359_v48 = vpop.eup %6358 }
 0xaa3   :  { %v4321_v23 = vmul.f32 %v6359_v48, %v7511_v11 }
 0xaa4   :  { %v4327_v49 = vpack.c.bf16 %v4319_v29, %v4319_v29 }
 0xaa5   :  { %v6361_v50 = vpop.eup %6360 }
 0xaa6   :  { %6071 = vmatmul.mubr.msk.bf16.vlgmr.msra.gmra.mxu0 %vm1772_vm3, %v4327_v49  ;;  %v4322_v52 = vmul.f32 %v6361_v50, %v7523_v42  ;;  %v4329_v42 = vpack.c.bf16 %v4321_v23, %v4321_v23 }
 0xaa7   :  { %6081 = vmatpush3.bf16.msra.mxu0 %v4529_v51  ;;  %6082 = vmatprep.mubr.msk.bf16.mxu0 %vm6628_vm0, %v6627_v21 }
 0xaa8   :  { %v4330_v34 = vpack.c.bf16 %v4322_v52, %v4322_v52  ;;  %6092 = vmatprep.subr.bf16.mxu0 %v6627_v21 }
 0xaa9   :  { %v6363_v57 = vpop.eup %6362 }
 0xaaa   :  { %6089 = vmatmul.mubr.msk.bf16.vlgmr.msra.gmra.mxu1 %vm1772_vm3, %v4330_v34  ;;  %v4324_v63 = vmul.f32 %v6363_v57, %v7527_v43  ;;  %v6365_v40 = vpop.eup %6364  ;;  %v6250_v43 = vld [vmem:[#allocation14 + $0x38] sm:$0xff]  }
 0xaab   :  { %6099 = vmatpush3.bf16.msra.mxu1 %v4667_v59  ;;  %6100 = vmatprep.mubr.msk.bf16.mxu1 %vm6628_vm0, %v6627_v21  ;;  %v4323_v61 = vmul.f32 %v6365_v40, %v7515_v27  ;;  %v6253_v27 = vld [vmem:[#allocation14 + $0x20] sm:$0xff]  }
 0xaac   :  { %v4332_v11 = vpack.c.bf16 %v4324_v63, %v4324_v63 }
 0xaad   :  { %v4331_v2 = vpack.c.bf16 %v4323_v61, %v4323_v61 }
 0xaae   :  { %6083 = vmatmul.mubr.msk.bf16.vlgmr.msra.gmra.mxu0 %vm1772_vm3, %v4329_v42 }
 0xaaf   :  { %6093 = vmatpush3.bf16.msra.mxu0 %v4621_v32  ;;  %6094 = vmatprep.mubr.msk.bf16.mxu0 %vm6628_vm0, %v6627_v21 }
 0xab0   :  { %6104 = vmatprep.subr.bf16.mxu0 %v6627_v21 }
 0xab2   :  { %6101 = vmatmul.mubr.msk.bf16.vlgmr.msra.gmra.mxu1 %vm1772_vm3, %v4332_v11 }
 0xab3   :  { %5294 = vmatprep.mubr.bf16.mxu1 %v6626_v0  ;;  %v6254_v0 = vld [vmem:[#allocation14 + $0x18] sm:$0xff]  }
 0xab6   :  { %6095 = vmatmul.mubr.msk.bf16.vlgmr.msra.gmra.mxu0 %vm1772_vm3, %v4331_v2 }
 0xab7   :  { %6120 = vmatprep.mubr.msk.bf16.mxu0 %vm6628_vm0, %v6627_v21  ;;  %6105 = vmatpush3.bf16.msra.mxu0 %v6250_v43 }
 0xab8   :  { %6106 = vmatprep.subr.bf16.mxu0 %v6627_v21 }
 0xabb   :  { %6107 = vmatpush3.bf16.msra.mxu0 %v6251_v56 }
 0xabc   :  { %6108 = vmatprep.subr.bf16.mxu0 %v6627_v21 }
 0xabf   :  { %6109 = vmatpush3.bf16.msra.mxu0 %v6252_v5 }
 0xac0   :  { %6110 = vmatprep.subr.bf16.mxu0 %v6627_v21 }
 0xac3   :  { %6111 = vmatpush3.bf16.msra.mxu0 %v6253_v27 }
 0xac4   :  { %6112 = vmatprep.subr.bf16.mxu0 %v6627_v21 }
 0xac7   :  { %6113 = vmatpush3.bf16.msra.mxu0 %v6254_v0 }
 0xac8   :  { %6114 = vmatprep.subr.bf16.mxu0 %v6627_v21 }
 0xacb   :  { %6115 = vmatpush3.bf16.msra.mxu0 %v6255_v7 }
 0xacc   :  { %6116 = vmatprep.subr.bf16.mxu0 %v6627_v21 }
 0xb32   :  { %v4427_v1 = vpop.f32.mrf.mxu1 }
 0xb34   :  { %v6066_v4 = vpop.f32.mrf.mxu1 }
 0xb36   :  { %v4430_v16 = vpop.f32.mrf.mxu1 }
 0xb38   :  { %v6067_v10 = vpop.f32.mrf.mxu1 }
 0xb3b   :  { %v4381_v3 = vpop.f32.mrf.mxu0 }
 0xb3d   :  { %v6060_v12 = vpop.f32.mrf.mxu0 }
 0xb3f   :  { %v4384_v60 = vpop.f32.mrf.mxu0 }
 0xb41   :  { %v6061_v22 = vpop.f32.mrf.mxu0 }
 0xb59   :  { %v4519_v62 = vpop.f32.mrf.mxu1 }
 0xb5b   :  { %v6078_v25 = vpop.f32.mrf.mxu1 }
 0xb5d   :  { %v4522_v28 = vpop.f32.mrf.mxu1 }
 0xb5f   :  { %v6079_v13 = vpop.f32.mrf.mxu1 }
 0xb66   :  { %v4473_v14 = vpop.f32.mrf.mxu0 }
 0xb68   :  { %v6072_v53 = vpop.f32.mrf.mxu0 }
 0xb6a   :  { %v4476_v24 = vpop.f32.mrf.mxu0  ;;  %v4611_v8 = vpop.f32.mrf.mxu1 }
 0xb6b   :  { %v4777_v18 = vcombine.low %v4427_v1, %v4611_v8  ;;  %v4778_v19 = vcombine.high %v4427_v1, %v4611_v8 }
 0xb6c   :  { %v6073_v26 = vpop.f32.mrf.mxu0  ;;  %v6090_v33 = vpop.f32.mrf.mxu1 }
 0xb6d   :  { %v4785_v46 = vrot.slane %v4777_v18, %v6843_v44  ;;  %v4792_v36 = vrot.slane %v4778_v19, %v6843_v44 }
 0xb6e   :  { %v4565_v31 = vpop.f32.mrf.mxu0  ;;  %v4614_v45 = vpop.f32.mrf.mxu1 }
 0xb6f   :  { %v4709_v50 = vcombine.low %v4381_v3, %v4565_v31  ;;  %v4710_v51 = vcombine.high %v4381_v3, %v4565_v31 }
 0xb70   :  { %v6084_v37 = vpop.f32.mrf.mxu0  ;;  %v6091_v17 = vpop.f32.mrf.mxu1 }
 0xb71   :  { %v4717_v2 = vrot.slane %v4709_v50, %v6843_v44  ;;  %v4724_v43 = vrot.slane %v4710_v51, %v6843_v44 }
 0xb72   :  { %v4568_v20 = vpop.f32.mrf.mxu0  ;;  %v4703_v9 = vpop.f32.mrf.mxu1 }
 0xb73   :  { %v4793_v41 = vcombine.low %v4519_v62, %v4703_v9  ;;  %v4794_v47 = vcombine.high %v4519_v62, %v4703_v9  ;;  %v6256_v9 = vld [vmem:[#allocation14 + $0x8] sm:$0xff]  }
 0xb74   :  { %v6085_v35 = vpop.f32.mrf.mxu0  ;;  %v6102_v29 = vpop.f32.mrf.mxu1  ;;  %6117 = vmatpush3.bf16.msra.mxu0 %v6256_v9  ;;  %v6272_v9 = vld [vmem:[#allocation16 + $0x34] ss:$8 sps:$4 sm:$0xff]  }
 0xb75   :  { %v4801_v48 = vrot.slane %v4793_v41, %v6843_v44  ;;  %v4808_v49 = vrot.slane %v4794_v47, %v6843_v44  ;;  %6118 = vmatprep.subr.bf16.mxu0 %v6627_v21 }
 0xb76   :  { %v4657_v52 = vpop.f32.mrf.mxu0  ;;  %v4706_v30 = vpop.f32.mrf.mxu1 }
 0xb77   :  { %v4809_v55 = vcombine.low %v4785_v46, %v4801_v48  ;;  %v4810_v34 = vcombine.high %v4785_v46, %v4801_v48  ;;  %v4825_v23 = vcombine.low %v4792_v36, %v4808_v49  ;;  %v4826_v57 = vcombine.high %v4792_v36, %v4808_v49 }
 0xb78   :  { %v4725_v59 = vcombine.low %v4473_v14, %v4657_v52  ;;  %v4726_v6 = vcombine.high %v4473_v14, %v4657_v52  ;;  %v6096_v42 = vpop.f32.mrf.mxu0  ;;  %v6103_v63 = vpop.f32.mrf.mxu1 }
 0xb79   :  { %v4817_v40 = vrot.slane %v4809_v55, %v6848_v58  ;;  %v4824_v32 = vrot.slane %v4810_v34, %v6848_v58  ;;  %v4833_v11 = vrot.slane %v4825_v23, %v6848_v58  ;;  %v4840_v61 = vrot.slane %v4826_v57, %v6848_v58  ;;  %v6257_v23 = vld [vmem:[#allocation14] sm:$0xff]  }
 0xb7a   :  { %v4733_v56 = vrot.slane %v4725_v59, %v6843_v44  ;;  %v4740_v5 = vrot.slane %v4726_v6, %v6843_v44  ;;  %v4660_v27 = vpop.f32.mrf.mxu0  ;;  %6119 = vmatpush3.bf16.msra.mxu0 %v6257_v23  ;;  %v6290_v23 = vld [vmem:[#allocation17 + $0x58] sm:$0xff]  }
 0xb7b   :  { %v4913_v0 = vcombine.low %v4817_v40, %v4824_v32  ;;  %v5678_v7 = vcombine.high %v4817_v40, %v4824_v32  ;;  %v4929_v1 = vcombine.low %v4833_v11, %v4840_v61  ;;  %v5679_v4 = vcombine.high %v4833_v11, %v4840_v61 }
 0xb7c   :  { %v4741_v16 = vcombine.low %v4717_v2, %v4733_v56  ;;  %v4742_v10 = vcombine.high %v4717_v2, %v4733_v56  ;;  %v4757_v3 = vcombine.low %v4724_v43, %v4740_v5  ;;  %v4758_v12 = vcombine.high %v4724_v43, %v4740_v5  ;;  %v6097_v60 = vpop.f32.mrf.mxu0 }
 0xb7d   :  { %v4920_v22 = vrot.slane %v4913_v0, %v6843_v44  ;;  %v4928_v62 = vrot.slane %v5678_v7, %v6843_v44  ;;  %v4936_v25 = vrot.slane %v4929_v1, %v6843_v44  ;;  %v4944_v28 = vrot.slane %v5679_v4, %v6843_v44 }
 0xb7e   :  { %v4749_v13 = vrot.slane %v4741_v16, %v6848_v58  ;;  %v4756_v14 = vrot.slane %v4742_v10, %v6848_v58  ;;  %v4765_v53 = vrot.slane %v4757_v3, %v6848_v58  ;;  %v4772_v24 = vrot.slane %v4758_v12, %v6848_v58 }
 0xb7f   :  { %v4946_v8 = vcombine.high %v4920_v22, %v4928_v62  ;;  %v4962_v26 = vcombine.high %v4936_v25, %v4944_v28  ;;  %v4945_v33 = vcombine.low %v4920_v22, %v4928_v62  ;;  %v4961_v31 = vcombine.low %v4936_v25, %v4944_v28  ;;  %v5680_v62 = vld [vmem:[%s7734_s10] ss:$0 sm:$0xff] }
 0xb80   :  { %v4845_v45 = vcombine.low %v4749_v13, %v4756_v14  ;;  %v5676_v37 = vcombine.high %v4749_v13, %v4756_v14  ;;  %v4861_v17 = vcombine.low %v4765_v53, %v4772_v24  ;;  %v5677_v18 = vcombine.high %v4765_v53, %v4772_v24 }
 0xb81   :  { %v4953_v19 = vrot.slane %v4945_v33, %v6848_v58  ;;  %v4969_v20 = vrot.slane %v4961_v31, %v6848_v58  ;;  %v4960_v46 = vrot.slane %v4946_v8, %v6848_v58  ;;  %v4976_v36 = vrot.slane %v4962_v26, %v6848_v58 }
 0xb82   :  { %v4852_v41 = vrot.slane %v4845_v45, %v6843_v44  ;;  %v4860_v47 = vrot.slane %v5676_v37, %v6843_v44  ;;  %v4868_v35 = vrot.slane %v4861_v17, %v6843_v44  ;;  %v4876_v29 = vrot.slane %v5677_v18, %v6843_v44  ;;  %v6258_v45 = vld [vmem:[#allocation16 + $0x70] ss:$8 sps:$4 sm:$0xff]   ;;  %v6263_v37 = vld [vmem:[#allocation16 + $0x64] ss:$8 sps:$4 sm:$0xff]   ;;  %v6261_v17 = vld [vmem:[#allocation16 + $0x60] ss:$8 sps:$4 sm:$0xff]  }
 0xb83   :  { %v4977_v48 = vcombine.low %v4953_v19, %v4969_v20  ;;  %v4979_v57 = vcombine.low %v4960_v46, %v4976_v36  ;;  %v4978_v42 = vcombine.high %v4953_v19, %v4969_v20  ;;  %v4980_v21 = vcombine.high %v4960_v46, %v4976_v36  ;;  %v6266_v18 = vld [vmem:[#allocation16 + $0x54] ss:$8 sps:$4 sm:$0xff]   ;;  %v6269_v19 = vld [vmem:[#allocation16 + $0x44] ss:$8 sps:$4 sm:$0xff]   ;;  %v6267_v20 = vld [vmem:[#allocation16 + $0x40] ss:$8 sps:$4 sm:$0xff]  }
 0xb84   :  { %v4878_v49 = vcombine.high %v4852_v41, %v4860_v47  ;;  %v4894_v50 = vcombine.high %v4868_v35, %v4876_v29  ;;  %v4877_v51 = vcombine.low %v4852_v41, %v4860_v47  ;;  %v4893_v52 = vcombine.low %v4868_v35, %v4876_v29  ;;  %v6270_v41 = vld [vmem:[#allocation16 + $0x30] ss:$8 sps:$4 sm:$0xff]   ;;  %v6275_v47 = vld [vmem:[#allocation16 + $0x24] ss:$8 sps:$4 sm:$0xff]   ;;  %v6273_v35 = vld [vmem:[#allocation16 + $0x20] ss:$8 sps:$4 sm:$0xff]  }
 0xb85   :  { %v6278_v29 = vld [vmem:[#allocation16 + $0x14] ss:$8 sps:$4 sm:$0xff]   ;;  %v6276_v46 = vld [vmem:[#allocation16 + $0x10] ss:$8 sps:$4 sm:$0xff]   ;;  %v6281_v36 = vld [vmem:[#allocation16 + $0x4] ss:$8 sps:$4 sm:$0xff]  }
 0xb86   :  { %v4892_v30 = vrot.slane %v4878_v49, %v6848_v58  ;;  %v4908_v55 = vrot.slane %v4894_v50, %v6848_v58  ;;  %v4885_v34 = vrot.slane %v4877_v51, %v6848_v58  ;;  %v4901_v44 = vrot.slane %v4893_v52, %v6848_v58  ;;  %v6282_v49 = vld [vmem:[#allocation17 + $0x78] sm:$0xff]   ;;  %v6284_v51 = vld [vmem:[#allocation17 + $0x70] sm:$0xff]  }
 0xb87   :  { %v6283_v50 = vld [vmem:[#allocation17 + $0x38] sm:$0xff]   ;;  %5830 = vmatprep.subr.bf16.mxu0 %v6282_v49  ;;  %v6285_v52 = vld [vmem:[#allocation17 + $0x30] sm:$0xff]  }
 0xb88   :  { %v4911_v59 = vcombine.low %v4892_v30, %v4908_v55  ;;  %v4910_v6 = vcombine.high %v4885_v34, %v4901_v44  ;;  %v4909_v63 = vcombine.low %v4885_v34, %v4901_v44  ;;  %v4912_v11 = vcombine.high %v4892_v30, %v4908_v55  ;;  %v6286_v30 = vld [vmem:[#allocation17 + $0x68] sm:$0xff]   ;;  %v6288_v34 = vld [vmem:[#allocation17 + $0x60] sm:$0xff]  }
 0xb89   :  { %v6287_v55 = vld [vmem:[#allocation17 + $0x28] sm:$0xff]   ;;  %v6289_v44 = vld [vmem:[#allocation17 + $0x20] sm:$0xff]  }
 0xb8a   :  { %v6168_v40 = vpack.i.bf16 %v4979_v57, %v4911_v59  ;;  %v6163_v32 = vpack.i.bf16 %v4978_v42, %v4910_v6  ;;  %v6173_v61 = vpack.i.bf16 %v4980_v21, %v4912_v11  ;;  %v6291_v57 = vld [vmem:[#allocation17 + $0x18] sm:$0xff]  }
 0xb8c   :  { %6169 = vrot.lane.b32.xlu1 %v6168_v40, %s6618_s0  ;;  %6164 = vrot.lane.b32.xlu0 %v6163_v32, %s6630_s13 }
 0xb90   :  { %6174 = vrot.lane.b32.xlu1 %v6173_v61, %s6629_s11  ;;  %s6633_s11 = smov [#allocation19]  }
 0xb91   :  { %s5540_s13 = sshll.u32 %s6633_s11, 4  ;;  %s5541_s13 = int_to_ptr.vmem [resolvable:$true] %s5540_s13 }
 0xb92   :  { %s6576_s4 = scalar_lea.vmem %s5541_s13, 256  ;;  %p6581_p9 = scmp.lt.s32.totalorder %s5541_s13, %s5541_s13 }
 0xb93   :  { %p6577_p8 = scmp.ne.s32.totalorder %s5541_s13, %s6576_s4  ;;  %p6582_p10 = scmp.lt.s32.totalorder %s6576_s4, %s6576_s4 }
 0xb95   :  { %p6583_p11 = por %p6582_p10, %p6581_p9 }
 0xb97   :  { %p6584_p12 = pnand %p6583_p11, %p6577_p8 }
 0xbfe   :  { %v6170_v2 = vpop.permute.xlu1 %6169  ;;  %v6165_v58 = vpop.permute.xlu0 %6164 }
 0xbff   :  { %v6167_v43 = vunpack.i.h.bf16 %v6165_v58  ;;  %v6166_v56 = vunpack.i.l.bf16 %v6165_v58  ;;  %v6172_v5 = vunpack.i.h.bf16 %v6170_v2  ;;  %v6171_v27 = vunpack.i.l.bf16 %v6170_v2 }
 0xc01   :  { %v5006_v0 = vsel %vm1381_vm1, %v4977_v48, %v6167_v43  ;;  %v5005_v7 = vsel %vm1381_vm1, %v4909_v63, %v6166_v56  ;;  %v6279_v48 = vld [vmem:[#allocation16] ss:$8 sps:$4 sm:$0xff]  }
 0xc02   :  { %v6175_v1 = vpop.permute.xlu1 %6174  ;;  %v5007_v10 = vsel %vm2544_vm6, %v5005_v7, %v6171_v27  ;;  %v5008_v3 = vsel %vm2544_vm6, %v5006_v0, %v6172_v5 }
 0xc03   :  { %v6177_v4 = vunpack.i.h.bf16 %v6175_v1  ;;  %v6176_v16 = vunpack.i.l.bf16 %v6175_v1  ;;  %v5689_v1 = vld [vmem:[%s7741_s17] ss:$0 sm:$0xff] }
 0xc05   :  { %v5009_v12 = vsel %vm2547_vm7, %v5007_v10, %v6176_v16  ;;  %v5010_v60 = vsel %vm2547_vm7, %v5008_v3, %v6177_v4 }
 0xc06   :  { %v5011_v22 = vpack.c.bf16 %v5010_v60, %v5009_v12  ;;  %v5690_v12 = vld [vmem:[%s7742_s18] ss:$0 sm:$0xff] }
 0xc08   :  { %6121 = vmatmul.mubr.bf16.vlgmr.msra.gmra.mxu0 %v5011_v22 }
 0xc09   :  { %5831 = vmatpush3.bf16.msra.mxu0 %v6283_v50 }
 0xc0a   :  { %5832 = vmatprep.subr.bf16.mxu0 %v6284_v51 }
 0xc0d   :  { %5833 = vmatpush3.bf16.msra.mxu0 %v6285_v52 }
 0xc0e   :  { %5834 = vmatprep.subr.bf16.mxu0 %v6286_v30 }
 0xc11   :  { %5835 = vmatpush3.bf16.msra.mxu0 %v6287_v55 }
 0xc12   :  { %5836 = vmatprep.subr.bf16.mxu0 %v6288_v34 }
 0xc15   :  { %5837 = vmatpush3.bf16.msra.mxu0 %v6289_v44 }
 0xc16   :  { %5838 = vmatprep.subr.bf16.mxu0 %v6290_v23 }
 0xc19   :  { %5839 = vmatpush3.bf16.msra.mxu0 %v6291_v57 }
 0xcc8   :  { %v5100_v25 = vpop.f32.mrf.mxu0 }
 0xcc9   :  { %v5101_v28 = vadd.f32 %v5680_v62, %v5100_v25 }
 0xcca   :  { %v6122_v13 = vpop.f32.mrf.mxu0 }
 0xccb   :  { %v7685_v14 = vadd.f32 %v5101_v28, %v7282_v15  ;;  %v6260_v15 = vld [vmem:[#allocation16 + $0x74] ss:$8 sps:$4 sm:$0xff]  }
 0xccc   :  { %v5103_v53 = vpop.f32.mrf.mxu0  ;;  %5262 = vmatprep.subr.bf16.mxu1 %v6260_v15  ;;  %v6292_v28 = vld [vmem:[#allocation17 + $0x50] sm:$0xff]  }
 0xccd   :  { %v5104_v24 = vadd.f32 %v5680_v62, %v5103_v53  ;;  %5111 = vadd.xlane.f32.xlu0 %v7685_v14  ;;  %v5117_v33 = vmul.f32 %v7685_v14, %v7685_v14  ;;  %5263 = vmatpush1.bf16.msra.mxu1 %v6258_v45  ;;  %v6293_v13 = vld [vmem:[#allocation17 + $0x10] sm:$0xff]   ;;  %v6295_v53 = vld [vmem:[#allocation17 + $0x8] sm:$0xff]  }
 0xcce   :  { %v6123_v8 = vpop.f32.mrf.mxu0  ;;  %5264 = vmatprep.subr.bf16.mxu1 %v6263_v37  ;;  %5840 = vmatprep.subr.bf16.mxu0 %v6292_v28 }
 0xccf   :  { %v7689_v26 = vadd.f32 %v5104_v24, %v7284_v54  ;;  %v6264_v54 = vld [vmem:[#allocation16 + $0x50] ss:$8 sps:$4 sm:$0xff]   ;;  %5841 = vmatpush3.bf16.msra.mxu0 %v6293_v13  ;;  %v6296_v24 = vld [vmem:[#allocation17 + $0x40] sm:$0xff]  }
 0xcd0   :  { %v6297_v8 = vld [vmem:[#allocation17] sm:$0xff]  }
 0xcd1   :  { %5119 = vadd.xlane.f32.xlu0 %v5117_v33  ;;  %5113 = vadd.xlane.f32.xlu1 %v7689_v26  ;;  %v5118_v31 = vmul.f32 %v7689_v26, %v7689_v26  ;;  %v5170_v33 = vld [vmem:[%s7736_s12] sm:$0x3] }
 0xcd2   :  { %5265 = vmatpush1.bf16.msra.mxu1 %v6261_v17  ;;  %v5175_v45 = vrot.slane %v5170_v33, %v7448_v39  ;;  %v5707_v39 = vld [vmem:[%s7738_s14] ss:$0 sm:$0xff] }
 0xcd3   :  { %5266 = vmatprep.subr.bf16.mxu1 %v6266_v18 }
 0xcd5   :  { %5121 = vadd.xlane.f32.xlu0 %v5118_v31 }
 0xcd6   :  { %5267 = vmatpush1.bf16.msra.mxu1 %v6264_v54 }
 0xcd7   :  { %5268 = vmatprep.subr.bf16.mxu1 %v6269_v19 }
 0xcda   :  { %5269 = vmatpush1.bf16.msra.mxu1 %v6267_v20 }
 0xcdb   :  { %5270 = vmatprep.subr.bf16.mxu1 %v6272_v9 }
 0xcde   :  { %5271 = vmatpush1.bf16.msra.mxu1 %v6270_v41 }
 0xcdf   :  { %5272 = vmatprep.subr.bf16.mxu1 %v6275_v47 }
 0xce2   :  { %5273 = vmatpush1.bf16.msra.mxu1 %v6273_v35 }
 0xce3   :  { %5274 = vmatprep.subr.bf16.mxu1 %v6278_v29 }
 0xce6   :  { %5275 = vmatpush1.bf16.msra.mxu1 %v6276_v46 }
 0xce7   :  { %5276 = vmatprep.subr.bf16.mxu1 %v6281_v36 }
 0xcea   :  { %5277 = vmatpush1.bf16.msra.mxu1 %v6279_v48 }
 0xd56   :  { %v5112_v59 = vpop.xlane.xlu0 %5111 }
 0xd57   :  { %v5115_v6 = vmul.f32 0.0078125, %v5112_v59 }
 0xd59   :  { %v5125_v40 = vmul.f32 %v5115_v6, %v5115_v6  ;;  %v5129_v27 = vsub.f32 %v7685_v14, %v5115_v6  ;;  %v6294_v14 = vld [vmem:[#allocation17 + $0x48] sm:$0xff]  }
 0xd5a   :  { %v5120_v42 = vpop.xlane.xlu0 %5119  ;;  %v5114_v63 = vpop.xlane.xlu1 %5113  ;;  %5842 = vmatprep.subr.bf16.mxu0 %v6294_v14 }
 0xd5b   :  { %v5123_v32 = vmul.f32 0.0078125, %v5120_v42  ;;  %v5116_v11 = vmul.f32 0.0078125, %v5114_v63  ;;  %5843 = vmatpush3.bf16.msra.mxu0 %v6295_v53 }
 0xd5c   :  { %5844 = vmatprep.subr.bf16.mxu0 %v6296_v24 }
 0xd5d   :  { %v5127_v21 = vsub.f32 %v5123_v32, %v5125_v40  ;;  %v5126_v58 = vmul.f32 %v5116_v11, %v5116_v11  ;;  %v5130_v4 = vsub.f32 %v7689_v26, %v5116_v11  ;;  %v5178_v26 = vsub.s32 1, %v6840_v38 }
 0xd5e   :  { %v5122_v61 = vpop.xlane.xlu0 %5121 }
 0xd5f   :  { %v5131_v2 = vadd.f32 1e-05, %v5127_v21  ;;  %v5124_v43 = vmul.f32 0.0078125, %v5122_v61  ;;  %5845 = vmatpush3.bf16.msra.mxu0 %v6297_v8  ;;  %v5179_v15 = vrot.slane %v5170_v33, %v5178_v26 }
 0xd61   :  { %6366 = vrsqrt.f32 %v5131_v2  ;;  %v5128_v56 = vsub.f32 %v5124_v43, %v5126_v58 }
 0xd63   :  { %v5132_v5 = vadd.f32 1e-05, %v5128_v56 }
 0xd65   :  { %6368 = vrsqrt.f32 %v5132_v5 }
 0xd6e   :  { %v6367_v0 = vpop.eup %6366 }
 0xd6f   :  { %v5135_v7 = vmul.f32 %v6367_v0, %v5129_v27 }
 0xd71   :  { %v5143_v3 = vmul.f32 %v5689_v1, %v5135_v7  ;;  %v5724_v7 = vld [vmem:[%s7743_s19] ss:$0 sm:$0xff] }
 0xd72   :  { %v6369_v16 = vpop.eup %6368 }
 0xd73   :  { %v5136_v10 = vmul.f32 %v6369_v16, %v5130_v4  ;;  %v5151_v22 = vadd.f32 %v5690_v12, %v5143_v3  ;;  %v5725_v4 = vld [vmem:[%s7765_s1] ss:$0 sm:$0xff] }
 0xd75   :  { %v5144_v60 = vmul.f32 %v5689_v1, %v5136_v10 }
 0xd77   :  { %v5152_v62 = vadd.f32 %v5690_v12, %v5144_v60 }
 0xd79   :  { %v5153_v25 = vpack.c.bf16 %v5152_v62, %v5151_v22 }
 0xd7b   :  { %5295 = vmatmul.mubr.bf16.vlgmr.msra.gmra.mxu1 %v5153_v25 }
 0xe3b   :  { %v5296_v31 = vpop.f32.mrf.mxu1 }
 0xe3c   :  { %v5297_v19 = vadd.f32 %v5296_v31, %v5175_v45 }
 0xe3d   :  { %v5298_v37 = vpop.f32.mrf.mxu1 }
 0xe3e   :  { %v5299_v18 = vadd.f32 %v5298_v37, %v5179_v15  ;;  %v5305_v29 = vmax.f32 %v5297_v19, 0.0 }
 0xe3f   :  { %v5300_v17 = vpop.f32.mrf.mxu1 }
 0xe40   :  { %v5301_v54 = vadd.f32 %v5300_v17, %v5175_v45  ;;  %v5306_v47 = vmax.f32 %v5299_v18, 0.0 }
 0xe41   :  { %v5302_v20 = vpop.f32.mrf.mxu1 }
 0xe42   :  { %v5303_v9 = vadd.f32 %v5302_v20, %v5179_v15  ;;  %v5307_v41 = vmax.f32 %v5301_v54, 0.0 }
 0xe44   :  { %v5308_v35 = vmax.f32 %v5303_v9, 0.0  ;;  %v5309_v46 = vpack.c.bf16 %v5307_v41, %v5305_v29 }
 0xe46   :  { %v5310_v38 = vpack.c.bf16 %v5308_v35, %v5306_v47 }
 0xe48   :  { %5478 = vmatprep.mubr.bf16.mxu0 %v5310_v38 }
 0xe49   :  { %5479 = vmatmul.mubr.bf16.vlgmr.msra.gmra.mxu0 %v5309_v46 }
 0xf09   :  { %v5846_v36 = vpop.f32.mrf.mxu0 }
 0xf0b   :  { %v5847_v48 = vpop.f32.mrf.mxu0 }
 0xf0c   :  { %v5848_v49 = vadd.f32 %v5847_v48, %v5846_v36 }
 0xf0d   :  { %v5849_v50 = vpop.f32.mrf.mxu0 }
 0xf0e   :  { %v5481_v51 = vadd.f32 %v5848_v49, %v5707_v39 }
 0xf0f   :  { %v5850_v52 = vpop.f32.mrf.mxu0 }
 0xf10   :  { %v5851_v30 = vadd.f32 %v5850_v52, %v5849_v50  ;;  %v5487_v55 = vadd.f32 %v5481_v51, %v5151_v22 }
 0xf12   :  { %v5484_v34 = vadd.f32 %v5851_v30, %v5707_v39  ;;  %5491 = vadd.xlane.f32.xlu1 %v5487_v55  ;;  %v5497_v23 = vmul.f32 %v5487_v55, %v5487_v55 }
 0xf14   :  { %v5488_v44 = vadd.f32 %v5484_v34, %v5152_v62 }
 0xf16   :  { %5493 = vadd.xlane.f32.xlu0 %v5488_v44  ;;  %5499 = vadd.xlane.f32.xlu1 %v5497_v23  ;;  %v5498_v57 = vmul.f32 %v5488_v44, %v5488_v44 }
 0xf1a   :  { %5501 = vadd.xlane.f32.xlu0 %v5498_v57 }
 0xf9b   :  { %v5492_v59 = vpop.xlane.xlu1 %5491 }
 0xf9c   :  { %v5495_v6 = vmul.f32 0.0078125, %v5492_v59 }
 0xf9e   :  { %v5505_v40 = vmul.f32 %v5495_v6, %v5495_v6  ;;  %v5509_v27 = vsub.f32 %v5487_v55, %v5495_v6 }
 0xf9f   :  { %v5494_v42 = vpop.xlane.xlu0 %5493  ;;  %v5500_v63 = vpop.xlane.xlu1 %5499 }
 0xfa0   :  { %v5496_v32 = vmul.f32 0.0078125, %v5494_v42  ;;  %v5503_v11 = vmul.f32 0.0078125, %v5500_v63 }
 0xfa2   :  { %v5507_v21 = vsub.f32 %v5503_v11, %v5505_v40  ;;  %v5506_v2 = vmul.f32 %v5496_v32, %v5496_v32  ;;  %v5510_v16 = vsub.f32 %v5488_v44, %v5496_v32 }
 0xfa3   :  { %v5502_v61 = vpop.xlane.xlu0 %5501 }
 0xfa4   :  { %v5511_v58 = vadd.f32 1e-05, %v5507_v21  ;;  %v5504_v43 = vmul.f32 0.0078125, %v5502_v61 }
 0xfa6   :  { %6370 = vrsqrt.f32 %v5511_v58  ;;  %v5508_v56 = vsub.f32 %v5504_v43, %v5506_v2 }
 0xfa8   :  { %v5512_v5 = vadd.f32 1e-05, %v5508_v56 }
 0xfaa   :  { %6372 = vrsqrt.f32 %v5512_v5 }
 0xfb3   :  { %v6371_v0 = vpop.eup %6370 }
 0xfb4   :  { %v5515_v1 = vmul.f32 %v6371_v0, %v5509_v27 }
 0xfb6   :  { %v5523_v10 = vmul.f32 %v5724_v7, %v5515_v1 }
 0xfb7   :  { %v6373_v3 = vpop.eup %6372 }
 0xfb8   :  { %v5516_v12 = vmul.f32 %v6373_v3, %v5510_v16  ;;  %v5531_v60 = vadd.f32 %v5725_v4, %v5523_v10 }
 0xfba   :  { %v5524_v22 = vmul.f32 %v5724_v7, %v5516_v12  ;;  %5533 = vst [vmem:[#allocation19] sm:$0xff] %v5531_v60 }
 0xfbc   :  { %v5532_v62 = vadd.f32 %v5725_v4, %v5524_v22 }
 0xfbe   :  { %5534 = vst [vmem:[#allocation19 + $0x8] sm:$0xff] %v5532_v62 }
 0xfbf   :  { %6587 = shalt.err (!%p6584_p12)
}
 0xfc0   :  { %s7766_s6 = sld [smem:[#allocation34_spill]] }
 0xfc6   :  { %5546 = dma.vmem_to_hbm [thread:$0]  %s5541_s13, 256, %s7766_s6, [#allocation4], %s6612_s28, %s6612_s28, %s6613_s29  }
 0xfc7   :  { %6608 = dma.done.wait [#allocation4], 256  }
 0xfc8   :  { %6609 = vsyncadd [#allocation4], 4294967040 }
 0xfc9   :  { %5550 = vsyncpa [#allocation3], 1 }
 0xfca   :  { %5551 = vsyncpa [#allocation6], 1 }
 0xfcb   :  { %5552 = vsyncpa [#allocation9], 1 }
 0xfcc   :  { %5553 = vsyncpa [#allocation12], 1 }
 0xfcd   :  { %5554 = vsyncpa [#allocation15], 1 }
 0xfce   :  { %5555 = vsyncpa [#allocation18], 1 }
 0xfcf   :  { %5556 = vsyncpa [#allocation4], 1 }

</bundles_post_ra>
